<compile_context>
chip_gen: v7x
topology: tpu7x:2x2x1
jax: 0.10.0
libtpu: 0.0.40
codegen_flags: <defaults>
</compile_context>

<pallas_src>
import functools

import jax
import jax.numpy as jnp
import numpy as np
from jax.experimental import pallas as pl
from jax.experimental.pallas import tpu as pltpu


# ----------------------------- activations ---------------------------------
def _hardswish(x):
    # x * hardtanh(x + 3, 0, 6) / 6
    return x * jnp.clip(x + 3.0, 0.0, 6.0) * (1.0 / 6.0)


def _leaky_relu(x, slope=0.1):
    return jnp.where(x >= 0.0, x, slope * x)


def _round_up(c, m=128):
    return ((c + m - 1) // m) * m


def _vmem_capacity_bytes():
    """Generation-aware VMEM capacity (v5e/v6e: 128 MiB per TC, v7x: 64 MiB)."""
    try:
        info = pltpu.get_tpu_info()
        cap = getattr(info, "vmem_capacity_bytes", None)
        if cap:
            return int(cap)
    except Exception:
        pass
    return 64 * 1024 * 1024      # conservative fallback (v7x-sized)


# ------------------------------ Pallas kernel -------------------------------
def _bottleneck_csp_kernel(x_c_ref, x_t_ref, x_b_ref,
                           w12_ref, b1_ref, b2_ref,
                           wb1_ref, bb1_ref,
                           wb2_ref, bb2_ref,
                           w3_ref, b3_ref,
                           w4_ref, b4_ref,
                           o_ref, *, group_taps):
    R = x_c_ref.shape[1]            # pixels in this tile (= th image rows * W)
    W = x_t_ref.shape[1]            # image width (halo blocks are one image row)
    Cp = wb1_ref.shape[0]           # lane-padded hidden width c_
    Rext = R + 2 * W
    f32 = jnp.float32

    h = pl.program_id(1)
    n_h = pl.num_programs(1)

    # ---- assemble tile + one-image-row halo above/below (bf16 activations) --
    x_ext = jnp.concatenate([x_t_ref[0], x_c_ref[0], x_b_ref[0]], axis=0)

    # ---- cv1 | cv2: one fused 1x1 matmul on x (bf16 MXU, f32 accumulate) ----
    h12 = jnp.dot(x_ext, w12_ref[...], preferred_element_type=f32)   # (Rext, 2Cp)
    a_ext = _hardswish(h12[:, :Cp] + b1_ref[...])      # cv1: conv+BN+hardswish
    y2 = h12[W:W + R, Cp:] + b2_ref[...]               # cv2: plain conv (cat-BN folded)

    # ---- Bottleneck.cv1: 1x1 + BN + hardswish (on the haloed slab) ----------
    b1v = _hardswish(jnp.dot(a_ext.astype(jnp.bfloat16), wb1_ref[...],
                             preferred_element_type=f32) + bb1_ref[...])

    # Zero halo rows that fall outside the image (this IS the conv zero-pad).
    ridx = jax.lax.broadcasted_iota(jnp.int32, (Rext, 1), 0)
    in_img = ((ridx >= W) | (h > 0)) & ((ridx < W + R) | (h < n_h - 1))
    b1v = jnp.where(in_img, b1v, 0.0)

    # ---- Bottleneck.cv2: 3x3 conv -------------------------------------------
    # dy (+-1 image row): sublane-aligned static slices into the haloed slab.
    # dx (+-1 pixel):     XLU roll + width-1 column mask applied ONCE per dx to
    #                     the whole rolled slab (mask depends only on row % W).
    # NOTE: pltpu.roll wraps at the slab edges; the only wrapped rows that any
    # dy-slice can see are (col==0, dx=-1) and (col==W-1, dx=+1), and exactly
    # those rows are zeroed by the column mask.  Keep mask + roll paired.
    col = ridx % W
    acc = jnp.zeros((R, Cp), f32)
    for dx in (-1, 0, 1):
        dxi = dx + 1
        if dx == 0:
            slab = b1v
        else:
            slab = pltpu.roll(b1v, shift=(-dx) % Rext, axis=0)
            cmask = (col + dx >= 0) & (col + dx < W)
            slab = jnp.where(cmask, slab, 0.0)
        slab16 = slab.astype(jnp.bfloat16)      # single cast per dx (3 total)
        wdx = wb2_ref[dxi]                       # (3*Cp, Cp), dy-major rows
        if group_taps:
            # Lane-concat the three dy taps -> one K=3*Cp matmul (fills the
            # 256-deep MXU on v6e/v7x; ~neutral on v5e's 128-deep MXU).
            op = jnp.concatenate(
                [slab16[0:R], slab16[W:W + R], slab16[2 * W:2 * W + R]], axis=1)
            acc = acc + jnp.dot(op, wdx, preferred_element_type=f32)
        else:
            for dyi in range(3):
                acc = acc + jnp.dot(slab16[dyi * W:dyi * W + R],
                                    wdx[dyi * Cp:(dyi + 1) * Cp],
                                    preferred_element_type=f32)
    b2v = _hardswish(acc + bb2_ref[...])

    # ---- shortcut add, cv3, cat-BN + LeakyReLU (folded), fused cv4 ----------
    m = a_ext[W:W + R] + b2v
    y1 = jnp.dot(m.astype(jnp.bfloat16), w3_ref[...],
                 preferred_element_type=f32) + b3_ref[...]
    # cv4 as a single K=2*Cp matmul on cat(leaky(y1), leaky(y2))
    y12 = jnp.concatenate([_leaky_relu(y1), _leaky_relu(y2)],
                          axis=1).astype(jnp.bfloat16)
    out = jnp.dot(y12, w4_ref[...], preferred_element_type=f32) + b4_ref[...]
    o_ref[0] = _hardswish(out).astype(o_ref.dtype)


# ------------------------------ wrappers -------------------------------------
def bottleneck_csp_nhwc(x_nhwc, params, c2, *, block_h=None,
                        out_dtype=jnp.bfloat16, keep_padded=False):
    """NHWC, lane-dense entry point (preferred: no layout transposes)."""
    N, H, W, C1 = x_nhwc.shape
    C1p = params['w12'].shape[0]
    Cp = params['wb1'].shape[0]
    C2p = params['w4'].shape[1]
    assert W % 8 == 0, "image width must be a multiple of 8 (sublane tile)"

    # lane-pad channels, cast activations to bf16 (halves HBM/VMEM traffic);
    # no-op if the caller already supplies padded bf16 activations.
    x = x_nhwc if x_nhwc.dtype == jnp.bfloat16 else x_nhwc.astype(jnp.float32)
    if C1p > C1:
        x = jnp.pad(x, ((0, 0), (0, 0), (0, 0), (0, C1p - C1)))
    x = x.astype(jnp.bfloat16).reshape(N, H * W, C1p)

    # ---- generation-aware tile choice (rows, not pixels) ---------------------
    vmem_cap = _vmem_capacity_bytes()
    vmem_limit = int(min(vmem_cap * 3 // 4, 96 * 1024 * 1024))
    out_itemsize = jnp.dtype(out_dtype).itemsize
    weight_bytes = 2 * sum(int(np.prod(v.shape)) * v.dtype.itemsize
                           for v in params.values())       # double-buffered resident
    # rough live VMEM per flattened pixel: double-buffered in/out tiles + f32
    # intermediates (h12, a_ext, b1v, rolled slab, grouped operand, acc, y1/y2).
    bytes_per_pix = 2 * 2 * C1p + 2 * out_itemsize * C2p + 48 * Cp
    act_budget = max(vmem_limit - weight_bytes - (6 << 20), bytes_per_pix * W)
    max_th = max(1, act_budget // (bytes_per_pix * W))
    if block_h is None:
        th = int(min(H, max_th))        # as many whole rows as fit (>=8-16 desired)
    else:
        th = max(1, min(H, int(block_h)))
    # keep both v7x TensorCores busy: want at least 2 grid steps in total.
    if N * (H // max(th, 1)) < 2 and H >= 2:
        th = max(1, H // 2)
    while H % th:
        th -= 1
    n_h = H // th
    R = th * W

    const2 = lambda n, h: (0, 0)
    const3 = lambda n, h: (0, 0, 0)

    # pair the 3x3 taps into K=3*Cp matmuls only when K would otherwise be <256
    group_taps = (Cp <= 128)
    kernel = functools.partial(_bottleneck_csp_kernel, group_taps=group_taps)

    flops = 2 * N * H * W * (C1p * 2 * Cp + 11 * Cp * Cp + 2 * Cp * C2p)
    bytes_accessed = int(x.size * x.dtype.itemsize
                         + N * H * W * C2p * out_itemsize
                         + weight_bytes // 2)

    out = pl.pallas_call(
        kernel,
        out_shape=jax.ShapeDtypeStruct((N, H * W, C2p), out_dtype),
        grid=(N, n_h),
        in_specs=[
            # centre tile + one clamped halo image row above / below it
            pl.BlockSpec((1, R, C1p), lambda n, h: (n, h, 0)),
            pl.BlockSpec((1, W, C1p),
                         lambda n, h: (n, jnp.maximum(h * th - 1, 0), 0)),
            pl.BlockSpec((1, W, C1p),
                         lambda n, h: (n, jnp.minimum((h + 1) * th, H - 1), 0)),
            # weights / biases: constant index maps -> fetched once, stay resident.
            # TODO(synk): pipeline_mode=pl.Buffered(1) here would halve resident
            # weight VMEM on v7x; left off to stay conservative on lowering.
            pl.BlockSpec((C1p, 2 * Cp), const2),
            pl.BlockSpec((1, Cp), const2),
            pl.BlockSpec((1, Cp), const2),
            pl.BlockSpec((Cp, Cp), const2),
            pl.BlockSpec((1, Cp), const2),
            pl.BlockSpec((3, 3 * Cp, Cp), const3),
            pl.BlockSpec((1, Cp), const2),
            pl.BlockSpec((Cp, Cp), const2),
            pl.BlockSpec((1, Cp), const2),
            pl.BlockSpec((2 * Cp, C2p), const2),
            pl.BlockSpec((1, C2p), const2),
        ],
        out_specs=pl.BlockSpec((1, R, C2p), lambda n, h: (n, h, 0)),
        compiler_params=pltpu.CompilerParams(
            dimension_semantics=("parallel", "parallel"),
            vmem_limit_bytes=vmem_limit),
        cost_estimate=pl.CostEstimate(flops=flops, transcendentals=0,
                                      bytes_accessed=bytes_accessed),
    )(x, x, x,
      params['w12'], params['b1'], params['b2'],
      params['wb1'], params['bb1'], params['wb2'], params['bb2'],
      params['w3'], params['b3'],
      params['w4'], params['b4'])

    out = out.reshape(N, H, W, C2p)
    # keep_padded=True keeps the lane-padded NHWC layout (no extra HBM pass).
    return out if keep_padded else out[..., :c2]


def bottleneck_csp(x_nchw, params, c2, *, block_h=None, out_dtype=jnp.bfloat16):
    # NCHW interface matching the PyTorch module; for real pipelines keep the
    # model NHWC end-to-end and call bottleneck_csp_nhwc directly (keep_padded)
    # to avoid the two layout transposes and the channel slice around the kernel.
    x = jnp.transpose(x_nchw, (0, 2, 3, 1))
    out = bottleneck_csp_nhwc(x, params, c2, block_h=block_h, out_dtype=out_dtype)
    return jnp.transpose(out, (0, 3, 1, 2))


# ------------------------ deterministic parameter init ----------------------
def make_params(c1, c2, e=0.5, seed=0):
    c_ = int(c2 * e)
    C1p, Cp, C2p = _round_up(c1), _round_up(c_), _round_up(c2)

    keys = jax.random.split(jax.random.PRNGKey(seed), 32)
    ki = iter(keys)

    def nrm(shape, scale=0.1):
        return scale * jax.random.normal(next(ki), shape, jnp.float32)

    def bn(c, eps=1e-5):
        gamma = 1.0 + 0.1 * jax.random.normal(next(ki), (c,), jnp.float32)
        beta = 0.1 * jax.random.normal(next(ki), (c,), jnp.float32)
        mean = 0.05 * jax.random.normal(next(ki), (c,), jnp.float32)
        var = 0.5 + jax.random.uniform(next(ki), (c,), jnp.float32)
        s = gamma / jnp.sqrt(var + eps)
        return s, beta - mean * s

    # raw conv weights stored as (C_in, C_out) == torch weight[co, ci].T
    W1 = nrm((c1, c_)); W2 = nrm((c1, c_)); W3 = nrm((c_, c_))
    W4 = nrm((2 * c_, c2)); Wb1 = nrm((c_, c_)); Wb2 = nrm((3, 3, c_, c_))  # HWIO

    s1, t1 = bn(c_)            # cv1 BN
    sb1, tb1 = bn(c_)          # bottleneck.cv1 BN
    sb2, tb2 = bn(c_)          # bottleneck.cv2 BN
    s_cat, t_cat = bn(2 * c_)  # standalone BN over cat(y1, y2)
    s4, t4 = bn(c2)            # cv4 BN

    # BN-folded f32 weights (these define the model the reference computes)
    w1f = W1 * s1[None, :]
    wb1f = Wb1 * sb1[None, :]
    wb2f = Wb2 * sb2[None, None, None, :]
    w3f = W3 * s_cat[None, :c_]          # cat-BN first half  -> cv3
    w2f = W2 * s_cat[None, c_:]          # cat-BN second half -> cv2
    w4af = W4[:c_, :] * s4[None, :]
    w4bf = W4[c_:, :] * s4[None, :]
    b1f, bb1f, bb2f, b4f = t1, tb1, tb2, t4
    b3f, b2f = t_cat[:c_], t_cat[c_:]

    def padw(w, r, c):   # zero-pad 2-D weight to (r, c), cast to bf16 for the MXU
        return jnp.pad(w, ((0, r - w.shape[0]), (0, c - w.shape[1]))).astype(jnp.bfloat16)

    def padb(b, c):      # zero-pad bias to (1, c), keep f32
        return jnp.pad(b, (0, c - b.shape[0]))[None, :].astype(jnp.float32)

    # 3x3 weights grouped per dx: row index = (dy+1)*Cp + ci, matching the
    # in-kernel lane concat of the three dy slices of each rolled slab.
    wb2p = jnp.pad(wb2f, ((0, 0), (0, 0), (0, Cp - c_), (0, Cp - c_)))
    wb2_dx = (jnp.transpose(wb2p, (1, 0, 2, 3))      # (kx, ky, ci, co)
              .reshape(3, 3 * Cp, Cp).astype(jnp.bfloat16))

    kernel_params = {
        # cv1 and cv2 fused into a single (C1p, 2*Cp) matmul on x
        'w12': jnp.concatenate([padw(w1f, C1p, Cp), padw(w2f, C1p, Cp)], axis=1),
        'b1': padb(b1f, Cp), 'b2': padb(b2f, Cp),
        'wb1': padw(wb1f, Cp, Cp), 'bb1': padb(bb1f, Cp),
        'wb2': wb2_dx, 'bb2': padb(bb2f, Cp),
        'w3': padw(w3f, Cp, Cp), 'b3': padb(b3f, Cp),
        # cv4 fused: rows = [y1 channels ; y2 channels]
        'w4': jnp.concatenate([padw(w4af, Cp, C2p), padw(w4bf, Cp, C2p)], axis=0),
        'b4': padb(b4f, C2p),
    }

    # Reference params use the same bf16-rounded weights (upcast), unpadded.
    r = lambda w: w.astype(jnp.bfloat16).astype(jnp.float32)
    ref_params = {
        'w1': r(w1f), 'b1': b1f[None, :], 'w2': r(w2f), 'b2': b2f[None, :],
        'wb1': r(wb1f), 'bb1': bb1f[None, :],
        'wb2_hwio': r(wb2f), 'bb2': bb2f[None, :],
        'w3': r(w3f), 'b3': b3f[None, :],
        'w4a': r(w4af), 'w4b': r(w4bf), 'b4': b4f[None, :],
    }
    return kernel_params, ref_params, c_


# ------------------------------ pure-JAX reference ---------------------------
def reference(x_nchw, P):
    hp = jax.lax.Precision.HIGHEST
    x = jnp.transpose(x_nchw, (0, 2, 3, 1))   # NHWC
    dot = lambda t, w: jnp.einsum('nhwc,cd->nhwd', t, w, precision=hp)
    a = _hardswish(dot(x, P['w1']) + P['b1'])
    y2 = dot(x, P['w2']) + P['b2']
    b1 = _hardswish(dot(a, P['wb1']) + P['bb1'])
    conv = jax.lax.conv_general_dilated(
        b1, P['wb2_hwio'], (1, 1), 'SAME',
        dimension_numbers=('NHWC', 'HWIO', 'NHWC'), precision=hp)
    b2 = _hardswish(conv + P['bb2'])
    m = a + b2
    y1 = dot(m, P['w3']) + P['b3']
    out = _hardswish(dot(_leaky_relu(y1), P['w4a'])
                     + dot(_leaky_relu(y2), P['w4b']) + P['b4'])
    return out.transpose(0, 3, 1, 2)


# ---------------------------------- main -------------------------------------
if __name__ == "__main__":
    N, C1, C2, H, W = 2, 8, 8, 16, 16          # c_ = int(C2 * 0.5) = 4
    x = jax.random.normal(jax.random.PRNGKey(0), (N, C1, H, W), jnp.float32)

    kparams, rparams, c_ = make_params(C1, C2, e=0.5, seed=0)
    ref = jax.block_until_ready(reference(x, rparams))

    # block_h=8 -> two row-blocks per image: exercises the cross-tile halo path.
    out = jax.block_until_ready(bottleneck_csp(x, kparams, C2, block_h=8))
    assert out.shape == (N, C2, H, W), out.shape
    np.testing.assert_allclose(np.asarray(out.astype(jnp.float32)),
                               np.asarray(ref), rtol=3e-2, atol=3e-2)

    # auto tile size (VMEM/row-based heuristic): exercises the full-image path.
    out2 = jax.block_until_ready(bottleneck_csp(x, kparams, C2))
    np.testing.assert_allclose(np.asarray(out2.astype(jnp.float32)),
                               np.asarray(ref), rtol=3e-2, atol=3e-2)

    print("KERNEL_OK")
</pallas_src>

<mosaic_0001>
module attributes {stable_mosaic.version = 11 : i64} {
  func.func @_bottleneck_csp_kernel(%arg0: i32, %arg1: i32, %arg2: memref<1x128x128xbf16, #tpu.memory_space<vmem>>, %arg3: memref<1x16x128xbf16, #tpu.memory_space<vmem>>, %arg4: memref<1x16x128xbf16, #tpu.memory_space<vmem>>, %arg5: memref<128x256xbf16, #tpu.memory_space<vmem>>, %arg6: memref<1x128xf32, #tpu.memory_space<vmem>>, %arg7: memref<1x128xf32, #tpu.memory_space<vmem>>, %arg8: memref<128x128xbf16, #tpu.memory_space<vmem>>, %arg9: memref<1x128xf32, #tpu.memory_space<vmem>>, %arg10: memref<3x384x128xbf16, #tpu.memory_space<vmem>>, %arg11: memref<1x128xf32, #tpu.memory_space<vmem>>, %arg12: memref<128x128xbf16, #tpu.memory_space<vmem>>, %arg13: memref<1x128xf32, #tpu.memory_space<vmem>>, %arg14: memref<256x128xbf16, #tpu.memory_space<vmem>>, %arg15: memref<1x128xf32, #tpu.memory_space<vmem>>, %arg16: memref<1x128x128xbf16, #tpu.memory_space<vmem>>) attributes {dimension_semantics = [#tpu.dimension_semantics<parallel>, #tpu.dimension_semantics<parallel>], iteration_bounds = array<i64: 2, 2>, scalar_prefetch = 0 : i64, scratch_operands = 0 : i64, tpu.core_type = #tpu.core_type<tc>, window_params = [{transform_indices = @transform_0, window_bounds = array<i64: 1, 128, 128>}, {transform_indices = @transform_1, window_bounds = array<i64: 1, 16, 128>}, {transform_indices = @transform_2, window_bounds = array<i64: 1, 16, 128>}, {pipeline_mode = #tpu.pipeline_mode<synchronous>, transform_indices = @transform_3, window_bounds = array<i64: 128, 256>}, {pipeline_mode = #tpu.pipeline_mode<synchronous>, transform_indices = @transform_4, window_bounds = array<i64: 1, 128>}, {pipeline_mode = #tpu.pipeline_mode<synchronous>, transform_indices = @transform_5, window_bounds = array<i64: 1, 128>}, {pipeline_mode = #tpu.pipeline_mode<synchronous>, transform_indices = @transform_6, window_bounds = array<i64: 128, 128>}, {pipeline_mode = #tpu.pipeline_mode<synchronous>, transform_indices = @transform_7, window_bounds = array<i64: 1, 128>}, {pipeline_mode = #tpu.pipeline_mode<synchronous>, transform_indices = @transform_8, window_bounds = array<i64: 3, 384, 128>}, {pipeline_mode = #tpu.pipeline_mode<synchronous>, transform_indices = @transform_9, window_bounds = array<i64: 1, 128>}, {pipeline_mode = #tpu.pipeline_mode<synchronous>, transform_indices = @transform_10, window_bounds = array<i64: 128, 128>}, {pipeline_mode = #tpu.pipeline_mode<synchronous>, transform_indices = @transform_11, window_bounds = array<i64: 1, 128>}, {pipeline_mode = #tpu.pipeline_mode<synchronous>, transform_indices = @transform_12, window_bounds = array<i64: 256, 128>}, {pipeline_mode = #tpu.pipeline_mode<synchronous>, transform_indices = @transform_13, window_bounds = array<i64: 1, 128>}, {transform_indices = @transform_14, window_bounds = array<i64: 1, 128, 128>}]} {
    %c0 = arith.constant 0 : index
    %c0_0 = arith.constant 0 : index
    %c0_1 = arith.constant 0 : index
    %0 = vector.load %arg3[%c0, %c0_0, %c0_1] : memref<1x16x128xbf16, #tpu.memory_space<vmem>>, vector<1x16x128xbf16>
    %1 = vector.shape_cast %0 : vector<1x16x128xbf16> to vector<16x128xbf16>
    %c0_2 = arith.constant 0 : index
    %c0_3 = arith.constant 0 : index
    %c0_4 = arith.constant 0 : index
    %2 = vector.load %arg2[%c0_2, %c0_3, %c0_4] : memref<1x128x128xbf16, #tpu.memory_space<vmem>>, vector<1x128x128xbf16>
    %3 = vector.shape_cast %2 : vector<1x128x128xbf16> to vector<128x128xbf16>
    %c0_5 = arith.constant 0 : index
    %c0_6 = arith.constant 0 : index
    %c0_7 = arith.constant 0 : index
    %4 = vector.load %arg4[%c0_5, %c0_6, %c0_7] : memref<1x16x128xbf16, #tpu.memory_space<vmem>>, vector<1x16x128xbf16>
    %5 = vector.shape_cast %4 : vector<1x16x128xbf16> to vector<16x128xbf16>
    %6 = tpu.concatenate %1, %3, %5 in 0 : vector<16x128xbf16>, vector<128x128xbf16>, vector<16x128xbf16> -> vector<160x128xbf16>
    %c0_8 = arith.constant 0 : index
    %c0_9 = arith.constant 0 : index
    %7 = vector.load %arg5[%c0_8, %c0_9] : memref<128x256xbf16, #tpu.memory_space<vmem>>, vector<128x256xbf16>
    %cst = arith.constant dense<0.000000e+00> : vector<160x256xf32>
    %8 = tpu.matmul %6, %7, %cst {dimension_numbers = #tpu.dot_dimension_numbers<[1], [0], [0], [1], [0, 0, 1, 1], [], []>} : vector<160x128xbf16>, vector<128x256xbf16>, vector<160x256xf32> -> vector<160x256xf32>
    %9 = vector.extract_strided_slice %8 {offsets = [0, 0], sizes = [160, 128], strides = [1, 1]} : vector<160x256xf32> to vector<160x128xf32>
    %c0_10 = arith.constant 0 : index
    %c0_11 = arith.constant 0 : index
    %10 = vector.load %arg6[%c0_10, %c0_11] : memref<1x128xf32, #tpu.memory_space<vmem>>, vector<1x128xf32>
    %11 = vector.broadcast %10 : vector<1x128xf32> to vector<160x128xf32>
    %12 = arith.addf %9, %11 : vector<160x128xf32>
    %cst_12 = arith.constant 3.000000e+00 : f32
    %13 = vector.broadcast %cst_12 : f32 to vector<160x128xf32>
    %14 = arith.addf %12, %13 : vector<160x128xf32>
    %cst_13 = arith.constant 0.000000e+00 : f32
    %cst_14 = arith.constant 6.000000e+00 : f32
    %15 = vector.broadcast %cst_13 : f32 to vector<160x128xf32>
    %16 = arith.maximumf %15, %14 : vector<160x128xf32>
    %17 = vector.broadcast %cst_14 : f32 to vector<160x128xf32>
    %18 = arith.minimumf %17, %16 : vector<160x128xf32>
    %19 = arith.mulf %12, %18 : vector<160x128xf32>
    %cst_15 = arith.constant 0.166666672 : f32
    %20 = vector.broadcast %cst_15 : f32 to vector<160x128xf32>
    %21 = arith.mulf %19, %20 : vector<160x128xf32>
    %22 = vector.extract_strided_slice %8 {offsets = [16, 128], sizes = [128, 128], strides = [1, 1]} : vector<160x256xf32> to vector<128x128xf32>
    %c0_16 = arith.constant 0 : index
    %c0_17 = arith.constant 0 : index
    %23 = vector.load %arg7[%c0_16, %c0_17] : memref<1x128xf32, #tpu.memory_space<vmem>>, vector<1x128xf32>
    %24 = vector.broadcast %23 : vector<1x128xf32> to vector<128x128xf32>
    %25 = arith.addf %22, %24 : vector<128x128xf32>
    %26 = arith.truncf %21 : vector<160x128xf32> to vector<160x128xbf16>
    %c0_18 = arith.constant 0 : index
    %c0_19 = arith.constant 0 : index
    %27 = vector.load %arg8[%c0_18, %c0_19] : memref<128x128xbf16, #tpu.memory_space<vmem>>, vector<128x128xbf16>
    %cst_20 = arith.constant dense<0.000000e+00> : vector<160x128xf32>
    %28 = tpu.matmul %26, %27, %cst_20 {dimension_numbers = #tpu.dot_dimension_numbers<[1], [0], [0], [1], [0, 0, 1, 1], [], []>} : vector<160x128xbf16>, vector<128x128xbf16>, vector<160x128xf32> -> vector<160x128xf32>
    %c0_21 = arith.constant 0 : index
    %c0_22 = arith.constant 0 : index
    %29 = vector.load %arg9[%c0_21, %c0_22] : memref<1x128xf32, #tpu.memory_space<vmem>>, vector<1x128xf32>
    %30 = vector.broadcast %29 : vector<1x128xf32> to vector<160x128xf32>
    %31 = arith.addf %28, %30 : vector<160x128xf32>
    %cst_23 = arith.constant 3.000000e+00 : f32
    %32 = vector.broadcast %cst_23 : f32 to vector<160x128xf32>
    %33 = arith.addf %31, %32 : vector<160x128xf32>
    %cst_24 = arith.constant 0.000000e+00 : f32
    %cst_25 = arith.constant 6.000000e+00 : f32
    %34 = vector.broadcast %cst_24 : f32 to vector<160x128xf32>
    %35 = arith.maximumf %34, %33 : vector<160x128xf32>
    %36 = vector.broadcast %cst_25 : f32 to vector<160x128xf32>
    %37 = arith.minimumf %36, %35 : vector<160x128xf32>
    %38 = arith.mulf %31, %37 : vector<160x128xf32>
    %cst_26 = arith.constant 0.166666672 : f32
    %39 = vector.broadcast %cst_26 : f32 to vector<160x128xf32>
    %40 = arith.mulf %38, %39 : vector<160x128xf32>
    %41 = tpu.iota {dimensions = array<i32: 0>} : vector<160x1xi32>
    %c16_i32 = arith.constant 16 : i32
    %42 = vector.broadcast %c16_i32 : i32 to vector<160x1xi32>
    %43 = arith.cmpi sge, %41, %42 : vector<160x1xi32>
    %c0_i32 = arith.constant 0 : i32
    %44 = arith.cmpi sgt, %arg1, %c0_i32 : i32
    %45 = vector.broadcast %44 : i1 to vector<160x1xi1>
    %46 = arith.ori %43, %45 : vector<160x1xi1>
    %c144_i32 = arith.constant 144 : i32
    %47 = vector.broadcast %c144_i32 : i32 to vector<160x1xi32>
    %48 = arith.cmpi slt, %41, %47 : vector<160x1xi32>
    %c1_i32 = arith.constant 1 : i32
    %49 = arith.cmpi slt, %arg1, %c1_i32 : i32
    %50 = vector.broadcast %49 : i1 to vector<160x1xi1>
    %51 = arith.ori %48, %50 : vector<160x1xi1>
    %52 = arith.andi %46, %51 : vector<160x1xi1>
    %cst_27 = arith.constant 0.000000e+00 : f32
    %53 = vector.shape_cast %52 : vector<160x1xi1> to vector<160x1xi1>
    %54 = vector.broadcast %53 : vector<160x1xi1> to vector<160x128xi1>
    %55 = vector.broadcast %cst_27 : f32 to vector<160x128xf32>
    %56 = arith.select %54, %40, %55 : vector<160x128xi1>, vector<160x128xf32>
    %c16_i32_28 = arith.constant 16 : i32
    %c0_i32_29 = arith.constant 0 : i32
    %57 = arith.cmpi eq, %c16_i32_28, %c0_i32_29 : i32
    %c1_i32_30 = arith.constant 1 : i32
    %58 = arith.select %57, %c1_i32_30, %c16_i32_28 : i32
    %59 = vector.broadcast %58 : i32 to vector<160x1xi32>
    %60 = arith.remsi %41, %59 : vector<160x1xi32>
    %c0_i32_31 = arith.constant 0 : i32
    %61 = vector.broadcast %c0_i32_31 : i32 to vector<160x1xi32>
    %62 = arith.cmpi ne, %60, %61 : vector<160x1xi32>
    %c0_i32_32 = arith.constant 0 : i32
    %63 = vector.broadcast %c0_i32_32 : i32 to vector<160x1xi32>
    %64 = arith.cmpi slt, %60, %63 : vector<160x1xi32>
    %c0_i32_33 = arith.constant 0 : i32
    %65 = arith.cmpi slt, %58, %c0_i32_33 : i32
    %66 = vector.broadcast %65 : i1 to vector<160x1xi1>
    %67 = vector.broadcast %66 : vector<160x1xi1> to vector<160x1xi1>
    %68 = arith.xori %64, %67 : vector<160x1xi1>
    %69 = arith.andi %68, %62 : vector<160x1xi1>
    %70 = vector.broadcast %58 : i32 to vector<160x1xi32>
    %71 = arith.addi %60, %70 : vector<160x1xi32>
    %72 = arith.select %69, %71, %60 : vector<160x1xi1>, vector<160x1xi32>
    %cst_34 = arith.constant 0.000000e+00 : f32
    %73 = vector.broadcast %cst_34 : f32 to vector<128x128xf32>
    %c1_i32_35 = arith.constant 1 : i32
    %74 = tpu.dynamic_rotate %56 by %c1_i32_35 dim 0 : vector<160x128xf32>, i32 -> vector<160x128xf32>
    %c-1_i32 = arith.constant -1 : i32
    %75 = vector.broadcast %c-1_i32 : i32 to vector<160x1xi32>
    %76 = arith.addi %72, %75 : vector<160x1xi32>
    %c0_i32_36 = arith.constant 0 : i32
    %77 = vector.broadcast %c0_i32_36 : i32 to vector<160x1xi32>
    %78 = arith.cmpi sge, %76, %77 : vector<160x1xi32>
    %c-1_i32_37 = arith.constant -1 : i32
    %79 = vector.broadcast %c-1_i32_37 : i32 to vector<160x1xi32>
    %80 = arith.addi %72, %79 : vector<160x1xi32>
    %c16_i32_38 = arith.constant 16 : i32
    %81 = vector.broadcast %c16_i32_38 : i32 to vector<160x1xi32>
    %82 = arith.cmpi slt, %80, %81 : vector<160x1xi32>
    %83 = arith.andi %78, %82 : vector<160x1xi1>
    %cst_39 = arith.constant 0.000000e+00 : f32
    %84 = vector.shape_cast %83 : vector<160x1xi1> to vector<160x1xi1>
    %85 = vector.broadcast %84 : vector<160x1xi1> to vector<160x128xi1>
    %86 = vector.broadcast %cst_39 : f32 to vector<160x128xf32>
    %87 = arith.select %85, %74, %86 : vector<160x128xi1>, vector<160x128xf32>
    %88 = arith.truncf %87 : vector<160x128xf32> to vector<160x128xbf16>
    %c0_40 = arith.constant 0 : index
    %c0_41 = arith.constant 0 : index
    %c0_42 = arith.constant 0 : index
    %89 = vector.load %arg10[%c0_40, %c0_41, %c0_42] : memref<3x384x128xbf16, #tpu.memory_space<vmem>>, vector<1x384x128xbf16>
    %90 = vector.shape_cast %89 : vector<1x384x128xbf16> to vector<384x128xbf16>
    %91 = vector.extract_strided_slice %88 {offsets = [0, 0], sizes = [128, 128], strides = [1, 1]} : vector<160x128xbf16> to vector<128x128xbf16>
    %92 = vector.extract_strided_slice %88 {offsets = [16, 0], sizes = [128, 128], strides = [1, 1]} : vector<160x128xbf16> to vector<128x128xbf16>
    %93 = vector.extract_strided_slice %88 {offsets = [32, 0], sizes = [128, 128], strides = [1, 1]} : vector<160x128xbf16> to vector<128x128xbf16>
    %94 = tpu.concatenate %91, %92, %93 in 1 : vector<128x128xbf16>, vector<128x128xbf16>, vector<128x128xbf16> -> vector<128x384xbf16>
    %cst_43 = arith.constant dense<0.000000e+00> : vector<128x128xf32>
    %95 = tpu.matmul %94, %90, %cst_43 {dimension_numbers = #tpu.dot_dimension_numbers<[1], [0], [0], [1], [0, 0, 1, 1], [], []>} : vector<128x384xbf16>, vector<384x128xbf16>, vector<128x128xf32> -> vector<128x128xf32>
    %96 = arith.addf %73, %95 : vector<128x128xf32>
    %97 = arith.truncf %56 : vector<160x128xf32> to vector<160x128xbf16>
    %c1 = arith.constant 1 : index
    %c0_44 = arith.constant 0 : index
    %c0_45 = arith.constant 0 : index
    %98 = vector.load %arg10[%c1, %c0_44, %c0_45] : memref<3x384x128xbf16, #tpu.memory_space<vmem>>, vector<1x384x128xbf16>
    %99 = vector.shape_cast %98 : vector<1x384x128xbf16> to vector<384x128xbf16>
    %100 = vector.extract_strided_slice %97 {offsets = [0, 0], sizes = [128, 128], strides = [1, 1]} : vector<160x128xbf16> to vector<128x128xbf16>
    %101 = vector.extract_strided_slice %97 {offsets = [16, 0], sizes = [128, 128], strides = [1, 1]} : vector<160x128xbf16> to vector<128x128xbf16>
    %102 = vector.extract_strided_slice %97 {offsets = [32, 0], sizes = [128, 128], strides = [1, 1]} : vector<160x128xbf16> to vector<128x128xbf16>
    %103 = tpu.concatenate %100, %101, %102 in 1 : vector<128x128xbf16>, vector<128x128xbf16>, vector<128x128xbf16> -> vector<128x384xbf16>
    %cst_46 = arith.constant dense<0.000000e+00> : vector<128x128xf32>
    %104 = tpu.matmul %103, %99, %cst_46 {dimension_numbers = #tpu.dot_dimension_numbers<[1], [0], [0], [1], [0, 0, 1, 1], [], []>} : vector<128x384xbf16>, vector<384x128xbf16>, vector<128x128xf32> -> vector<128x128xf32>
    %105 = arith.addf %96, %104 : vector<128x128xf32>
    %c159_i32 = arith.constant 159 : i32
    %106 = tpu.dynamic_rotate %56 by %c159_i32 dim 0 : vector<160x128xf32>, i32 -> vector<160x128xf32>
    %c1_i32_47 = arith.constant 1 : i32
    %107 = vector.broadcast %c1_i32_47 : i32 to vector<160x1xi32>
    %108 = arith.addi %72, %107 : vector<160x1xi32>
    %c0_i32_48 = arith.constant 0 : i32
    %109 = vector.broadcast %c0_i32_48 : i32 to vector<160x1xi32>
    %110 = arith.cmpi sge, %108, %109 : vector<160x1xi32>
    %c1_i32_49 = arith.constant 1 : i32
    %111 = vector.broadcast %c1_i32_49 : i32 to vector<160x1xi32>
    %112 = arith.addi %72, %111 : vector<160x1xi32>
    %c16_i32_50 = arith.constant 16 : i32
    %113 = vector.broadcast %c16_i32_50 : i32 to vector<160x1xi32>
    %114 = arith.cmpi slt, %112, %113 : vector<160x1xi32>
    %115 = arith.andi %110, %114 : vector<160x1xi1>
    %cst_51 = arith.constant 0.000000e+00 : f32
    %116 = vector.shape_cast %115 : vector<160x1xi1> to vector<160x1xi1>
    %117 = vector.broadcast %116 : vector<160x1xi1> to vector<160x128xi1>
    %118 = vector.broadcast %cst_51 : f32 to vector<160x128xf32>
    %119 = arith.select %117, %106, %118 : vector<160x128xi1>, vector<160x128xf32>
    %120 = arith.truncf %119 : vector<160x128xf32> to vector<160x128xbf16>
    %c2 = arith.constant 2 : index
    %c0_52 = arith.constant 0 : index
    %c0_53 = arith.constant 0 : index
    %121 = vector.load %arg10[%c2, %c0_52, %c0_53] : memref<3x384x128xbf16, #tpu.memory_space<vmem>>, vector<1x384x128xbf16>
    %122 = vector.shape_cast %121 : vector<1x384x128xbf16> to vector<384x128xbf16>
    %123 = vector.extract_strided_slice %120 {offsets = [0, 0], sizes = [128, 128], strides = [1, 1]} : vector<160x128xbf16> to vector<128x128xbf16>
    %124 = vector.extract_strided_slice %120 {offsets = [16, 0], sizes = [128, 128], strides = [1, 1]} : vector<160x128xbf16> to vector<128x128xbf16>
    %125 = vector.extract_strided_slice %120 {offsets = [32, 0], sizes = [128, 128], strides = [1, 1]} : vector<160x128xbf16> to vector<128x128xbf16>
    %126 = tpu.concatenate %123, %124, %125 in 1 : vector<128x128xbf16>, vector<128x128xbf16>, vector<128x128xbf16> -> vector<128x384xbf16>
    %cst_54 = arith.constant dense<0.000000e+00> : vector<128x128xf32>
    %127 = tpu.matmul %126, %122, %cst_54 {dimension_numbers = #tpu.dot_dimension_numbers<[1], [0], [0], [1], [0, 0, 1, 1], [], []>} : vector<128x384xbf16>, vector<384x128xbf16>, vector<128x128xf32> -> vector<128x128xf32>
    %128 = arith.addf %105, %127 : vector<128x128xf32>
    %c0_55 = arith.constant 0 : index
    %c0_56 = arith.constant 0 : index
    %129 = vector.load %arg11[%c0_55, %c0_56] : memref<1x128xf32, #tpu.memory_space<vmem>>, vector<1x128xf32>
    %130 = vector.broadcast %129 : vector<1x128xf32> to vector<128x128xf32>
    %131 = arith.addf %128, %130 : vector<128x128xf32>
    %cst_57 = arith.constant 3.000000e+00 : f32
    %132 = vector.broadcast %cst_57 : f32 to vector<128x128xf32>
    %133 = arith.addf %131, %132 : vector<128x128xf32>
    %cst_58 = arith.constant 0.000000e+00 : f32
    %cst_59 = arith.constant 6.000000e+00 : f32
    %134 = vector.broadcast %cst_58 : f32 to vector<128x128xf32>
    %135 = arith.maximumf %134, %133 : vector<128x128xf32>
    %136 = vector.broadcast %cst_59 : f32 to vector<128x128xf32>
    %137 = arith.minimumf %136, %135 : vector<128x128xf32>
    %138 = arith.mulf %131, %137 : vector<128x128xf32>
    %cst_60 = arith.constant 0.166666672 : f32
    %139 = vector.broadcast %cst_60 : f32 to vector<128x128xf32>
    %140 = arith.mulf %138, %139 : vector<128x128xf32>
    %141 = vector.extract_strided_slice %21 {offsets = [16, 0], sizes = [128, 128], strides = [1, 1]} : vector<160x128xf32> to vector<128x128xf32>
    %142 = arith.addf %141, %140 : vector<128x128xf32>
    %143 = arith.truncf %142 : vector<128x128xf32> to vector<128x128xbf16>
    %c0_61 = arith.constant 0 : index
    %c0_62 = arith.constant 0 : index
    %144 = vector.load %arg12[%c0_61, %c0_62] : memref<128x128xbf16, #tpu.memory_space<vmem>>, vector<128x128xbf16>
    %cst_63 = arith.constant dense<0.000000e+00> : vector<128x128xf32>
    %145 = tpu.matmul %143, %144, %cst_63 {dimension_numbers = #tpu.dot_dimension_numbers<[1], [0], [0], [1], [0, 0, 1, 1], [], []>} : vector<128x128xbf16>, vector<128x128xbf16>, vector<128x128xf32> -> vector<128x128xf32>
    %c0_64 = arith.constant 0 : index
    %c0_65 = arith.constant 0 : index
    %146 = vector.load %arg13[%c0_64, %c0_65] : memref<1x128xf32, #tpu.memory_space<vmem>>, vector<1x128xf32>
    %147 = vector.broadcast %146 : vector<1x128xf32> to vector<128x128xf32>
    %148 = arith.addf %145, %147 : vector<128x128xf32>
    %cst_66 = arith.constant 0.000000e+00 : f32
    %149 = vector.broadcast %cst_66 : f32 to vector<128x128xf32>
    %150 = arith.cmpf oge, %148, %149 : vector<128x128xf32>
    %cst_67 = arith.constant 1.000000e-01 : f32
    %151 = vector.broadcast %cst_67 : f32 to vector<128x128xf32>
    %152 = arith.mulf %151, %148 : vector<128x128xf32>
    %153 = arith.select %150, %148, %152 : vector<128x128xi1>, vector<128x128xf32>
    %cst_68 = arith.constant 0.000000e+00 : f32
    %154 = vector.broadcast %cst_68 : f32 to vector<128x128xf32>
    %155 = arith.cmpf oge, %25, %154 : vector<128x128xf32>
    %cst_69 = arith.constant 1.000000e-01 : f32
    %156 = vector.broadcast %cst_69 : f32 to vector<128x128xf32>
    %157 = arith.mulf %156, %25 : vector<128x128xf32>
    %158 = arith.select %155, %25, %157 : vector<128x128xi1>, vector<128x128xf32>
    %159 = tpu.concatenate %153, %158 in 1 : vector<128x128xf32>, vector<128x128xf32> -> vector<128x256xf32>
    %160 = arith.truncf %159 : vector<128x256xf32> to vector<128x256xbf16>
    %c0_70 = arith.constant 0 : index
    %c0_71 = arith.constant 0 : index
    %161 = vector.load %arg14[%c0_70, %c0_71] : memref<256x128xbf16, #tpu.memory_space<vmem>>, vector<256x128xbf16>
    %cst_72 = arith.constant dense<0.000000e+00> : vector<128x128xf32>
    %162 = tpu.matmul %160, %161, %cst_72 {dimension_numbers = #tpu.dot_dimension_numbers<[1], [0], [0], [1], [0, 0, 1, 1], [], []>} : vector<128x256xbf16>, vector<256x128xbf16>, vector<128x128xf32> -> vector<128x128xf32>
    %c0_73 = arith.constant 0 : index
    %c0_74 = arith.constant 0 : index
    %163 = vector.load %arg15[%c0_73, %c0_74] : memref<1x128xf32, #tpu.memory_space<vmem>>, vector<1x128xf32>
    %164 = vector.broadcast %163 : vector<1x128xf32> to vector<128x128xf32>
    %165 = arith.addf %162, %164 : vector<128x128xf32>
    %cst_75 = arith.constant 3.000000e+00 : f32
    %166 = vector.broadcast %cst_75 : f32 to vector<128x128xf32>
    %167 = arith.addf %165, %166 : vector<128x128xf32>
    %cst_76 = arith.constant 0.000000e+00 : f32
    %cst_77 = arith.constant 6.000000e+00 : f32
    %168 = vector.broadcast %cst_76 : f32 to vector<128x128xf32>
    %169 = arith.maximumf %168, %167 : vector<128x128xf32>
    %170 = vector.broadcast %cst_77 : f32 to vector<128x128xf32>
    %171 = arith.minimumf %170, %169 : vector<128x128xf32>
    %172 = arith.mulf %165, %171 : vector<128x128xf32>
    %cst_78 = arith.constant 0.166666672 : f32
    %173 = vector.broadcast %cst_78 : f32 to vector<128x128xf32>
    %174 = arith.mulf %172, %173 : vector<128x128xf32>
    %175 = arith.truncf %174 : vector<128x128xf32> to vector<128x128xbf16>
    %c0_79 = arith.constant 0 : index
    %c0_80 = arith.constant 0 : index
    %c0_81 = arith.constant 0 : index
    %176 = vector.load %arg16[%c0_79, %c0_80, %c0_81] : memref<1x128x128xbf16, #tpu.memory_space<vmem>>, vector<1x128x128xbf16>
    %177 = vector.shape_cast %176 : vector<1x128x128xbf16> to vector<128x128xbf16>
    %178 = vector.shape_cast %175 : vector<128x128xbf16> to vector<1x128x128xbf16>
    tpu.vector_store %arg16[%c0_79, %c0_80, %c0_81], %178 {strides = array<i32>} : memref<1x128x128xbf16, #tpu.memory_space<vmem>>, vector<1x128x128xbf16>,
    return
  }
  func.func @transform_0(%arg0: i32, %arg1: i32) -> (i32, i32, i32) {
    %c0_i32 = arith.constant 0 : i32
    %c0_i32_0 = arith.constant 0 : i32
    return %arg0, %arg1, %c0_i32 : i32, i32, i32
  }
  func.func @transform_1(%arg0: i32, %arg1: i32) -> (i32, i32, i32) {
    %c8_i32 = arith.constant 8 : i32
    %0 = arith.muli %arg1, %c8_i32 : i32
    %c1_i32 = arith.constant 1 : i32
    %1 = arith.subi %0, %c1_i32 : i32
    %c0_i32 = arith.constant 0 : i32
    %2 = arith.maxsi %1, %c0_i32 : i32
    %c0_i32_0 = arith.constant 0 : i32
    %c0_i32_1 = arith.constant 0 : i32
    return %arg0, %2, %c0_i32_0 : i32, i32, i32
  }
  func.func @transform_2(%arg0: i32, %arg1: i32) -> (i32, i32, i32) {
    %c1_i32 = arith.constant 1 : i32
    %0 = arith.addi %arg1, %c1_i32 : i32
    %c8_i32 = arith.constant 8 : i32
    %1 = arith.muli %0, %c8_i32 : i32
    %c15_i32 = arith.constant 15 : i32
    %2 = arith.minsi %1, %c15_i32 : i32
    %c0_i32 = arith.constant 0 : i32
    %c0_i32_0 = arith.constant 0 : i32
    return %arg0, %2, %c0_i32 : i32, i32, i32
  }
  func.func @transform_3(%arg0: i32, %arg1: i32) -> (i32, i32) {
    %c0_i32 = arith.constant 0 : i32
    %c0_i32_0 = arith.constant 0 : i32
    %c0_i32_1 = arith.constant 0 : i32
    return %c0_i32, %c0_i32_0 : i32, i32
  }
  func.func @transform_4(%arg0: i32, %arg1: i32) -> (i32, i32) {
    %c0_i32 = arith.constant 0 : i32
    %c0_i32_0 = arith.constant 0 : i32
    %c0_i32_1 = arith.constant 0 : i32
    return %c0_i32, %c0_i32_0 : i32, i32
  }
  func.func @transform_5(%arg0: i32, %arg1: i32) -> (i32, i32) {
    %c0_i32 = arith.constant 0 : i32
    %c0_i32_0 = arith.constant 0 : i32
    %c0_i32_1 = arith.constant 0 : i32
    return %c0_i32, %c0_i32_0 : i32, i32
  }
  func.func @transform_6(%arg0: i32, %arg1: i32) -> (i32, i32) {
    %c0_i32 = arith.constant 0 : i32
    %c0_i32_0 = arith.constant 0 : i32
    %c0_i32_1 = arith.constant 0 : i32
    return %c0_i32, %c0_i32_0 : i32, i32
  }
  func.func @transform_7(%arg0: i32, %arg1: i32) -> (i32, i32) {
    %c0_i32 = arith.constant 0 : i32
    %c0_i32_0 = arith.constant 0 : i32
    %c0_i32_1 = arith.constant 0 : i32
    return %c0_i32, %c0_i32_0 : i32, i32
  }
  func.func @transform_8(%arg0: i32, %arg1: i32) -> (i32, i32, i32) {
    %c0_i32 = arith.constant 0 : i32
    %c0_i32_0 = arith.constant 0 : i32
    %c0_i32_1 = arith.constant 0 : i32
    %c0_i32_2 = arith.constant 0 : i32
    return %c0_i32, %c0_i32_0, %c0_i32_1 : i32, i32, i32
  }
  func.func @transform_9(%arg0: i32, %arg1: i32) -> (i32, i32) {
    %c0_i32 = arith.constant 0 : i32
    %c0_i32_0 = arith.constant 0 : i32
    %c0_i32_1 = arith.constant 0 : i32
    return %c0_i32, %c0_i32_0 : i32, i32
  }
  func.func @transform_10(%arg0: i32, %arg1: i32) -> (i32, i32) {
    %c0_i32 = arith.constant 0 : i32
    %c0_i32_0 = arith.constant 0 : i32
    %c0_i32_1 = arith.constant 0 : i32
    return %c0_i32, %c0_i32_0 : i32, i32
  }
  func.func @transform_11(%arg0: i32, %arg1: i32) -> (i32, i32) {
    %c0_i32 = arith.constant 0 : i32
    %c0_i32_0 = arith.constant 0 : i32
    %c0_i32_1 = arith.constant 0 : i32
    return %c0_i32, %c0_i32_0 : i32, i32
  }
  func.func @transform_12(%arg0: i32, %arg1: i32) -> (i32, i32) {
    %c0_i32 = arith.constant 0 : i32
    %c0_i32_0 = arith.constant 0 : i32
    %c0_i32_1 = arith.constant 0 : i32
    return %c0_i32, %c0_i32_0 : i32, i32
  }
  func.func @transform_13(%arg0: i32, %arg1: i32) -> (i32, i32) {
    %c0_i32 = arith.constant 0 : i32
    %c0_i32_0 = arith.constant 0 : i32
    %c0_i32_1 = arith.constant 0 : i32
    return %c0_i32, %c0_i32_0 : i32, i32
  }
  func.func @transform_14(%arg0: i32, %arg1: i32) -> (i32, i32, i32) {
    %c0_i32 = arith.constant 0 : i32
    %c0_i32_0 = arith.constant 0 : i32
    return %arg0, %arg1, %c0_i32 : i32, i32, i32
  }
}

</mosaic_0001>

<bundles_post_ra>
// kernel: tpu_custom_call.1
= control target key start
LH: loop header
LB: loop body
LE: loop exit
PB: predicated region body
PF: predicated region fallthrough
CT: control target
= control target key end

     0   :  { %s7845_s0 = inlined_call_operand.hbm [shape: bf16[2,256,128], index: 0, kind: input, shape index: {}]   ;;  %s7846_s1 = inlined_call_operand.hbm [shape: bf16[2,256,128], index: 1, kind: input, shape index: {}]   ;;  %s7847_s2 = inlined_call_operand.hbm [shape: bf16[2,256,128], index: 2, kind: input, shape index: {}]   ;;  %s7848_s3 = inlined_call_operand.hbm [shape: bf16[128,256], index: 3, kind: input, shape index: {}]   ;;  %s7849_s4 = inlined_call_operand.vmem [shape: f32[1,128], index: 4, kind: input, shape index: {}]   ;;  %s7850_s5 = inlined_call_operand.vmem [shape: f32[1,128], index: 5, kind: input, shape index: {}]   ;;  %s7851_s6 = inlined_call_operand.hbm [shape: bf16[128,128], index: 6, kind: input, shape index: {}]   ;;  %s7852_s7 = inlined_call_operand.vmem [shape: f32[1,128], index: 7, kind: input, shape index: {}]   ;;  %s7853_s8 = inlined_call_operand.hbm [shape: bf16[3,384,128], index: 8, kind: input, shape index: {}]   ;;  %s7854_s9 = inlined_call_operand.vmem [shape: f32[1,128], index: 9, kind: input, shape index: {}]   ;;  %s7855_s10 = inlined_call_operand.hbm [shape: bf16[128,128], index: 10, kind: input, shape index: {}]   ;;  %s7856_s11 = inlined_call_operand.vmem [shape: f32[1,128], index: 11, kind: input, shape index: {}]   ;;  %s7857_s12 = inlined_call_operand.hbm [shape: bf16[256,128], index: 12, kind: input, shape index: {}]   ;;  %s7858_s13 = inlined_call_operand.vmem [shape: f32[1,128], index: 13, kind: input, shape index: {}]   ;;  %s7859_s14 = inlined_call_operand.hbm [shape: bf16[2,256,128], index: 14, kind: output, shape index: {}]  }
   0x1   :  { %7921 = sst [smem:[#allocation58_spill]] %s7845_s0 }
   0x2   :  { %7922 = sst [smem:[#allocation59_spill]] %s7846_s1 }
   0x3   :  { %7923 = sst [smem:[#allocation60_spill]] %s7847_s2 }
   0x4   :  { %7924 = sst [smem:[#allocation61_spill]] %s7848_s3 }
   0x5   :  { %7925 = sst [smem:[#allocation62_spill]] %s7849_s4 }
   0x6   :  { %7926 = sst [smem:[#allocation63_spill]] %s7850_s5 }
   0x7   :  { %7927 = sst [smem:[#allocation64_spill]] %s7851_s6 }
   0x8   :  { %7928 = sst [smem:[#allocation65_spill]] %s7852_s7 }
   0x9   :  { %7929 = sst [smem:[#allocation66_spill]] %s7853_s8 }
   0xa   :  { %7930 = sst [smem:[#allocation67_spill]] %s7854_s9 }
   0xb   :  { %7931 = sst [smem:[#allocation68_spill]] %s7855_s10 }
   0xc   :  { %7932 = sst [smem:[#allocation69_spill]] %s7856_s11 }
   0xd   :  { %7933 = sst [smem:[#allocation70_spill]] %s7857_s12 }
   0xe   :  { %7934 = sst [smem:[#allocation71_spill]] %s7858_s13 }
   0xf   :  { %7935 = sst [smem:[#allocation72_spill]] %s7859_s14 }
  0x10   :  { %19 = vsyncpa [#allocation3], 0 }
  0x11   :  { %21 = vsyncpa [#allocation3 + $0x1], 0 }
  0x12   :  { %22 = vsyncpa [#allocation6], 0 }
  0x13   :  { %24 = vsyncpa [#allocation6 + $0x1], 0 }
  0x14   :  { %25 = vsyncpa [#allocation9], 0 }
  0x15   :  { %26 = vsyncpa [#allocation12], 0 }
  0x16   :  { %27 = vsyncpa [#allocation15], 0 }
  0x17   :  { %28 = vsyncpa [#allocation4], 0 }
  0x18   :  { %30 = vsyncpa [#allocation4 + $0x1], 0  ;;  %s6285_s29 = smov 0   ;;  %s6287_s30 = smov 0  }
  0x19   :  { %s6289_s15 = smov 0   ;;  %s6291_s16 = smov 0  }
  0x1a   :  { %s6293_s17 = smov 0   ;;  %s6295_s18 = smov 0  }
  0x1b   :  { %s6297_s19 = smov 0   ;;  %s6299_s20 = smov 0  }
  0x1c   :  { %s6301_s21 = smov 0   ;;  %s6303_s22 = smov 0  }
  0x1d   :  { %s6305_s23 = smov 0   ;;  %s6307_s24 = smov 0  }
  0x1e   :  { %s6309_s25 = smov 0   ;;  %s6311_s26 = smov 0  }
  0x1f LB: > { %7936 = sst [smem:[#allocation24_spill]] %s6139_s29  ;;  %s6356_s27 = sadd.s32 4294967295, %s6191_s26   ;;  %s6191_s26 = sphi %s6311_s26, %s36_s26   ;;  %s6187_s25 = sphi %s6309_s25, %s8116_s25   ;;  %s6183_s24 = sphi %s6307_s24, %s8124_s24   ;;  %s6179_s23 = sphi %s6305_s23, %s8114_s23   ;;  %s6175_s22 = sphi %s6303_s22, %s8113_s22   ;;  %s6171_s21 = sphi %s6301_s21, %s8123_s21   ;;  %s6167_s20 = sphi %s6299_s20, %s8122_s20   ;;  %s6163_s19 = sphi %s6297_s19, %s8121_s19   ;;  %s6159_s18 = sphi %s6295_s18, %s8120_s18   ;;  %s6155_s17 = sphi %s6293_s17, %s8119_s17   ;;  %s6151_s16 = sphi %s6291_s16, %s8118_s16   ;;  %s6147_s15 = sphi %s6289_s15, %s8117_s15   ;;  %s6143_s30 = sphi %s6287_s30, %s8109_s30   ;;  %s6139_s29 = sphi %s6285_s29, %s8108_s29  }
  0x20   : > { %7937 = sst [smem:[#allocation25_spill]] %s6143_s30  ;;  %p4455_p0 = scmp.ge.s32.totalorder %s6191_s26, 1 }
  0x21   : > { %7938 = sst [smem:[#allocation26_spill]] %s6147_s15  ;;  %p7864_p1 = scmp.eq.s32.totalorder %s6356_s27, 0 }
  0x22   : > { %7939 = sst [smem:[#allocation27_spill]] %s6155_s17  ;;  %p412_p2 = scmp.lt.s32.totalorder %s6191_s26, 5 }
  0x23   : > { %7940 = sst [smem:[#allocation28_spill]] %s6175_s22  ;;  %s6193_s14 = smov [#allocation8]  }
  0x24   : > { %7941 = sst [smem:[#allocation29_spill]] %s6179_s23  ;;  %p6361_p3 = pnand %p4455_p0, %p412_p2 }
  0x25   : > { %7942 = sst [smem:[#allocation30_spill]] %s6183_s24  ;;  %s424_s23 = sshll.u32 %s6193_s14, 4  ;;  %s425_s23 = int_to_ptr.vmem [resolvable:$true] %s424_s23 }
  0x26   : > { %7943 = sst [smem:[#allocation31_spill]] %s6187_s25  ;;  %p5490_p4 = pneg %p6361_p3 }
  0x27   : > { %s7944_s28 = scalar_select %p6361_p3, 1, 0 }
  0x28   : > { %p6369_p5 = pnand %p5490_p4, %p7864_p1  ;;  %s6194_s11 = smov [#allocation11]  }
  0x29   : > { %7945 = sst [smem:[#allocation32_spill]] %s7944_s28  ;;  %s459_s9 = sshll.u32 %s6194_s11, 4  ;;  %s460_s9 = int_to_ptr.vmem [resolvable:$true] %s459_s9 }
  0x2a   : > { %s7946_s13 = scalar_select %p6369_p5, 1, 0 }
  0x2b   : > { %s7947_s3 = sld [smem:[#allocation61_spill]]  ;;  %p6381_p7 = pneg %p6369_p5 }
  0x31   : > { %s5795_s5 = scalar_lea.hbm %s7947_s3, 2048 }
  0x32   : > { %p5796_p6 = scmp.ne.s32.totalorder %s7947_s3, %s5795_s5  ;;  %p5802_p10 = scmp.lt.u32.totalorder %s5795_s5, %s7947_s3 }
  0x34   : > { %p5798_p8 = pnand %p6381_p7, %p5796_p6 }
  0x36   : > { %p5799_p9 = pneg %p5798_p8 }
  0x38   : > { %p5804_p11 = pnand %p5802_p10, %p5799_p9 }
  0x3a   : > { %5807 = shalt.err (!%p5804_p11)
}
  0x3b   : > { %s5808_s7 = scalar_lea.vmem %s425_s23, 2048  ;;  %p5816_p2 = scmp.lt.s32.totalorder %s425_s23, %s425_s23 }
  0x3c   : > { %p5809_p12 = scmp.ne.s32.totalorder %s425_s23, %s5808_s7  ;;  %p5817_p4 = scmp.lt.s32.totalorder %s5808_s7, %s5808_s7 }
  0x3e   : > { %p5811_p13 = pnand %p5809_p12, %p6381_p7  ;;  %p5818_p1 = por %p5817_p4, %p5816_p2 }
  0x40   : > { %p5812_p0 = pneg %p5811_p13 }
  0x42   : > { %p5819_p3 = pnand %p5818_p1, %p5812_p0 }
  0x44   : > { %5822 = shalt.err (!%p5819_p3)
}
  0x45   : > { %s6195_s2 = smov 128   ;;  %s6196_s4 = smov 8  }
  0x46   : > { %5493 = dma.hbm_to_vmem [thread:$0]  (!%p6369_p5), %s7947_s3, 2048, %s425_s23, [#allocation9], %s6195_s2, %s6195_s2, %s6196_s4  }
  0x47   : > { %s7949_s8 = sld [smem:[#allocation66_spill]] }
  0x4d   : > { %s5823_s28 = scalar_lea.hbm %s7949_s8, 9216 }
  0x4e   : > { %p5824_p6 = scmp.ne.s32.totalorder %s7949_s8, %s5823_s28  ;;  %p5830_p8 = scmp.lt.u32.totalorder %s5823_s28, %s7949_s8 }
  0x50   : > { %p5826_p1 = pnand %p5824_p6, %p6381_p7 }
  0x52   : > { %p5827_p3 = pneg %p5826_p1 }
  0x54   : > { %p5832_p9 = pnand %p5830_p8, %p5827_p3 }
  0x56   : > { %5835 = shalt.err (!%p5832_p9)
}
  0x57   : > { %s5836_s11 = scalar_lea.vmem %s460_s9, 9216  ;;  %p5844_p13 = scmp.lt.s32.totalorder %s460_s9, %s460_s9 }
  0x58   : > { %p5837_p10 = scmp.ne.s32.totalorder %s460_s9, %s5836_s11  ;;  %p5845_p0 = scmp.lt.s32.totalorder %s5836_s11, %s5836_s11 }
  0x5a   : > { %p5839_p11 = pnand %p5837_p10, %p6381_p7  ;;  %p5846_p2 = por %p5845_p0, %p5844_p13 }
  0x5c   : > { %p5840_p12 = pneg %p5839_p11 }
  0x5e   : > { %p5847_p4 = pnand %p5846_p2, %p5840_p12 }
  0x60   : > { %5850 = shalt.err (!%p5847_p4)
}
  0x61   : > { %s7869_s30 = smov 64   ;;  %s7871_s0 = smov 4  }
  0x62   : > { %5499 = dma.hbm_to_vmem [thread:$0]  (!%p6369_p5), %s7949_s8, 9216, %s460_s9, [#allocation12], %s7869_s30, %s7869_s30, %s7871_s0  }
  0x63   : > { %s45_s2 = sadd.s32 1, %s6183_s24  ;;  %s48_s4 = sadd.s32 1, %s6187_s25 }
  0x64   : > { %p46_p6 = scmp.ge.s32.totalorder %s45_s2, 2  ;;  %p7883_p1 = scmp.eq.s32.totalorder %s6191_s26, 0 }
  0x65   : > { %s4449_s5 = sshll.u32 %s6183_s24, 3  ;;  %s93_s29 = sadd.s32 1, %s6159_s18 }
  0x66   : > { %s8126_s2 = smov (%p46_p6, %s45_s2), 0  ;;  %s8128_s4 = smov (!%p46_p6, %s48_s4), %s6187_s25 }
  0x67   : > { %7950 = sst [smem:[#allocation33_spill]] %s8126_s2  ;;  %s53_s22 = ssub.s32 %s6183_s24, %s8126_s2 }
  0x68   : > { %s4450_s28 = sadd.s32 4294967295, %s4449_s5  ;;  %p50_p3 = scmp.ge.s32.totalorder %s8128_s4, 2 }
  0x69   : > { %p82_p8 = scmp.gt.s32.totalorder %s4450_s28, 0  ;;  %s4451_s9 = sshll.u32 %s8126_s2, 3 }
  0x6a   : > { %p100_p9 = scmp.ne.s32.totalorder %s6159_s18, %s6155_s17  ;;  %s8130_s4 = smov (%p50_p3, %s8128_s4), 0 }
  0x6b   : > { %7951 = sst [smem:[#allocation34_spill]] %s8130_s4  ;;  %s8132_s28 = smov (!%p82_p8, %s4450_s28), 0 }
  0x6c   : > { %s6435_s7 = ssub.s32 %s6187_s25, %s8130_s4  ;;  %s4452_s11 = sadd.s32 4294967295, %s4451_s9 }
  0x6d   : > { %7952 = sst [smem:[#allocation35_spill]] %s6435_s7  ;;  %s6438_s15 = sor.u32 %s53_s22, %s6435_s7 }
  0x6e   : > { %p86_p10 = scmp.gt.s32.totalorder %s4452_s11, 0  ;;  %p6443_p12 = por %p100_p9, %p7883_p1 }
  0x6f   : > { %p106_p13 = scmp.ne.s32.totalorder %s6155_s17, %s6151_s16  ;;  %s6449_s30 = sadd.s32 8, %s4449_s5 }
  0x70   : > { %s8134_s11 = smov (!%p86_p10, %s4452_s11), 0  ;;  %7954 = sst [smem:[#allocation36_spill]] %s6449_s30 }
  0x71   : > { %s89_s0 = ssub.s32 %s8132_s28, %s8134_s11  ;;  %p7955_p2 = scmp.eq.s32.totalorder %s6356_s27, 0 }
  0x72   : > { %s90_s22 = sor.u32 %s89_s0, %s6435_s7  ;;  %s6459_s8 = sadd.s32 8, %s4451_s9 }
  0x73   : > { %p6455_p4 = por %p106_p13, %p7955_p2  ;;  %p91_p6 = scmp.eq.s32.totalorder %s90_s22, 0 }
  0x74   : > { %p7882_p8 = scmp.lt.s32.totalorder %s6191_s26, 4  ;;  %s6467_s5 = sshll.u32 %s6187_s25, 5 }
  0x75   : > { %s7956_s3 = scalar_select %p6455_p4, 1, 0 }
  0x76   : > { %s6464_s16 = scalar_select %p91_p6, %s6159_s18, %s93_s29  }
  0x77   : > { %7957 = sst [smem:[#allocation37_spill]] %s7956_s3  ;;  %s531_s11 = sand.u32 1, %s6191_s26  }
  0x78   : > { %s533_s0 = sand.u32 1, %s6159_s18   ;;  %s4469_s2 = sshll.u32 %s8132_s28, 1 }
  0x79   : > { %s4466_s4 = sshll.u32 %s533_s0, 3  ;;  %s545_s17 = sadd.s32 %s4469_s2, %s6467_s5 }
  0x7a   : > { %s4471_s7 = sshll.u32 %s545_s17, 6  ;;  %s535_s3 = scalar_lea.vmem [#allocation5], %s4466_s4 }
  0x7b   : > { %s548_s22 = sshll.u32 %s535_s3, 4  ;;  %s7958_s1 = sld [smem:[#allocation59_spill]]  ;;  %s6477_s22 = int_to_ptr.vmem [resolvable:$true] %s548_s22 }
  0x7c   : > { %p6483_p9 = pnand %p7882_p8, %p6443_p12  ;;  %s6199_s3 = smov [#allocation10]  }
  0x7d   : > { %s443_s17 = sshll.u32 %s6199_s3, 4  ;;  %s6489_s24 = scalar_lea.sflag [#allocation6], %s531_s11  ;;  %s6487_s17 = int_to_ptr.vmem [resolvable:$true] %s443_s17 }
  0x7e   : > { %p5853_p13 = pneg %p6483_p9 }
  0x81   : > { %s6475_s9 = scalar_lea.hbm %s7958_s1, %s4471_s7  ;;  %s5856_s28 = scalar_lea.hbm %s7958_s1, 4096 }
  0x82   : > { %s5851_s30 = scalar_lea.hbm %s6475_s9, 128  ;;  %p5857_p12 = scmp.lt.u32.totalorder %s6475_s9, %s7958_s1 }
  0x83   : > { %p5852_p10 = scmp.ne.s32.totalorder %s6475_s9, %s5851_s30  ;;  %p5858_p3 = scmp.lt.u32.totalorder %s5856_s28, %s5851_s30 }
  0x84   : > { %p5860_p8 = scmp.lt.u32.totalorder %s5851_s30, %s6475_s9 }
  0x85   : > { %p5854_p2 = pnand %p5853_p13, %p5852_p10  ;;  %p5859_p0 = por %p5858_p3, %p5857_p12 }
  0x87   : > { %p5855_p6 = pneg %p5854_p2  ;;  %p5861_p1 = por %p5860_p8, %p5859_p0 }
  0x89   : > { %p5862_p11 = pnand %p5861_p1, %p5855_p6 }
  0x8b   : > { %5865 = shalt.err (!%p5862_p11)
}
  0x8c   : > { %s5866_s11 = scalar_lea.vmem %s6477_s22, 128  ;;  %s6200_s0 = smov [#allocation5]  }
  0x8d   : > { %p5867_p10 = scmp.ne.s32.totalorder %s6477_s22, %s5866_s11  ;;  %s5871_s3 = sshll.u32 %s6200_s0, 4  ;;  %s5872_s3 = int_to_ptr.vmem [resolvable:$false] %s5871_s3 }
  0x8e   : > { %s5873_s2 = scalar_lea.vmem %s5872_s3, 256  ;;  %p5874_p5 = scmp.lt.s32.totalorder %s6477_s22, %s5872_s3 }
  0x8f   : > { %p5869_p2 = pnand %p5867_p10, %p5853_p13  ;;  %p5875_p3 = scmp.lt.s32.totalorder %s5873_s2, %s5866_s11 }
  0x91   : > { %p5870_p4 = pneg %p5869_p2  ;;  %p5876_p12 = por %p5875_p3, %p5874_p5 }
  0x93   : > { %p5877_p0 = pnand %p5876_p12, %p5870_p4 }
  0x95   : > { %5880 = shalt.err (!%p5877_p0)
}
  0x96   : > { %s7960_s30 = smov 4   ;;  %s7961_s4 = smov 64  }
  0x97   : > { %5512 = dma.hbm_to_vmem [thread:$0]  (!%p6483_p9), %s6475_s9, 128, %s6477_s22, %s6489_s24, %s7961_s4, %s7961_s4, %s7960_s30  }
  0x98   : > { %s7962_s6 = sld [smem:[#allocation64_spill]] }
  0x9e   : > { %s5881_s23 = scalar_lea.hbm %s7962_s6, 1024 }
  0x9f   : > { %p5882_p5 = scmp.ne.s32.totalorder %s7962_s6, %s5881_s23  ;;  %p5888_p4 = scmp.lt.u32.totalorder %s5881_s23, %s7962_s6 }
  0xa1   : > { %p5884_p1 = pnand %p5882_p5, %p6381_p7 }
  0xa3   : > { %p5885_p11 = pneg %p5884_p1 }
  0xa5   : > { %p5890_p8 = pnand %p5888_p4, %p5885_p11 }
  0xa7   : > { %5893 = shalt.err (!%p5890_p8)
}
  0xa8   : > { %s5894_s22 = scalar_lea.vmem %s6487_s17, 1024  ;;  %p5902_p10 = scmp.lt.s32.totalorder %s6487_s17, %s6487_s17 }
  0xa9   : > { %p5895_p9 = scmp.ne.s32.totalorder %s6487_s17, %s5894_s22  ;;  %p5903_p2 = scmp.lt.s32.totalorder %s5894_s22, %s5894_s22 }
  0xab   : > { %p5897_p13 = pnand %p5895_p9, %p6381_p7  ;;  %p5904_p3 = por %p5903_p2, %p5902_p10 }
  0xad   : > { %p5898_p6 = pneg %p5897_p13 }
  0xaf   : > { %p5905_p12 = pnand %p5904_p3, %p5898_p6 }
  0xb1   : > { %5908 = shalt.err (!%p5905_p12)
}
  0xb2   : > { %p7963_p0 = scmp.ne.s32.totalorder %s7946_s13, 0  ;;  %s6201_s28 = smov [#allocation13]  }
  0xb3   : > { %s475_s7 = sshll.u32 %s6201_s28, 4  ;;  %s6202_s23 = smov [#allocation14]   ;;  %s476_s7 = int_to_ptr.vmem [resolvable:$true] %s475_s7 }
  0xb4   : > { %5496 = dma.hbm_to_vmem [thread:$0]  (!%p7963_p0), %s7962_s6, 1024, %s6487_s17, [#allocation9], %s7961_s4, %s7961_s4, %s7960_s30  }
  0xb5   : > { %s491_s0 = sshll.u32 %s6202_s23, 4  ;;  %s7964_s10 = sld [smem:[#allocation68_spill]]  ;;  %s492_s0 = int_to_ptr.vmem [resolvable:$true] %s491_s0 }
  0xbb   : > { %s5909_s11 = scalar_lea.hbm %s7964_s10, 1024 }
  0xbc   : > { %p5910_p5 = scmp.ne.s32.totalorder %s7964_s10, %s5909_s11  ;;  %p5916_p4 = scmp.lt.u32.totalorder %s5909_s11, %s7964_s10 }
  0xbe   : > { %p5912_p1 = pnand %p5910_p5, %p6381_p7 }
  0xc0   : > { %p5913_p11 = pneg %p5912_p1 }
  0xc2   : > { %p5918_p8 = pnand %p5916_p4, %p5913_p11 }
  0xc4   : > { %5921 = shalt.err (!%p5918_p8)
}
  0xc5   : > { %s5922_s17 = scalar_lea.vmem %s476_s7, 1024  ;;  %p5930_p10 = scmp.lt.s32.totalorder %s476_s7, %s476_s7 }
  0xc6   : > { %p5923_p9 = scmp.ne.s32.totalorder %s476_s7, %s5922_s17  ;;  %p5931_p2 = scmp.lt.s32.totalorder %s5922_s17, %s5922_s17 }
  0xc8   : > { %p5925_p13 = pnand %p5923_p9, %p6381_p7  ;;  %p5932_p3 = por %p5931_p2, %p5930_p10 }
  0xca   : > { %p5926_p6 = pneg %p5925_p13 }
  0xcc   : > { %p5933_p12 = pnand %p5932_p3, %p5926_p6 }
  0xce   : > { %5936 = shalt.err (!%p5933_p12)
}
  0xcf   : > { %5502 = dma.hbm_to_vmem [thread:$0]  (!%p7963_p0), %s7964_s10, 1024, %s476_s7, [#allocation12], %s7961_s4, %s7961_s4, %s7960_s30  }
  0xd0   : > { %s7965_s12 = sld [smem:[#allocation70_spill]] }
  0xd6   : > { %s5937_s23 = scalar_lea.hbm %s7965_s12, 2048 }
  0xd7   : > { %p5938_p5 = scmp.ne.s32.totalorder %s7965_s12, %s5937_s23  ;;  %p5944_p4 = scmp.lt.u32.totalorder %s5937_s23, %s7965_s12 }
  0xd9   : > { %p5940_p1 = pnand %p5938_p5, %p6381_p7 }
  0xdb   : > { %p5941_p11 = pneg %p5940_p1 }
  0xdd   : > { %p5946_p8 = pnand %p5944_p4, %p5941_p11 }
  0xdf   : > { %5949 = shalt.err (!%p5946_p8)
}
  0xe0   : > { %s5950_s9 = scalar_lea.vmem %s492_s0, 2048  ;;  %p5958_p10 = scmp.lt.s32.totalorder %s492_s0, %s492_s0 }
  0xe1   : > { %p5951_p9 = scmp.ne.s32.totalorder %s492_s0, %s5950_s9  ;;  %p5959_p2 = scmp.lt.s32.totalorder %s5950_s9, %s5950_s9 }
  0xe3   : > { %p5953_p13 = pnand %p5951_p9, %p6381_p7  ;;  %p5960_p3 = por %p5959_p2, %p5958_p10 }
  0xe5   : > { %p5954_p6 = pneg %p5953_p13 }
  0xe7   : > { %p5961_p12 = pnand %p5960_p3, %p5954_p6 }
  0xe9   : > { %5964 = shalt.err (!%p5961_p12)
}
  0xea   : > { %s7966_s14 = sld [smem:[#allocation30_spill]]  ;;  %s4448_s13 = sadd.s32 4294967294, %s6191_s26  }
  0xeb   : > { %5505 = dma.hbm_to_vmem [thread:$0]  (!%p7963_p0), %s7965_s12, 2048, %s492_s0, [#allocation15], %s7961_s4, %s7961_s4, %s7960_s30  }
  0xec   : > { %s57_s1 = sadd.s32 1, %s6171_s21  ;;  %p64_p7 = scmp.ne.s32.totalorder %s6171_s21, %s6167_s20 }
  0xed   : > { %p7967_p5 = scmp.eq.s32.totalorder %s6438_s15, 0  ;;  %p7969_p1 = scmp.eq.s32.totalorder %s6191_s26, 0 }
  0xee   : > { %p70_p4 = scmp.ne.s32.totalorder %s6167_s20, %s6163_s19  ;;  %p399_p8 = scmp.eq.s32.totalorder %s6356_s27, 3 }
  0xef   : > { %s6595_s25 = scalar_select %p7967_p5, %s6171_s21, %s57_s1  }
  0xf0   : > { %p6599_p11 = por %p7969_p1, %p64_p7  ;;  %p405_p9 = scmp.eq.s32.totalorder %s4448_s13, 3 }
  0xf1   : > { %7968 = sst [smem:[#allocation38_spill]] %s6595_s25  ;;  %p7971_p13 = scmp.eq.s32.totalorder %s6356_s27, 0 }
  0xf2   : > { %s508_s0 = sand.u32 1, %s6171_s21   ;;  %p6613_p0 = por %p399_p8, %p64_p7 }
  0xf3   : > { %p6608_p6 = por %p7971_p13, %p70_p4  ;;  %p6617_p10 = por %p405_p9, %p70_p4 }
  0xf4   : > { %s7974_s15 = scalar_select %p6613_p0, 1, 0 }
  0xf5   : > { %s7972_s28 = scalar_select %p6608_p6, 1, 0 }
  0xf6   : > { %s7975_s23 = scalar_select %p6617_p10, 1, 0 }
  0xf7   : > { %7973 = sst [smem:[#allocation39_spill]] %s7972_s28  ;;  %s4462_s3 = sshll.u32 %s508_s0, 6 }
  0xf8   : > { %s4463_s29 = sshll.u32 %s7966_s14, 4  ;;  %s512_s22 = scalar_lea.vmem [#allocation2], %s4462_s3 }
  0xf9   : > { %s518_s11 = sadd.s32 %s6467_s5, %s4463_s29  ;;  %s521_s9 = sshll.u32 %s512_s22, 4  ;;  %s6623_s9 = int_to_ptr.vmem [resolvable:$true] %s521_s9 }
  0xfa   : > { %s4465_s7 = sshll.u32 %s518_s11, 6  ;;  %s7976_s1 = sld [smem:[#allocation58_spill]] }
  0xfb   : > { %p7977_p2 = scmp.lt.s32.totalorder %s6191_s26, 4  ;;  %s6638_s14 = scalar_lea.sflag [#allocation3], %s508_s0 }
  0xfd   : > { %p6634_p3 = pnand %p7977_p2, %p6599_p11 }
  0xff   : > { %p5967_p7 = pneg %p6634_p3 }
 0x100   : > { %s6628_s6 = scalar_lea.hbm %s7976_s1, %s4465_s7  ;;  %s5970_s11 = scalar_lea.hbm %s7976_s1, 4096 }
 0x101   : > { %s5965_s3 = scalar_lea.hbm %s6628_s6, 1024  ;;  %p5971_p11 = scmp.lt.u32.totalorder %s6628_s6, %s7976_s1 }
 0x102   : > { %p5966_p12 = scmp.ne.s32.totalorder %s6628_s6, %s5965_s3  ;;  %p5972_p4 = scmp.lt.u32.totalorder %s5970_s11, %s5965_s3 }
 0x103   : > { %p5974_p9 = scmp.lt.u32.totalorder %s5965_s3, %s6628_s6 }
 0x104   : > { %p5968_p5 = pnand %p5967_p7, %p5966_p12  ;;  %p5973_p8 = por %p5972_p4, %p5971_p11 }
 0x106   : > { %p5969_p1 = pneg %p5968_p5  ;;  %p5975_p13 = por %p5974_p9, %p5973_p8 }
 0x108   : > { %p5976_p2 = pnand %p5975_p13, %p5969_p1 }
 0x10a   : > { %5979 = shalt.err (!%p5976_p2)
}
 0x10b   : > { %s5980_s0 = scalar_lea.vmem %s6623_s9, 1024  ;;  %s6203_s17 = smov [#allocation2]  }
 0x10c   : > { %p5981_p12 = scmp.ne.s32.totalorder %s6623_s9, %s5980_s0  ;;  %s5985_s13 = sshll.u32 %s6203_s17, 4  ;;  %s5986_s13 = int_to_ptr.vmem [resolvable:$false] %s5985_s13 }
 0x10d   : > { %s5987_s2 = scalar_lea.vmem %s5986_s13, 2048  ;;  %p5988_p0 = scmp.lt.s32.totalorder %s6623_s9, %s5986_s13 }
 0x10e   : > { %p5983_p5 = pnand %p5981_p12, %p5967_p7  ;;  %p5989_p11 = scmp.lt.s32.totalorder %s5987_s2, %s5980_s0 }
 0x110   : > { %p5984_p10 = pneg %p5983_p5  ;;  %p5990_p4 = por %p5989_p11, %p5988_p0 }
 0x112   : > { %p5991_p8 = pnand %p5990_p4, %p5984_p10 }
 0x114   : > { %5994 = shalt.err (!%p5991_p8)
}
 0x115   : > { %s7979_s3 = sld [smem:[#allocation26_spill]]  ;;  %s7980_s29 = sld [smem:[#allocation36_spill]] }
 0x116   : > { %s7981_s11 = sld [smem:[#allocation25_spill]]  ;;  %s7983_s7 = sld [smem:[#allocation35_spill]] }
 0x117   : > { %s7982_s22 = sld [smem:[#allocation24_spill]]  ;;  %p7985_p10 = scmp.lt.s32.totalorder %s6459_s8, 15 }
 0x118   : > { %5509 = dma.hbm_to_vmem [thread:$0]  (!%p6634_p3), %s6628_s6, 1024, %s6623_s9, %s6638_s14, %s7961_s4, %s7961_s4, %s7960_s30  }
 0x119   : > { %s8138_s8 = smov (!%p7985_p10, %s6459_s8), 15  ;;  %p7986_p9 = scmp.eq.s32.totalorder %s6191_s26, 0 }
 0x11a   : > { %p7987_p12 = scmp.eq.s32.totalorder %s6356_s27, 0  ;;  %s7989_s25 = sld [smem:[#allocation60_spill]] }
 0x11b   : > { %s129_s10 = sadd.s32 1, %s7979_s3  ;;  %p7984_p0 = scmp.lt.s32.totalorder %s7980_s29, 15 }
 0x11c   : > { %p136_p7 = scmp.ne.s32.totalorder %s7979_s3, %s7981_s11  ;;  %s560_s17 = sand.u32 1, %s7979_s3  }
 0x11d   : > { %s8136_s29 = smov (!%p7984_p0, %s7980_s29), 15  ;;  %p142_p1 = scmp.ne.s32.totalorder %s7981_s11, %s7982_s22 }
 0x11e   : > { %s125_s0 = ssub.s32 %s8136_s29, %s8138_s8  ;;  %p138_p13 = por %p136_p7, %p7986_p9 }
 0x11f   : > { %s126_s13 = sor.u32 %s125_s0, %s7983_s7  ;;  %p6686_p5 = por %p142_p1, %p7987_p12 }
 0x120   : > { %p127_p2 = scmp.eq.s32.totalorder %s126_s13, 0  ;;  %s4472_s6 = sshll.u32 %s560_s17, 3 }
 0x121   : > { %s7988_s2 = scalar_select %p6686_p5, 1, 0 }
 0x122   : > { %s4474_s9 = sshll.u32 %s8136_s29, 1  ;;  %s8140_s3 = smov (!%p127_p2, %s7979_s3), %s129_s10 }
 0x123   : > { %s572_s14 = sadd.s32 %s4474_s9, %s6467_s5  ;;  %s562_s12 = scalar_lea.vmem [#allocation7], %s4472_s6 }
 0x124   : > { %s4476_s1 = sshll.u32 %s572_s14, 6  ;;  %s575_s11 = sshll.u32 %s562_s12, 4  ;;  %s6699_s11 = int_to_ptr.vmem [resolvable:$true] %s575_s11 }
 0x125   : > { %s7990_s28 = smov %s7989_s25  ;;  %s6697_s7 = scalar_lea.hbm %s7989_s25, %s4476_s1 }
 0x126   : > { %p7991_p3 = scmp.lt.s32.totalorder %s6191_s26, 4  ;;  %s5995_s5 = scalar_lea.hbm %s6697_s7, 128 }
 0x127   : > { %p5996_p4 = scmp.ne.s32.totalorder %s6697_s7, %s5995_s5  ;;  %s6000_s1 = scalar_lea.hbm %s7990_s28, 4096 }
 0x128   : > { %p6703_p11 = pnand %p7991_p3, %p138_p13  ;;  %p6001_p7 = scmp.lt.u32.totalorder %s6697_s7, %s7990_s28 }
 0x129   : > { %p6002_p1 = scmp.lt.u32.totalorder %s6000_s1, %s5995_s5  ;;  %p6004_p13 = scmp.lt.u32.totalorder %s5995_s5, %s6697_s7 }
 0x12a   : > { %p5997_p8 = pneg %p6703_p11 }
 0x12b   : > { %p6003_p9 = por %p6002_p1, %p6001_p7 }
 0x12c   : > { %p5998_p0 = pnand %p5997_p8, %p5996_p4 }
 0x12d   : > { %p6005_p2 = por %p6004_p13, %p6003_p9 }
 0x12e   : > { %p5999_p10 = pneg %p5998_p0 }
 0x130   : > { %p6006_p12 = pnand %p6005_p2, %p5999_p10 }
 0x132   : > { %6009 = shalt.err (!%p6006_p12)
}
 0x133   : > { %s6010_s17 = scalar_lea.vmem %s6699_s11, 128  ;;  %s6204_s13 = smov [#allocation7]  }
 0x134   : > { %p6011_p3 = scmp.ne.s32.totalorder %s6699_s11, %s6010_s17  ;;  %s6015_s6 = sshll.u32 %s6204_s13, 4  ;;  %s6016_s6 = int_to_ptr.vmem [resolvable:$false] %s6015_s6 }
 0x135   : > { %s6017_s9 = scalar_lea.vmem %s6016_s6, 256  ;;  %p6018_p5 = scmp.lt.s32.totalorder %s6699_s11, %s6016_s6 }
 0x136   : > { %p6013_p4 = pnand %p6011_p3, %p5997_p8  ;;  %p6019_p7 = scmp.lt.s32.totalorder %s6017_s9, %s6010_s17 }
 0x138   : > { %p6014_p0 = pneg %p6013_p4  ;;  %p6020_p1 = por %p6019_p7, %p6018_p5 }
 0x13a   : > { %p6021_p9 = pnand %p6020_p1, %p6014_p0 }
 0x13c   : > { %6024 = shalt.err (!%p6021_p9)
}
 0x13d   : > { %5515 = dma.hbm_to_vmem [thread:$0]  (!%p6703_p11), %s6697_s7, 128, %s6699_s11, %s6489_s24, %s7961_s4, %s7961_s4, %s7960_s30  }
 0x13e   : > { %s7993_s14 = sld [smem:[#allocation32_spill]] }
 0x144   : > { %p7994_p8 = scmp.ne.s32.totalorder %s7993_s14, 0 }
 0x146   : > { %587 = sbr.rel (%p7994_p8) target bundleno = 1790 (0x6fe), region = 76 }
 0x14d   : > { %s6739_s8 = sand.u32 1, %s6167_s20  }
 0x14e   : > { %s4478_s5 = sshll.u32 %s6739_s8, 6  ;;  %s590_s12 = scalar_lea.sflag [#allocation3], %s6739_s8 }
 0x14f   : > { %s6745_s29 = scalar_lea.vmem [#allocation2], %s4478_s5 }
 0x150   : > { %6110 = dma.done.wait (%p6608_p6), %s590_s12, 1024  }
 0x151   : > { %6112 = vsyncadd (%p6608_p6), %s590_s12, 4294966272  ;;  %s7996_s24 = sld [smem:[#allocation27_spill]]  ;;  %s7997_s30 = sld [smem:[#allocation37_spill]] }
 0x152   : > { %s598_s4 = sand.u32 1, %s6356_s27  }
 0x153   : > { %s599_s25 = scalar_lea.sflag [#allocation6], %s598_s4 }
 0x157   : > { %s600_s11 = sand.u32 1, %s7996_s24   ;;  %p7998_p5 = scmp.ne.s32.totalorder %s7997_s30, 0 }
 0x158   : > { %s6753_s7 = sshll.u32 %s600_s11, 3 }
 0x159   : > { %s602_s1 = scalar_lea.vmem [#allocation5], %s6753_s7 }
 0x15a   : > { %6114 = dma.done.wait (%p7998_p5), %s599_s25, 128  }
 0x15b   : > { %6116 = vsyncadd (%p7998_p5), %s599_s25, 4294967168  ;;  %s7999_s10 = sld [smem:[#allocation25_spill]]  ;;  %p8000_p6 = scmp.ne.s32.totalorder %s7988_s2, 0 }
 0x161   : > { %s609_s0 = sand.u32 1, %s7999_s10  }
 0x162   : > { %s6761_s17 = sshll.u32 %s609_s0, 3 }
 0x163   : > { %s611_s13 = scalar_lea.vmem [#allocation7], %s6761_s17 }
 0x164   : > { %6118 = dma.done.wait (%p8000_p6), %s599_s25, 128  }
 0x165   : > { %6120 = vsyncadd (%p8000_p6), %s599_s25, 4294967168  ;;  %p8001_p11 = scmp.eq.s32.totalorder %s6356_s27, 0 }
 0x167   : > { %6122 = dma.done.wait (%p8001_p11), [#allocation9], 3072   ;;  %p8002_p10 = pmov %p8001_p11 }
 0x169   : > { %6124 = vsyncadd (%p8002_p10), [#allocation9], 4294964224  ;;  %p8003_p13 = pmov %p8002_p10 }
 0x16a   : > { %p8004_p2 = pmov %p8002_p10 }
 0x16b   : > { %6126 = dma.done.wait (%p8003_p13), [#allocation12], 10240  }
 0x16c   : > { %6128 = vsyncadd (%p8004_p2), [#allocation12], 4294957056  ;;  %p8005_p12 = pmov %p8004_p2 }
 0x16d   : > { %p8006_p3 = pmov %p8004_p2 }
 0x16e   : > { %6130 = dma.done.wait (%p8005_p12), [#allocation15], 2048  }
 0x16f   : > { %6132 = vsyncadd (%p8006_p3), [#allocation15], 4294965248  ;;  %v6205_v0 = vmov 0   ;;  %v5657_v1 = vld [vmem:[#allocation8 + $0x4] ss:$8 sps:$4 sm:$0xff]   ;;  %v5684_v22 = vld [vmem:[%s6745_s29 + $0x10] sm:$0xff]  }
 0x170   : > { %907 = vmatprep.mubr.bf16.mxu0 %v6205_v0  ;;  %v5659_v2 = vld [vmem:[#allocation8] ss:$8 sps:$4 sm:$0xff]   ;;  %875 = vmatprep.subr.bf16.mxu0 %v5657_v1  ;;  %v5660_v3 = vld [vmem:[#allocation8 + $0x14] ss:$8 sps:$4 sm:$0xff]   ;;  %v5662_v4 = vld [vmem:[#allocation8 + $0x10] ss:$8 sps:$4 sm:$0xff]  }
 0x171   : > { %876 = vmatpush1.bf16.msra.mxu0 %v5659_v2  ;;  %v5663_v5 = vld [vmem:[#allocation8 + $0x24] ss:$8 sps:$4 sm:$0xff]   ;;  %v5665_v6 = vld [vmem:[#allocation8 + $0x20] ss:$8 sps:$4 sm:$0xff]   ;;  %v5666_v7 = vld [vmem:[#allocation8 + $0x34] ss:$8 sps:$4 sm:$0xff]  }
 0x172   : > { %877 = vmatprep.subr.bf16.mxu0 %v5660_v3  ;;  %v5668_v8 = vld [vmem:[#allocation8 + $0x30] ss:$8 sps:$4 sm:$0xff]   ;;  %v5669_v9 = vld [vmem:[#allocation8 + $0x44] ss:$8 sps:$4 sm:$0xff]   ;;  %v5671_v10 = vld [vmem:[#allocation8 + $0x40] ss:$8 sps:$4 sm:$0xff]  }
 0x173   : > { %v5672_v11 = vld [vmem:[#allocation8 + $0x54] ss:$8 sps:$4 sm:$0xff]   ;;  %v5674_v12 = vld [vmem:[#allocation8 + $0x50] ss:$8 sps:$4 sm:$0xff]   ;;  %v5675_v13 = vld [vmem:[#allocation8 + $0x64] ss:$8 sps:$4 sm:$0xff]  }
 0x174   : > { %v5677_v14 = vld [vmem:[#allocation8 + $0x60] ss:$8 sps:$4 sm:$0xff]   ;;  %v5678_v16 = vld [vmem:[#allocation8 + $0x74] ss:$8 sps:$4 sm:$0xff]   ;;  %v5680_v18 = vld [vmem:[#allocation8 + $0x70] ss:$8 sps:$4 sm:$0xff]  }
 0x175   : > { %878 = vmatpush1.bf16.msra.mxu0 %v5662_v4  ;;  %v5691_v15 = vld [vmem:[#allocation10] sm:$0xff]   ;;  %v5692_v17 = vld [vmem:[#allocation10 + $0x8] sm:$0xff]   ;;  %v5685_v23 = vld [vmem:[%s6745_s29 + $0x18] sm:$0xff]   ;;  %s8007_s6 = sld [smem:[#allocation62_spill]]  ;;  %s8008_s22 = sld [smem:[#allocation63_spill]] }
 0x176   : > { %879 = vmatprep.subr.bf16.mxu0 %v5663_v5  ;;  %5202 = vmatprep.subr.bf16.mxu1 %v5691_v15  ;;  %v5681_v19 = vld [vmem:[%s602_s1] sm:$0xff]   ;;  %v5688_v26 = vld [vmem:[%s6745_s29 + $0x30] sm:$0xff]   ;;  %v5689_v27 = vld [vmem:[%s6745_s29 + $0x38] sm:$0xff]   ;;  %s8027_s12 = sld [smem:[#allocation28_spill]]  ;;  %s8028_s30 = sld [smem:[#allocation65_spill]] }
 0x177   : > { %5203 = vmatpush3.bf16.msra.mxu1 %v5691_v15  ;;  %v5682_v20 = vld [vmem:[%s6745_s29] sm:$0xff]   ;;  %v5683_v21 = vld [vmem:[%s6745_s29 + $0x8] sm:$0xff]   ;;  %v5690_v28 = vld [vmem:[%s611_s13] sm:$0xff]   ;;  %s8075_s1 = sld [smem:[#allocation67_spill]]  ;;  %s8083_s17 = sld [smem:[#allocation69_spill]] }
 0x178   : > { %5204 = vmatprep.subr.bf16.mxu1 %v5692_v17  ;;  %v5686_v24 = vld [vmem:[%s6745_s29 + $0x20] sm:$0xff]   ;;  %v5687_v25 = vld [vmem:[%s6745_s29 + $0x28] sm:$0xff]   ;;  %v5693_v29 = vld [vmem:[#allocation10 + $0x10] sm:$0xff]   ;;  %s8102_s2 = sld [smem:[#allocation71_spill]]  ;;  %s4245_s7 = scalar_lea.sflag [#allocation4], %s6739_s8 }
 0x179   : > { %880 = vmatpush1.bf16.msra.mxu0 %v5665_v6  ;;  %v5694_v30 = vld [vmem:[#allocation10 + $0x18] sm:$0xff]   ;;  %v5695_v31 = vld [vmem:[#allocation10 + $0x20] sm:$0xff]   ;;  %v5696_v32 = vld [vmem:[#allocation10 + $0x28] sm:$0xff]   ;;  %p8105_p1 = scmp.ne.s32.totalorder %s7974_s15, 0 }
 0x17a   : > { %881 = vmatprep.subr.bf16.mxu0 %v5666_v7  ;;  %v5697_v33 = vld [vmem:[#allocation10 + $0x30] sm:$0xff]   ;;  %v5698_v34 = vld [vmem:[#allocation10 + $0x38] sm:$0xff]   ;;  %v5699_v35 = vld [vmem:[#allocation11 + $0x140] sm:$0xff]  }
 0x17b   : > { %5205 = vmatpush3.bf16.msra.mxu1 %v5692_v17  ;;  %v5700_v36 = vld [vmem:[#allocation11 + $0x100] sm:$0xff]   ;;  %v5702_v37 = vld [vmem:[#allocation11 + $0x148] sm:$0xff]   ;;  %v5708_v38 = vld [vmem:[#allocation11 + $0x150] sm:$0xff]  }
 0x17c   : > { %5206 = vmatprep.subr.bf16.mxu1 %v5693_v29  ;;  %v6805_v39 = vld [vmem:[%s8007_s6] ss:$0 sm:$0xff]  ;;  %p1489_p4 = scmp.gt.s32.totalorder %s8027_s12, 0  ;;  %p1533_p0 = scmp.lt.s32.totalorder %s8027_s12, 1 }
 0x17d   : > { %882 = vmatpush1.bf16.msra.mxu0 %v5668_v8  ;;  %v6812_v51 = vld [vmem:[%s8008_s22] ss:$0 sm:$0xff]  ;;  %s7739_s6 = scalar_lea.vmem [#allocation16], %s4478_s5  ;;  %s8103_s5 = sld [smem:[#allocation29_spill]] }
 0x17e   : > { %883 = vmatprep.subr.bf16.mxu0 %v5669_v9  ;;  %s1490_s4 = scalar_select %p1489_p4, 1, 0 }
 0x17f   : > { %5207 = vmatpush3.bf16.msra.mxu1 %v5693_v29  ;;  %s7163_s11 = scalar_select %p1533_p0, 1, 0 }
 0x180   : > { %5208 = vmatprep.subr.bf16.mxu1 %v5694_v30  ;;  %s4790_s9 = sshll.u32 %s8027_s12, 4  ;;  %s4260_s24 = sshll.u32 %s7739_s6, 4  ;;  %s7766_s24 = int_to_ptr.vmem [resolvable:$true] %s4260_s24 }
 0x181   : > { %884 = vmatpush1.bf16.msra.mxu0 %v5671_v10  ;;  %s6025_s25 = scalar_lea.vmem %s7766_s24, 1024 }
 0x182   : > { %885 = vmatprep.subr.bf16.mxu0 %v5672_v11  ;;  %p6026_p7 = scmp.ne.s32.totalorder %s7766_s24, %s6025_s25 }
 0x183   : > { %5209 = vmatpush3.bf16.msra.mxu1 %v5694_v30  ;;  %v5701_v30 = vld [vmem:[#allocation11 + $0xc0] sm:$0xff]   ;;  %s4791_s14 = sshll.u32 %s8103_s5, 5 }
 0x184   : > { %5210 = vmatprep.subr.bf16.mxu1 %v5695_v31  ;;  %s4257_s22 = sadd.s32 %s4791_s14, %s4790_s9  ;;  %p6027_p9 = pnand %p6026_p7, %p8105_p1 }
 0x185   : > { %886 = vmatpush1.bf16.msra.mxu0 %v5674_v12  ;;  %s4792_s29 = sshll.u32 %s4257_s22, 6 }
 0x186   : > { %887 = vmatprep.subr.bf16.mxu0 %v5675_v13  ;;  %p6028_p8 = pneg %p6027_p9 }
 0x187   : > { %5211 = vmatpush3.bf16.msra.mxu1 %v5695_v31 }
 0x188   : > { %5212 = vmatprep.subr.bf16.mxu1 %v5696_v32 }
 0x189   : > { %888 = vmatpush1.bf16.msra.mxu0 %v5677_v14 }
 0x18a   : > { %889 = vmatprep.subr.bf16.mxu0 %v5678_v16  ;;  %v5728_v16 = vld [vmem:[#allocation11 + $0x8] sm:$0xff]  }
 0x18b   : > { %5213 = vmatpush3.bf16.msra.mxu1 %v5696_v32 }
 0x18c   : > { %5214 = vmatprep.subr.bf16.mxu1 %v5697_v33 }
 0x18d   : > { %890 = vmatpush1.bf16.msra.mxu0 %v5680_v18 }
 0x18e   : > { %5238 = vmatprep.subr.bf16.mxu0 %v5699_v35 }
 0x18f   : > { %5215 = vmatpush3.bf16.msra.mxu1 %v5697_v33 }
 0x190   : > { %908 = vmatmul.mubr.bf16.vlgmr.msra.gmra.mrb[0].mxu0 %v5681_v19  ;;  %5216 = vmatprep.subr.bf16.mxu1 %v5698_v34 }
 0x191   : > { %915 = vmatprep.mubr.bf16.mxu0 %v6205_v0  ;;  %5239 = vmatpush3.bf16.msra.mxu0 %v5699_v35 }
 0x192   : > { %5240 = vmatprep.subr.bf16.mxu0 %v5702_v37 }
 0x193   : > { %5217 = vmatpush3.bf16.msra.mxu1 %v5698_v34  ;;  %v5703_v34 = vld [vmem:[#allocation11 + $0x108] sm:$0xff]  }
 0x194   : > { %4882 = vmatprep.subr.bf16.mxu1 %v5700_v36 }
 0x195   : > { %5241 = vmatpush3.bf16.msra.mxu0 %v5702_v37 }
 0x196   : > { %5242 = vmatprep.subr.bf16.mxu0 %v5708_v38 }
 0x198   : > { %916 = vmatmul.mubr.bf16.gmra.mrb[4].mxu0 %v5682_v20 }
 0x199   : > { %925 = vmatprep.mubr.bf16.mxu0 %v6205_v0  ;;  %5243 = vmatpush3.bf16.msra.mxu0 %v5708_v38 }
 0x1a0   : > { %926 = vmatmul.mubr.bf16.gmra.mrb[8].mxu0 %v5683_v21 }
 0x1a1   : > { %935 = vmatprep.mubr.bf16.mxu0 %v6205_v0 }
 0x1a8   : > { %936 = vmatmul.mubr.bf16.gmra.mrb[12].mxu0 %v5684_v22 }
 0x1a9   : > { %945 = vmatprep.mubr.bf16.mxu0 %v6205_v0 }
 0x1b0   : > { %946 = vmatmul.mubr.bf16.gmra.mrb[16].mxu0 %v5685_v23 }
 0x1b1   : > { %955 = vmatprep.mubr.bf16.mxu0 %v6205_v0 }
 0x1b8   : > { %956 = vmatmul.mubr.bf16.gmra.mrb[20].mxu0 %v5686_v24 }
 0x1b9   : > { %965 = vmatprep.mubr.bf16.mxu0 %v6205_v0 }
 0x1c0   : > { %966 = vmatmul.mubr.bf16.gmra.mrb[24].mxu0 %v5687_v25 }
 0x1c1   : > { %975 = vmatprep.mubr.bf16.mxu0 %v6205_v0 }
 0x1c8   : > { %976 = vmatmul.mubr.bf16.gmra.mrb[28].mxu0 %v5688_v26 }
 0x1c9   : > { %985 = vmatprep.mubr.bf16.mxu0 %v6205_v0 }
 0x1d0   : > { %986 = vmatmul.mubr.bf16.gmra.mrb[32].mxu0 %v5689_v27 }
 0x1d1   : > { %995 = vmatprep.mubr.bf16.mxu0 %v6205_v0 }
 0x1d8   : > { %996 = vmatmul.mubr.bf16.gmra.mrb[36].mxu0 %v5690_v28 }
 0x263   : > { %v909_v40 = vpop.f32.mrb[0].mxu0 }
 0x264   : > { %v1011_v41 = vadd.f32 %v6805_v39, %v909_v40  ;;  %v911_v42 = vpop.f32.mrb[1].mxu0 }
 0x265   : > { %v912_v43 = vpop.f32.mrb[2].mxu0 }
 0x266   : > { %v1031_v44 = vadd.f32 3.0, %v1011_v41  ;;  %v1012_v45 = vadd.f32 %v6805_v39, %v912_v43  ;;  %v914_v46 = vpop.f32.mrb[3].mxu0 }
 0x267   : > { %v5704_v46 = vld [vmem:[#allocation11 + $0xc8] sm:$0xff]  }
 0x268   : > { %v1051_v47 = vmax.f32 %v1031_v44, 0.0  ;;  %v1032_v48 = vadd.f32 3.0, %v1012_v45 }
 0x26a   : > { %v1071_v49 = vmin.f32 %v1051_v47, 6.0  ;;  %v1052_v50 = vmax.f32 %v1032_v48, 0.0 }
 0x26b   : > { %v917_v52 = vpop.f32.mrb[4].mxu0 }
 0x26c   : > { %v1072_v53 = vmin.f32 %v1052_v50, 6.0  ;;  %v1013_v54 = vadd.f32 %v6805_v39, %v917_v52  ;;  %v919_v55 = vpop.f32.mrb[5].mxu0  ;;  %v1091_v56 = vmul.f32 %v1071_v49, %v1011_v41  ;;  %v5705_v52 = vld [vmem:[#allocation11 + $0x110] sm:$0xff]  }
 0x26d   : > { %v1138_v57 = vadd.f32 %v6812_v51, %v919_v55  ;;  %v921_v58 = vpop.f32.mrb[6].mxu0 }
 0x26e   : > { %v1033_v59 = vadd.f32 3.0, %v1013_v54  ;;  %v1014_v60 = vadd.f32 %v6805_v39, %v921_v58  ;;  %v923_v61 = vpop.f32.mrb[7].mxu0  ;;  %v1092_v62 = vmul.f32 %v1072_v53, %v1012_v45  ;;  %v1111_v1 = vmul.f32 0.16666667, %v1091_v56 }
 0x26f   : > { %v3804_v63 = vmul.f32 0.1, %v1138_v57  ;;  %v1139_v0 = vadd.f32 %v6812_v51, %v923_v61  ;;  %vm3788_vm0 = vcmp.ge.f32.partialorder %v1138_v57, 0.0 }
 0x270   : > { %v1053_v2 = vmax.f32 %v1033_v59, 0.0  ;;  %v1034_v3 = vadd.f32 3.0, %v1014_v60  ;;  %v1112_v4 = vmul.f32 0.16666667, %v1092_v62 }
 0x271   : > { %vm3789_vm1 = vcmp.ge.f32.partialorder %v1139_v0, 0.0  ;;  %v3805_v5 = vmul.f32 0.1, %v1139_v0  ;;  %v6818_v10 = vsel %vm3788_vm0, %v1138_v57, %v3804_v63 }
 0x272   : > { %v1073_v6 = vmin.f32 %v1053_v2, 6.0  ;;  %v1054_v7 = vmax.f32 %v1034_v3, 0.0  ;;  %v1154_v8 = vpack.c.bf16 %v1112_v4, %v1111_v1 }
 0x273   : > { %v927_v9 = vpop.f32.mrb[8].mxu0  ;;  %v6820_v11 = vsel %vm3789_vm1, %v1139_v0, %v3805_v5  ;;  %v5707_v0 = vld [vmem:[#allocation11 + $0x118] sm:$0xff]  }
 0x274   : > { %v1093_v12 = vmul.f32 %v1073_v6, %v1013_v54  ;;  %v1074_v13 = vmin.f32 %v1054_v7, 6.0  ;;  %v1015_v14 = vadd.f32 %v6805_v39, %v927_v9  ;;  %v929_v15 = vpop.f32.mrb[9].mxu0  ;;  %5218 = vmatprep.mubr.bf16.mxu1 %v1154_v8 }
 0x275   : > { %v1140_v17 = vadd.f32 %v6812_v51, %v929_v15  ;;  %v931_v18 = vpop.f32.mrb[10].mxu0 }
 0x276   : > { %v1094_v19 = vmul.f32 %v1074_v13, %v1014_v60  ;;  %v1035_v20 = vadd.f32 3.0, %v1015_v14  ;;  %v1016_v21 = vadd.f32 %v6805_v39, %v931_v18  ;;  %v933_v22 = vpop.f32.mrb[11].mxu0  ;;  %v6827_v23 = vmul.f32 0.16666667, %v1093_v12  ;;  %v5706_v60 = vld [vmem:[#allocation11 + $0xd0] sm:$0xff]   ;;  %v5709_v13 = vld [vmem:[#allocation11 + $0xd8] sm:$0xff]  }
 0x277   : > { %v3806_v24 = vmul.f32 0.1, %v1140_v17  ;;  %v1141_v25 = vadd.f32 %v6812_v51, %v933_v22  ;;  %vm3790_vm2 = vcmp.ge.f32.partialorder %v1140_v17, 0.0 }
 0x278   : > { %v6830_v26 = vmul.f32 0.16666667, %v1094_v19  ;;  %v1055_v27 = vmax.f32 %v1035_v20, 0.0  ;;  %v1036_v28 = vadd.f32 3.0, %v1016_v21 }
 0x279   : > { %vm3791_vm3 = vcmp.ge.f32.partialorder %v1141_v25, 0.0  ;;  %v3807_v29 = vmul.f32 0.1, %v1141_v25  ;;  %v6834_v36 = vsel %vm3790_vm2, %v1140_v17, %v3806_v24 }
 0x27a   : > { %v1075_v31 = vmin.f32 %v1055_v27, 6.0  ;;  %v1056_v32 = vmax.f32 %v1036_v28, 0.0  ;;  %v1155_v33 = vpack.c.bf16 %v6830_v26, %v6827_v23  ;;  %8009 = vst [vmem:[#allocation40_spill] sm:$0xff] %v6834_v36 }
 0x27b   : > { %v937_v35 = vpop.f32.mrb[12].mxu0  ;;  %v6836_v37 = vsel %vm3791_vm3, %v1141_v25, %v3807_v29 }
 0x27c   : > { %8010 = vst [vmem:[#allocation41_spill] sm:$0xff] %v6836_v37  ;;  %v1095_v38 = vmul.f32 %v1075_v31, %v1015_v14  ;;  %v1076_v40 = vmin.f32 %v1056_v32, 6.0  ;;  %v1017_v41 = vadd.f32 %v6805_v39, %v937_v35  ;;  %v939_v42 = vpop.f32.mrb[13].mxu0  ;;  %5219 = vmatmul.mubr.bf16.vlgmr.msra.gmra.mrb[0].mxu1 %v1155_v33 }
 0x27d   : > { %v1142_v44 = vadd.f32 %v6812_v51, %v939_v42  ;;  %v941_v45 = vpop.f32.mrb[14].mxu0  ;;  %4883 = vmatpush3.bf16.msra.mxu1 %v5701_v30 }
 0x27e   : > { %v1096_v47 = vmul.f32 %v1076_v40, %v1016_v21  ;;  %v1037_v48 = vadd.f32 3.0, %v1017_v41  ;;  %v1018_v49 = vadd.f32 %v6805_v39, %v941_v45  ;;  %v943_v50 = vpop.f32.mrb[15].mxu0  ;;  %4884 = vmatprep.subr.bf16.mxu1 %v5703_v34  ;;  %v6843_v53 = vmul.f32 0.16666667, %v1095_v38 }
 0x27f   : > { %v3808_v54 = vmul.f32 0.1, %v1142_v44  ;;  %v1143_v55 = vadd.f32 %v6812_v51, %v943_v50  ;;  %vm3792_vm4 = vcmp.ge.f32.partialorder %v1142_v44, 0.0 }
 0x280   : > { %v6846_v56 = vmul.f32 0.16666667, %v1096_v47  ;;  %v1057_v57 = vmax.f32 %v1037_v48, 0.0  ;;  %v1038_v58 = vadd.f32 3.0, %v1018_v49 }
 0x281   : > { %vm3793_vm5 = vcmp.ge.f32.partialorder %v1143_v55, 0.0  ;;  %v3809_v59 = vmul.f32 0.1, %v1143_v55  ;;  %4885 = vmatpush3.bf16.msra.mxu1 %v5704_v46  ;;  %v6850_v2 = vsel %vm3792_vm4, %v1142_v44, %v3808_v54 }
 0x282   : > { %v1077_v61 = vmin.f32 %v1057_v57, 6.0  ;;  %v1058_v62 = vmax.f32 %v1038_v58, 0.0  ;;  %v1156_v63 = vpack.c.bf16 %v6846_v56, %v6843_v53  ;;  %4886 = vmatprep.subr.bf16.mxu1 %v5705_v52  ;;  %8011 = vst [vmem:[#allocation42_spill] sm:$0xff] %v6850_v2 }
 0x283   : > { %v947_v1 = vpop.f32.mrb[16].mxu0  ;;  %v6852_v3 = vsel %vm3793_vm5, %v1143_v55, %v3809_v59 }
 0x284   : > { %8012 = vst [vmem:[#allocation43_spill] sm:$0xff] %v6852_v3  ;;  %v1097_v4 = vmul.f32 %v1077_v61, %v1017_v41  ;;  %v1078_v5 = vmin.f32 %v1058_v62, 6.0  ;;  %v1019_v6 = vadd.f32 %v6805_v39, %v947_v1  ;;  %v949_v7 = vpop.f32.mrb[17].mxu0  ;;  %5222 = vmatprep.mubr.bf16.mxu1 %v1156_v63 }
 0x285   : > { %v1144_v9 = vadd.f32 %v6812_v51, %v949_v7  ;;  %v951_v12 = vpop.f32.mrb[18].mxu0  ;;  %4887 = vmatpush3.bf16.msra.mxu1 %v5706_v60 }
 0x286   : > { %v1098_v14 = vmul.f32 %v1078_v5, %v1018_v49  ;;  %v1039_v15 = vadd.f32 3.0, %v1019_v6  ;;  %v1020_v17 = vadd.f32 %v6805_v39, %v951_v12  ;;  %v953_v18 = vpop.f32.mrb[19].mxu0  ;;  %4888 = vmatprep.subr.bf16.mxu1 %v5707_v0  ;;  %v6859_v19 = vmul.f32 0.16666667, %v1097_v4 }
 0x287   : > { %v3810_v20 = vmul.f32 0.1, %v1144_v9  ;;  %v1145_v21 = vadd.f32 %v6812_v51, %v953_v18  ;;  %vm3794_vm6 = vcmp.ge.f32.partialorder %v1144_v9, 0.0 }
 0x288   : > { %v6862_v22 = vmul.f32 0.16666667, %v1098_v14  ;;  %v1059_v24 = vmax.f32 %v1039_v15, 0.0  ;;  %v1040_v25 = vadd.f32 3.0, %v1020_v17 }
 0x289   : > { %vm3795_vm7 = vcmp.ge.f32.partialorder %v1145_v21, 0.0  ;;  %v3811_v27 = vmul.f32 0.1, %v1145_v21  ;;  %4889 = vmatpush3.bf16.msra.mxu1 %v5709_v13  ;;  %v6866_v32 = vsel %vm3794_vm6, %v1144_v9, %v3810_v20 }
 0x28a   : > { %v1079_v28 = vmin.f32 %v1059_v24, 6.0  ;;  %v1060_v29 = vmax.f32 %v1040_v25, 0.0  ;;  %v1157_v30 = vpack.c.bf16 %v6862_v22, %v6859_v19  ;;  %8013 = vst [vmem:[#allocation44_spill] sm:$0xff] %v6866_v32 }
 0x28b   : > { %v957_v31 = vpop.f32.mrb[20].mxu0  ;;  %v6868_v33 = vsel %vm3795_vm7, %v1145_v21, %v3811_v27 }
 0x28c   : > { %8014 = vst [vmem:[#allocation45_spill] sm:$0xff] %v6868_v33  ;;  %v1099_v34 = vmul.f32 %v1079_v28, %v1019_v6  ;;  %v1080_v35 = vmin.f32 %v1060_v29, 6.0  ;;  %v1021_v38 = vadd.f32 %v6805_v39, %v957_v31  ;;  %v959_v40 = vpop.f32.mrb[21].mxu0  ;;  %5223 = vmatmul.mubr.bf16.gmra.mrb[4].mxu1 %v1157_v30 }
 0x28d   : > { %v1146_v42 = vadd.f32 %v6812_v51, %v959_v40  ;;  %v961_v44 = vpop.f32.mrb[22].mxu0 }
 0x28e   : > { %v1100_v45 = vmul.f32 %v1080_v35, %v1020_v17  ;;  %v1041_v46 = vadd.f32 3.0, %v1021_v38  ;;  %v1022_v47 = vadd.f32 %v6805_v39, %v961_v44  ;;  %v963_v48 = vpop.f32.mrb[23].mxu0  ;;  %v6875_v49 = vmul.f32 0.16666667, %v1099_v34 }
 0x28f   : > { %v3812_v50 = vmul.f32 0.1, %v1146_v42  ;;  %v1147_v52 = vadd.f32 %v6812_v51, %v963_v48  ;;  %vm3796_vm8 = vcmp.ge.f32.partialorder %v1146_v42, 0.0 }
 0x290   : > { %v6878_v54 = vmul.f32 0.16666667, %v1100_v45  ;;  %v1061_v55 = vmax.f32 %v1041_v46, 0.0  ;;  %v1042_v57 = vadd.f32 3.0, %v1022_v47 }
 0x291   : > { %vm3797_vm9 = vcmp.ge.f32.partialorder %v1147_v52, 0.0  ;;  %v3813_v58 = vmul.f32 0.1, %v1147_v52  ;;  %v6882_v63 = vsel %vm3796_vm8, %v1146_v42, %v3812_v50  ;;  %vm6206_vm8 = vmmov 1  }
 0x292   : > { %v1081_v59 = vmin.f32 %v1061_v55, 6.0  ;;  %v1062_v60 = vmax.f32 %v1042_v57, 0.0  ;;  %v1158_v61 = vpack.c.bf16 %v6878_v54, %v6875_v49  ;;  %8015 = vst [vmem:[#allocation46_spill] sm:$0xff] %v6882_v63 }
 0x293   : > { %v967_v62 = vpop.f32.mrb[24].mxu0  ;;  %v6884_v0 = vsel %vm3797_vm9, %v1147_v52, %v3813_v58 }
 0x294   : > { %8016 = vst [vmem:[#allocation47_spill] sm:$0xff] %v6884_v0  ;;  %v1101_v1 = vmul.f32 %v1081_v59, %v1021_v38  ;;  %v1082_v4 = vmin.f32 %v1062_v60, 6.0  ;;  %v1023_v5 = vadd.f32 %v6805_v39, %v967_v62  ;;  %v969_v6 = vpop.f32.mrb[25].mxu0  ;;  %5226 = vmatprep.mubr.bf16.mxu1 %v1158_v61 }
 0x295   : > { %v1148_v9 = vadd.f32 %v6812_v51, %v969_v6  ;;  %v971_v12 = vpop.f32.mrb[26].mxu0 }
 0x296   : > { %v1102_v13 = vmul.f32 %v1082_v4, %v1022_v47  ;;  %v1043_v14 = vadd.f32 3.0, %v1023_v5  ;;  %v1024_v15 = vadd.f32 %v6805_v39, %v971_v12  ;;  %v973_v17 = vpop.f32.mrb[27].mxu0  ;;  %v6891_v18 = vmul.f32 0.16666667, %v1101_v1 }
 0x297   : > { %v3814_v20 = vmul.f32 0.1, %v1148_v9  ;;  %v1149_v21 = vadd.f32 %v6812_v51, %v973_v17  ;;  %vm3798_vm10 = vcmp.ge.f32.partialorder %v1148_v9, 0.0 }
 0x298   : > { %v6894_v24 = vmul.f32 0.16666667, %v1102_v13  ;;  %v1063_v25 = vmax.f32 %v1043_v14, 0.0  ;;  %v1044_v27 = vadd.f32 3.0, %v1024_v15 }
 0x299   : > { %vm3799_vm11 = vcmp.ge.f32.partialorder %v1149_v21, 0.0  ;;  %v3815_v28 = vmul.f32 0.1, %v1149_v21  ;;  %v6898_v35 = vsel %vm3798_vm10, %v1148_v9, %v3814_v20 }
 0x29a   : > { %v1083_v29 = vmin.f32 %v1063_v25, 6.0  ;;  %v1064_v30 = vmax.f32 %v1044_v27, 0.0  ;;  %v1159_v31 = vpack.c.bf16 %v6894_v24, %v6891_v18  ;;  %8017 = vst [vmem:[#allocation48_spill] sm:$0xff] %v6898_v35 }
 0x29b   : > { %v977_v34 = vpop.f32.mrb[28].mxu0  ;;  %v6900_v38 = vsel %vm3799_vm11, %v1149_v21, %v3815_v28 }
 0x29c   : > { %8018 = vst [vmem:[#allocation49_spill] sm:$0xff] %v6900_v38  ;;  %v1103_v40 = vmul.f32 %v1083_v29, %v1023_v5  ;;  %v1084_v42 = vmin.f32 %v1064_v30, 6.0  ;;  %v1025_v44 = vadd.f32 %v6805_v39, %v977_v34  ;;  %v979_v45 = vpop.f32.mrb[29].mxu0  ;;  %5227 = vmatmul.mubr.bf16.gmra.mrb[8].mxu1 %v1159_v31 }
 0x29d   : > { %v1150_v47 = vadd.f32 %v6812_v51, %v979_v45  ;;  %v981_v48 = vpop.f32.mrb[30].mxu0 }
 0x29e   : > { %v1104_v50 = vmul.f32 %v1084_v42, %v1024_v15  ;;  %v1045_v52 = vadd.f32 3.0, %v1025_v44  ;;  %v1026_v55 = vadd.f32 %v6805_v39, %v981_v48  ;;  %v983_v57 = vpop.f32.mrb[31].mxu0  ;;  %v6907_v58 = vmul.f32 0.16666667, %v1103_v40 }
 0x29f   : > { %v3816_v59 = vmul.f32 0.1, %v1150_v47  ;;  %v1151_v60 = vadd.f32 %v6812_v51, %v983_v57  ;;  %vm3800_vm12 = vcmp.ge.f32.partialorder %v1150_v47, 0.0 }
 0x2a0   : > { %v6910_v61 = vmul.f32 0.16666667, %v1104_v50  ;;  %v1065_v62 = vmax.f32 %v1045_v52, 0.0  ;;  %v1046_v1 = vadd.f32 3.0, %v1026_v55 }
 0x2a1   : > { %vm3801_vm13 = vcmp.ge.f32.partialorder %v1151_v60, 0.0  ;;  %v3817_v4 = vmul.f32 0.1, %v1151_v60  ;;  %v6914_v13 = vsel %vm3800_vm12, %v1150_v47, %v3816_v59 }
 0x2a2   : > { %v1085_v5 = vmin.f32 %v1065_v62, 6.0  ;;  %v1066_v6 = vmax.f32 %v1046_v1, 0.0  ;;  %v1160_v9 = vpack.c.bf16 %v6910_v61, %v6907_v58  ;;  %8019 = vst [vmem:[#allocation50_spill] sm:$0xff] %v6914_v13 }
 0x2a3   : > { %v987_v12 = vpop.f32.mrb[32].mxu0  ;;  %v6916_v14 = vsel %vm3801_vm13, %v1151_v60, %v3817_v4 }
 0x2a4   : > { %8020 = vst [vmem:[#allocation51_spill] sm:$0xff] %v6916_v14  ;;  %v1105_v15 = vmul.f32 %v1085_v5, %v1025_v44  ;;  %v1086_v17 = vmin.f32 %v1066_v6, 6.0  ;;  %v1027_v20 = vadd.f32 %v6805_v39, %v987_v12  ;;  %v989_v21 = vpop.f32.mrb[33].mxu0  ;;  %5230 = vmatprep.mubr.bf16.mxu1 %v1160_v9 }
 0x2a5   : > { %v1152_v27 = vadd.f32 %v6812_v51, %v989_v21  ;;  %v991_v28 = vpop.f32.mrb[34].mxu0 }
 0x2a6   : > { %v1106_v29 = vmul.f32 %v1086_v17, %v1026_v55  ;;  %v1047_v30 = vadd.f32 3.0, %v1027_v20  ;;  %v1028_v31 = vadd.f32 %v6805_v39, %v991_v28  ;;  %v993_v34 = vpop.f32.mrb[35].mxu0  ;;  %v6923_v40 = vmul.f32 0.16666667, %v1105_v15 }
 0x2a7   : > { %v3818_v42 = vmul.f32 0.1, %v1152_v27  ;;  %v1153_v44 = vadd.f32 %v6812_v51, %v993_v34  ;;  %vm3802_vm14 = vcmp.ge.f32.partialorder %v1152_v27, 0.0 }
 0x2a8   : > { %8021 = vst [vmem:[#allocation52_spill] sm:$0xff] %v6923_v40  ;;  %v6926_v45 = vmul.f32 0.16666667, %v1106_v29  ;;  %v1067_v47 = vmax.f32 %v1047_v30, 0.0  ;;  %v1048_v48 = vadd.f32 3.0, %v1028_v31 }
 0x2a9   : > { %vm3803_vm15 = vcmp.ge.f32.partialorder %v1153_v44, 0.0  ;;  %v3819_v50 = vmul.f32 0.1, %v1153_v44  ;;  %v6930_v60 = vsel %vm3802_vm14, %v1152_v27, %v3818_v42 }
 0x2aa   : > { %8022 = vst [vmem:[#allocation53_spill] sm:$0xff] %v6926_v45  ;;  %v1087_v52 = vmin.f32 %v1067_v47, 6.0  ;;  %v1068_v57 = vmax.f32 %v1048_v48, 0.0  ;;  %v1161_v55 = vpack.c.bf16 %v6926_v45, %v6923_v40  ;;  %8023 = vst [vmem:[#allocation54_spill] sm:$0xff] %v6930_v60 }
 0x2ab   : > { %v997_v59 = vpop.f32.mrb[36].mxu0  ;;  %v6932_v62 = vsel %vm3803_vm15, %v1153_v44, %v3819_v50 }
 0x2ac   : > { %8024 = vst [vmem:[#allocation55_spill] sm:$0xff] %v6932_v62  ;;  %v1107_v1 = vmul.f32 %v1087_v52, %v1027_v20  ;;  %v1088_v4 = vmin.f32 %v1068_v57, 6.0  ;;  %v1029_v51 = vadd.f32 %v6805_v39, %v997_v59  ;;  %v999_v5 = vpop.f32.mrb[37].mxu0  ;;  %5231 = vmatmul.mubr.bf16.gmra.mrb[12].mxu1 %v1161_v55  ;;  %v5711_v57 = vld [vmem:[#allocation11 + $0xe0] sm:$0xff]   ;;  %v5712_v55 = vld [vmem:[#allocation11 + $0x128] sm:$0xff]  }
 0x2ad   : > { %v1000_v9 = vpop.f32.mrb[38].mxu0  ;;  %v5713_v59 = vld [vmem:[#allocation11 + $0xe8] sm:$0xff]   ;;  %v5714_v5 = vld [vmem:[#allocation11 + $0x158] sm:$0xff]  }
 0x2ae   : > { %v1108_v12 = vmul.f32 %v1088_v4, %v1028_v31  ;;  %v1049_v15 = vadd.f32 3.0, %v1029_v51  ;;  %v1030_v17 = vadd.f32 %v6805_v39, %v1000_v9  ;;  %v1002_v21 = vpop.f32.mrb[39].mxu0  ;;  %v6938_v28 = vmul.f32 0.16666667, %v1107_v1  ;;  %v5710_v39 = vld [vmem:[#allocation11 + $0x120] sm:$0xff]   ;;  %v5715_v1 = vld [vmem:[#allocation11 + $0x130] sm:$0xff]   ;;  %5244 = vmatprep.subr.bf16.mxu0 %v5714_v5 }
 0x2af   : > { %4890 = vmatprep.subr.bf16.mxu1 %v5710_v39  ;;  %v5716_v4 = vld [vmem:[#allocation11 + $0xf0] sm:$0xff]   ;;  %v5718_v9 = vld [vmem:[#allocation11 + $0xf8] sm:$0xff]   ;;  %5245 = vmatpush3.bf16.msra.mxu0 %v5714_v5 }
 0x2b0   : > { %8025 = vst [vmem:[#allocation56_spill] sm:$0xff] %v6938_v28  ;;  %v6940_v27 = vmul.f32 0.16666667, %v1108_v12  ;;  %v1069_v29 = vmax.f32 %v1049_v15, 0.0  ;;  %v1050_v20 = vadd.f32 3.0, %v1030_v17  ;;  %4891 = vmatpush3.bf16.msra.mxu1 %v5711_v57  ;;  %v5719_v12 = vld [vmem:[#allocation11 + $0x160] sm:$0xff]  }
 0x2b1   : > { %4892 = vmatprep.subr.bf16.mxu1 %v5712_v55  ;;  %5246 = vmatprep.subr.bf16.mxu0 %v5719_v12  ;;  %v5720_v15 = vld [vmem:[#allocation11 + $0x168] sm:$0xff]   ;;  %v5722_v21 = vld [vmem:[#allocation11 + $0x178] sm:$0xff]  }
 0x2b2   : > { %8026 = vst [vmem:[#allocation57_spill] sm:$0xff] %v6940_v27  ;;  %v1089_v30 = vmin.f32 %v1069_v29, 6.0  ;;  %v1070_v34 = vmax.f32 %v1050_v20, 0.0  ;;  %v1162_v42 = vpack.c.bf16 %v6940_v27, %v6938_v28  ;;  %v6944_v29 = vld [vmem:[#allocation11 + $0x80] sm:$0xff]  }
 0x2b3   : > { %5247 = vmatpush3.bf16.msra.mxu0 %v5719_v12  ;;  %v5724_v20 = vld [vmem:[#allocation11 + $0x40] sm:$0xff]  }
 0x2b4   : > { %v1109_v44 = vmul.f32 %v1089_v30, %v1029_v51  ;;  %v1090_v47 = vmin.f32 %v1070_v34, 6.0  ;;  %5234 = vmatprep.mubr.bf16.mxu1 %v1162_v42  ;;  %4893 = vmatpush3.bf16.msra.mxu1 %v5713_v59  ;;  %v5717_v51 = vld [vmem:[#allocation11 + $0x138] sm:$0xff]   ;;  %v6950_v30 = vld [vmem:[%s8028_s30] ss:$0 sm:$0xff] }
 0x2b5   : > { %4894 = vmatprep.subr.bf16.mxu1 %v5715_v1  ;;  %5248 = vmatprep.subr.bf16.mxu0 %v5720_v15  ;;  %v1448_v1 = vlaneseq }
 0x2b6   : > { %v1110_v48 = vmul.f32 %v1090_v47, %v1030_v17  ;;  %v1129_v31 = vmul.f32 0.16666667, %v1109_v44  ;;  %v5721_v17 = vld [vmem:[#allocation11 + $0x170] sm:$0xff]  }
 0x2b7   : > { %5249 = vmatpush3.bf16.msra.mxu0 %v5720_v15  ;;  %v1491_v15 = vstv %s1490_s4  ;;  %s8104_s4 = sld [smem:[#allocation72_spill]] }
 0x2b8   : > { %v1130_v50 = vmul.f32 0.16666667, %v1110_v48  ;;  %4895 = vmatpush3.bf16.msra.mxu1 %v5716_v4  ;;  %5250 = vmatprep.subr.bf16.mxu0 %v5721_v17  ;;  %vm6959_vm0 = vcmp.eq.s32.totalorder %v1491_v15, 1  ;;  %v5725_v15 = vld [vmem:[#allocation11] sm:$0xff]  }
 0x2b9   : > { %4896 = vmatprep.subr.bf16.mxu1 %v5717_v51  ;;  %vm4548_vm3 = vmpackc.low %vm6959_vm0, %vm6959_vm0 }
 0x2ba   : > { %v1163_v52 = vpack.c.bf16 %v1130_v50, %v1129_v31 }
 0x2bb   : > { %5251 = vmatpush3.bf16.msra.mxu0 %v5721_v17 }
 0x2bc   : > { %5235 = vmatmul.mubr.bf16.gmra.mrb[16].mxu1 %v1163_v52  ;;  %5252 = vmatprep.subr.bf16.mxu0 %v5722_v21 }
 0x2bd   : > { %4897 = vmatpush3.bf16.msra.mxu1 %v5718_v9 }
 0x2be   : > { %4962 = vmatprep.subr.bf16.mxu1 %v5724_v20 }
 0x2bf   : > { %5253 = vmatpush3.bf16.msra.mxu0 %v5722_v21 }
 0x2c0   : > { %5270 = vmatprep.subr.bf16.mxu0 %v6944_v29 }
 0x34f   : > { %v5220_v34 = vpop.f32.mrb[0].mxu1 }
 0x350   : > { %v1278_v42 = vadd.f32 %v5220_v34, %v6950_v30  ;;  %v1269_v44 = vpop.f32.mrb[1].mxu1  ;;  %v6957_v34 = vshrl.u32 %v1448_v1, 7 }
 0x351   : > { %v1270_v47 = vadd.f32 %v6950_v30, %v1269_v44  ;;  %v5221_v48 = vpop.f32.mrb[2].mxu1 }
 0x352   : > { %v1350_v31 = vadd.f32 3.0, %v1278_v42  ;;  %v1281_v50 = vadd.f32 %v5221_v48, %v6950_v30  ;;  %v1272_v52 = vpop.f32.mrb[3].mxu1  ;;  %vm1897_vm1 = vcmp.lt.s32.totalorder %v6957_v34, 1  ;;  %vm2871_vm2 = vcmp.lt.s32.totalorder %v6957_v34, 7 }
 0x353   : > { %v1348_v39 = vadd.f32 3.0, %v1270_v47  ;;  %v1273_v57 = vadd.f32 %v6950_v30, %v1272_v52  ;;  %v7125_v2 = vadd.s32 16, %v6957_v34  ;;  %v1457_v28 = vadd.s32 64, %v6957_v34 }
 0x354   : > { %v1370_v55 = vmax.f32 %v1350_v31, 0.0  ;;  %v1351_v59 = vadd.f32 3.0, %v1281_v50 }
 0x355   : > { %v1368_v4 = vmax.f32 %v1348_v39, 0.0  ;;  %v1349_v51 = vadd.f32 3.0, %v1273_v57 }
 0x356   : > { %v1390_v5 = vmin.f32 %v1370_v55, 6.0  ;;  %v1371_v9 = vmax.f32 %v1351_v59, 0.0 }
 0x357   : > { %v1388_v12 = vmin.f32 %v1368_v4, 6.0  ;;  %v1369_v17 = vmax.f32 %v1349_v51, 0.0 }
 0x358   : > { %v1410_v21 = vmul.f32 %v1390_v5, %v1278_v42  ;;  %v1391_v20 = vmin.f32 %v1371_v9, 6.0 }
 0x359   : > { %v1408_v44 = vmul.f32 %v1388_v12, %v1270_v47  ;;  %v1389_v48 = vmin.f32 %v1369_v17, 6.0 }
 0x35a   : > { %v1430_v6 = vmul.f32 0.16666667, %v1410_v21  ;;  %v1411_v31 = vmul.f32 %v1391_v20, %v1281_v50 }
 0x35b   : > { %v1428_v52 = vmul.f32 0.16666667, %v1408_v44  ;;  %v1409_v39 = vmul.f32 %v1389_v48, %v1273_v57  ;;  %v5727_v48 = vld [vmem:[#allocation11 + $0x48] sm:$0xff]  }
 0x35c   : > { %v6963_v46 = vmul.f32 0.16666667, %v1411_v31  ;;  %v1879_v55 = vrot.slane %v1430_v6, 7  ;;  %v2853_v47 = vrot.slane %v1430_v6, 1 }
 0x35d   : > { %v6968_v42 = vsel %vm6959_vm0, %v1428_v52, 0.0  ;;  %v1429_v59 = vmul.f32 0.16666667, %v1409_v39 }
 0x35e   : > { %v7894_v1 = vrot.slane %v6968_v42, 7  ;;  %v7896_v4 = vrot.slane %v6963_v46, 7  ;;  %v7895_v50 = vrot.slane %v6963_v46, 1  ;;  %v7893_v57 = vrot.slane %v6968_v42, 1 }
 0x35f   : > { %v1618_v51 = vsel %vm6959_vm0, %v1429_v59, 0.0  ;;  %v4549_v5 = vpack.c.bf16 %v1429_v59, %v1428_v52  ;;  %v5224_v9 = vpop.f32.mrb[4].mxu1  ;;  %v6978_v12 = vpack.c.bf16 %v6963_v46, %v1430_v6 }
 0x360   : > { %v1878_v17 = vrot.slane %v1618_v51, 7  ;;  %v2852_v21 = vrot.slane %v1618_v51, 1  ;;  %v1294_v20 = vadd.f32 %v5224_v9, %v6950_v30  ;;  %v1285_v44 = vpop.f32.mrb[5].mxu1  ;;  %v1914_v31 = vsel %vm1897_vm1, %v1879_v55, %v7896_v4 }
 0x361   : > { %v1286_v52 = vadd.f32 %v6950_v30, %v1285_v44  ;;  %2351 = vmatprep.mubr.bf16.mxu1 %v6978_v12  ;;  %v5225_v6 = vpop.f32.mrb[6].mxu1  ;;  %v6994_v39 = vsel %vm2871_vm2, %v2853_v47, %v7895_v50 }
 0x362   : > { %v7000_v59 = vsel %vm1897_vm1, %v7894_v1, %v1878_v17  ;;  %v7004_v51 = vsel %vm2871_vm2, %v2852_v21, %v2853_v47  ;;  %v7010_v9 = vsel %vm2871_vm2, %v7893_v57, %v2852_v21  ;;  %v1354_v44 = vadd.f32 3.0, %v1294_v20  ;;  %4550 = vmatmul.mubr.msk.bf16.vlgmr.msra.gmra.mrb[20].mxu1 %vm4548_vm3, %v4549_v5  ;;  %v1288_v7 = vpop.f32.mrb[7].mxu1  ;;  %v5730_v57 = vld [vmem:[#allocation11 + $0x50] sm:$0xff]  }
 0x363   : > { %v1352_v8 = vadd.f32 3.0, %v1286_v52  ;;  %v1297_v47 = vadd.f32 %v5225_v6, %v6950_v30  ;;  %v1289_v43 = vadd.f32 %v6950_v30, %v1288_v7  ;;  %4963 = vmatpush3.bf16.msra.mxu1 %v5725_v15  ;;  %v1915_v1 = vsel %vm1897_vm1, %v1878_v17, %v1879_v55  ;;  %v5731_v6 = vld [vmem:[#allocation11 + $0x10] sm:$0xff]   ;;  %v5733_v15 = vld [vmem:[#allocation11 + $0x58] sm:$0xff]  }
 0x364   : > { %v1374_v21 = vmax.f32 %v1354_v44, 0.0  ;;  %4964 = vmatprep.subr.bf16.mxu1 %v5727_v48  ;;  %v7023_v4 = vpack.c.bf16 %v1914_v31, %v1915_v1  ;;  %v5734_v17 = vld [vmem:[#allocation11 + $0x18] sm:$0xff]   ;;  %v5736_v1 = vld [vmem:[#allocation11 + $0x60] sm:$0xff]  }
 0x365   : > { %v1372_v25 = vmax.f32 %v1352_v8, 0.0  ;;  %v1355_v50 = vadd.f32 3.0, %v1297_v47  ;;  %v1353_v5 = vadd.f32 3.0, %v1289_v43 }
 0x366   : > { %v1394_v60 = vmin.f32 %v1374_v21, 6.0 }
 0x367   : > { %v1392_v41 = vmin.f32 %v1372_v25, 6.0  ;;  %v1375_v62 = vmax.f32 %v1355_v50, 0.0  ;;  %v1373_v13 = vmax.f32 %v1353_v5, 0.0  ;;  %4965 = vmatpush3.bf16.msra.mxu1 %v5728_v16  ;;  %v8031_v5 = vrot.slane %v6963_v46, 7 }
 0x368   : > { %v1414_v7 = vmul.f32 %v1394_v60, %v1294_v20  ;;  %4966 = vmatprep.subr.bf16.mxu1 %v5730_v57 }
 0x369   : > { %v1412_v44 = vmul.f32 %v1392_v41, %v1286_v52  ;;  %v1395_v48 = vmin.f32 %v1375_v62, 6.0  ;;  %v1393_v14 = vmin.f32 %v1373_v13, 6.0 }
 0x36a   : > { %v1434_v35 = vmul.f32 0.16666667, %v1414_v7 }
 0x36b   : > { %v1432_v38 = vmul.f32 0.16666667, %v1412_v44  ;;  %v1415_v55 = vmul.f32 %v1395_v48, %v1297_v47  ;;  %v1413_v8 = vmul.f32 %v1393_v14, %v1289_v43  ;;  %4967 = vmatpush3.bf16.msra.mxu1 %v5731_v6  ;;  %v5726_v48 = vld [vmem:[#allocation11 + $0x88] sm:$0xff]  }
 0x36c   : > { %4968 = vmatprep.subr.bf16.mxu1 %v5733_v15  ;;  %v1883_v16 = vrot.slane %v1434_v35, 7  ;;  %v2857_v25 = vrot.slane %v1434_v35, 1 }
 0x36d   : > { %v1881_v31 = vrot.slane %v1432_v38, 7  ;;  %v7025_v21 = vmul.f32 0.16666667, %v1415_v55  ;;  %v1433_v50 = vmul.f32 0.16666667, %v1413_v8  ;;  %v2855_v60 = vrot.slane %v1432_v38, 1 }
 0x36e   : > { %v5737_v55 = vld [vmem:[#allocation11 + $0x20] sm:$0xff]  }
 0x36f   : > { %v7903_v57 = vrot.slane %v7025_v21, 7  ;;  %v7029_v41 = vpack.c.bf16 %v7025_v21, %v1434_v35  ;;  %v7908_v13 = vrot.slane %v7025_v21, 1  ;;  %v1882_v62 = vrot.slane %v1433_v50, 7  ;;  %v5228_v43 = vpop.f32.mrb[8].mxu1  ;;  %4969 = vmatpush3.bf16.msra.mxu1 %v5734_v17 }
 0x370   : > { %v2856_v14 = vrot.slane %v1433_v50, 1  ;;  %v1310_v20 = vadd.f32 %v5228_v43, %v6950_v30  ;;  %v1301_v52 = vpop.f32.mrb[9].mxu1  ;;  %v2118_v47 = vpack.c.bf16 %v1433_v50, %v1432_v38  ;;  %4970 = vmatprep.subr.bf16.mxu1 %v5736_v1  ;;  %v1913_v6 = vsel %vm1897_vm1, %v8031_v5, %v1881_v31  ;;  %v5739_v43 = vld [vmem:[#allocation11 + $0x68] sm:$0xff]  }
 0x371   : > { %v1910_v35 = vsel %vm1897_vm1, %v1883_v16, %v7903_v57  ;;  %v1911_v7 = vsel %vm1897_vm1, %v1882_v62, %v1883_v16  ;;  %v1302_v15 = vadd.f32 %v6950_v30, %v1301_v52  ;;  %v5229_v44 = vpop.f32.mrb[10].mxu1  ;;  %v1912_v38 = vsel %vm1897_vm1, %v1881_v31, %v1882_v62 }
 0x372   : > { %v7046_v8 = vpack.c.bf16 %v1910_v35, %v1911_v7  ;;  %v1358_v17 = vadd.f32 3.0, %v1310_v20  ;;  %v1313_v1 = vadd.f32 %v5229_v44, %v6950_v30  ;;  %2359 = vmatprep.mubr.bf16.mxu1 %v2118_v47  ;;  %5254 = vmatprep.mubr.bf16.mxu0 %v2118_v47  ;;  %v1304_v50 = vpop.f32.mrb[11].mxu1  ;;  %v7049_v5 = vpack.c.bf16 %v1912_v38, %v1913_v6 }
 0x373   : > { %v1356_v16 = vadd.f32 3.0, %v1302_v15  ;;  %v1305_v52 = vadd.f32 %v6950_v30, %v1304_v50  ;;  %2360 = vmatmul.mubr.bf16.gmra.mrb[24].mxu1 %v6978_v12  ;;  %5255 = vmatmul.mubr.bf16.vlgmr.msra.gmra.mrb[40].mxu0 %v7029_v41  ;;  %v8032_v31 = vrot.slane %v6963_v46, 1  ;;  %v2885_v35 = vsel %vm2871_vm2, %v2856_v14, %v2857_v25  ;;  %v5729_v50 = vld [vmem:[#allocation11 + $0x90] sm:$0xff]  }
 0x374   : > { %v1378_v7 = vmax.f32 %v1358_v17, 0.0  ;;  %v1359_v44 = vadd.f32 3.0, %v1313_v1  ;;  %2367 = vmatprep.mubr.bf16.mxu1 %v7029_v41  ;;  %5271 = vmatpush3.bf16.msra.mxu0 %v6944_v29  ;;  %v2886_v12 = vsel %vm2871_vm2, %v2855_v60, %v2856_v14  ;;  %v7073_v17 = vsel %vm2871_vm2, %v2857_v25, %v7908_v13  ;;  %v5745_v25 = vld [vmem:[#allocation11 + $0x78] sm:$0xff]  }
 0x375   : > { %v2887_v62 = vsel %vm2871_vm2, %v8032_v31, %v2855_v60  ;;  %v1376_v38 = vmax.f32 %v1356_v16, 0.0  ;;  %v1357_v46 = vadd.f32 3.0, %v1305_v52  ;;  %5272 = vmatprep.subr.bf16.mxu0 %v5726_v48  ;;  %4971 = vmatpush3.bf16.msra.mxu1 %v5737_v55  ;;  %v5740_v31 = vld [vmem:[#allocation11 + $0x28] sm:$0xff]   ;;  %v7067_v57 = vpack.c.bf16 %v2885_v35, %v2886_v12  ;;  %v5732_v35 = vld [vmem:[#allocation11 + $0x98] sm:$0xff]   ;;  %v5743_v12 = vld [vmem:[#allocation11 + $0x30] sm:$0xff]  }
 0x376   : > { %v7063_v6 = vpack.c.bf16 %v2887_v62, %v6994_v39  ;;  %v1398_v29 = vmin.f32 %v1378_v7, 6.0  ;;  %v1379_v39 = vmax.f32 %v1359_v44, 0.0  ;;  %4972 = vmatprep.subr.bf16.mxu1 %v5739_v43  ;;  %v5742_v62 = vld [vmem:[#allocation11 + $0x70] sm:$0xff]  }
 0x377   : > { %v1396_v63 = vmin.f32 %v1376_v38, 6.0  ;;  %v1377_v60 = vmax.f32 %v1357_v46, 0.0 }
 0x378   : > { %v1418_v14 = vmul.f32 %v1398_v29, %v1310_v20  ;;  %v1399_v16 = vmin.f32 %v1379_v39, 6.0  ;;  %5273 = vmatpush3.bf16.msra.mxu0 %v5726_v48 }
 0x379   : > { %v1416_v0 = vmul.f32 %v1396_v63, %v1302_v15  ;;  %v1397_v55 = vmin.f32 %v1377_v60, 6.0  ;;  %5274 = vmatprep.subr.bf16.mxu0 %v5729_v50  ;;  %4973 = vmatpush3.bf16.msra.mxu1 %v5740_v31  ;;  %v8033_v31 = vrot.slane %v7025_v21, 7  ;;  %v8034_v60 = vrot.slane %v7025_v21, 1 }
 0x37a   : > { %v1438_v32 = vmul.f32 0.16666667, %v1418_v14  ;;  %v1419_v33 = vmul.f32 %v1399_v16, %v1313_v1  ;;  %4974 = vmatprep.subr.bf16.mxu1 %v5742_v62 }
 0x37b   : > { %v1436_v13 = vmul.f32 0.16666667, %v1416_v0  ;;  %v1417_v7 = vmul.f32 %v1397_v55, %v1305_v52  ;;  %2368 = vmatmul.mubr.bf16.gmra.mrb[28].mxu1 %v2118_v47  ;;  %v5735_v0 = vld [vmem:[#allocation11 + $0xa0] sm:$0xff]  }
 0x37c   : > { %v7075_v43 = vmul.f32 0.16666667, %v1419_v33  ;;  %5275 = vmatpush3.bf16.msra.mxu0 %v5729_v50  ;;  %v1887_v44 = vrot.slane %v1438_v32, 7  ;;  %v2861_v63 = vrot.slane %v1438_v32, 1 }
 0x37d   : > { %v1885_v20 = vrot.slane %v1436_v13, 7  ;;  %v2859_v38 = vrot.slane %v1436_v13, 1  ;;  %v1437_v48 = vmul.f32 0.16666667, %v1417_v7  ;;  %5276 = vmatprep.subr.bf16.mxu0 %v5732_v35  ;;  %4975 = vmatpush3.bf16.msra.mxu1 %v5743_v12  ;;  %v5746_v12 = vld [vmem:[#allocation11 + $0x38] sm:$0xff]  }
 0x37e   : > { %v7910_v15 = vrot.slane %v7075_v43, 7  ;;  %v7909_v46 = vrot.slane %v7075_v43, 1  ;;  %v7080_v1 = vpack.c.bf16 %v7075_v43, %v1438_v32  ;;  %4976 = vmatprep.subr.bf16.mxu1 %v5745_v25 }
 0x37f   : > { %v1886_v47 = vrot.slane %v1437_v48, 7  ;;  %v2860_v33 = vrot.slane %v1437_v48, 1  ;;  %v5232_v52 = vpop.f32.mrb[12].mxu1  ;;  %v2120_v50 = vpack.c.bf16 %v1437_v48, %v1436_v13  ;;  %v1909_v29 = vsel %vm1897_vm1, %v8033_v31, %v1885_v20 }
 0x380   : > { %v1326_v39 = vadd.f32 %v5232_v52, %v6950_v30  ;;  %v1317_v62 = vpop.f32.mrb[13].mxu1  ;;  %5277 = vmatpush3.bf16.msra.mxu0 %v5732_v35  ;;  %v1906_v32 = vsel %vm1897_vm1, %v1887_v44, %v7910_v15  ;;  %v2883_v14 = vsel %vm2871_vm2, %v8034_v60, %v2859_v38  ;;  %v7099_v13 = vsel %vm2871_vm2, %v2861_v63, %v7909_v46  ;;  %v5738_v35 = vld [vmem:[#allocation11 + $0xa8] sm:$0xff]  }
 0x381   : > { %v1318_v16 = vadd.f32 %v6950_v30, %v1317_v62  ;;  %v5233_v55 = vpop.f32.mrb[14].mxu1  ;;  %2375 = vmatprep.mubr.bf16.mxu1 %v2120_v50  ;;  %5258 = vmatprep.mubr.bf16.mxu0 %v2120_v50  ;;  %v1908_v25 = vsel %vm1897_vm1, %v1885_v20, %v1886_v47  ;;  %v1907_v21 = vsel %vm1897_vm1, %v1886_v47, %v1887_v44 }
 0x382   : > { %v1362_v7 = vadd.f32 3.0, %v1326_v39  ;;  %v1329_v48 = vadd.f32 %v5233_v55, %v6950_v30  ;;  %v1320_v52 = vpop.f32.mrb[15].mxu1  ;;  %5259 = vmatmul.mubr.bf16.gmra.mrb[44].mxu0 %v7080_v1  ;;  %5278 = vmatprep.subr.bf16.mxu0 %v5735_v0  ;;  %v7108_v31 = vpack.c.bf16 %v1908_v25, %v1909_v29  ;;  %v7110_v62 = vpack.c.bf16 %v1906_v32, %v1907_v21  ;;  %v5741_v21 = vld [vmem:[#allocation11 + $0xb0] sm:$0xff]  }
 0x383   : > { %v1360_v60 = vadd.f32 3.0, %v1318_v16  ;;  %v1321_v46 = vadd.f32 %v6950_v30, %v1320_v52  ;;  %2376 = vmatmul.mubr.bf16.gmra.mrb[32].mxu1 %v7029_v41  ;;  %v7115_v20 = vpack.c.bf16 %v2883_v14, %v7073_v17  ;;  %v2881_v44 = vsel %vm2871_vm2, %v2860_v33, %v2861_v63 }
 0x384   : > { %v1382_v47 = vmax.f32 %v1362_v7, 0.0  ;;  %v1363_v55 = vadd.f32 3.0, %v1329_v48  ;;  %2383 = vmatprep.mubr.bf16.mxu1 %v7080_v1  ;;  %5279 = vmatpush3.bf16.msra.mxu0 %v5735_v0  ;;  %v2882_v29 = vsel %vm2871_vm2, %v2859_v38, %v2860_v33  ;;  %v5744_v38 = vld [vmem:[#allocation11 + $0xb8] sm:$0xff]  }
 0x385   : > { %v1380_v32 = vmax.f32 %v1360_v60, 0.0  ;;  %v1361_v25 = vadd.f32 3.0, %v1321_v46  ;;  %5280 = vmatprep.subr.bf16.mxu0 %v5738_v35  ;;  %4977 = vmatpush3.bf16.msra.mxu1 %v5746_v12  ;;  %v7122_v41 = vpack.c.bf16 %v2881_v44, %v2882_v29 }
 0x386   : > { %v1402_v17 = vmin.f32 %v1382_v47, 6.0  ;;  %v1383_v14 = vmax.f32 %v1363_v55, 0.0 }
 0x387   : > { %v1400_v52 = vmin.f32 %v1380_v32, 6.0  ;;  %v1381_v15 = vmax.f32 %v1361_v25, 0.0 }
 0x388   : > { %v1422_v63 = vmul.f32 %v1402_v17, %v1326_v39  ;;  %v1403_v7 = vmin.f32 %v1383_v14, 6.0  ;;  %5281 = vmatpush3.bf16.msra.mxu0 %v5738_v35  ;;  %v1655_v39 = vand.u32 15, %v7125_v2  ;;  %v1453_v35 = vadd.s32 32, %v6957_v34 }
 0x389   : > { %v1420_v0 = vmul.f32 %v1400_v52, %v1318_v16  ;;  %v1401_v3 = vmin.f32 %v1381_v15, 6.0  ;;  %5282 = vmatprep.subr.bf16.mxu0 %v5741_v21  ;;  %v8035_v14 = vrot.slane %v7075_v43, 7 }
 0x38a   : > { %v1442_v33 = vmul.f32 0.16666667, %v1422_v63  ;;  %v1423_v60 = vmul.f32 %v1403_v7, %v1329_v48 }
 0x38b   : > { %v1440_v12 = vmul.f32 0.16666667, %v1420_v0  ;;  %v1421_v44 = vmul.f32 %v1401_v3, %v1321_v46  ;;  %2384 = vmatmul.mubr.bf16.gmra.mrb[36].mxu1 %v2120_v50  ;;  %v5747_v46 = vld [vmem:[#allocation11 + $0x1c0] sm:$0xff]  }
 0x38c   : > { %v7127_v47 = vmul.f32 0.16666667, %v1423_v60  ;;  %5283 = vmatpush3.bf16.msra.mxu0 %v5741_v21  ;;  %v1891_v55 = vrot.slane %v1442_v33, 7  ;;  %v2865_v15 = vrot.slane %v1442_v33, 1 }
 0x38d   : > { %v1889_v29 = vrot.slane %v1440_v12, 7  ;;  %v2863_v32 = vrot.slane %v1440_v12, 1  ;;  %v1441_v16 = vmul.f32 0.16666667, %v1421_v44  ;;  %5284 = vmatprep.subr.bf16.mxu0 %v5744_v38 }
 0x38e   : > { %v7914_v25 = vrot.slane %v7127_v47, 7  ;;  %v7913_v48 = vrot.slane %v7127_v47, 1  ;;  %v7135_v3 = vpack.c.bf16 %v7127_v47, %v1442_v33  ;;  %v8036_v33 = vrot.slane %v7075_v43, 1 }
 0x38f   : > { %v1890_v50 = vrot.slane %v1441_v16, 7  ;;  %v2864_v21 = vrot.slane %v1441_v16, 1  ;;  %v5236_v2 = vpop.f32.mrb[16].mxu1  ;;  %v2122_v17 = vpack.c.bf16 %v1441_v16, %v1440_v12  ;;  %v1905_v52 = vsel %vm1897_vm1, %v8035_v14, %v1889_v29 }
 0x390   : > { %v1342_v63 = vadd.f32 %v5236_v2, %v6950_v30  ;;  %v1333_v7 = vpop.f32.mrb[17].mxu1  ;;  %5285 = vmatpush3.bf16.msra.mxu0 %v5744_v38  ;;  %v1902_v0 = vsel %vm1897_vm1, %v1891_v55, %v7914_v25  ;;  %v2879_v60 = vsel %vm2871_vm2, %v8036_v33, %v2863_v32  ;;  %v7154_v12 = vsel %vm2871_vm2, %v2865_v15, %v7913_v48 }
 0x391   : > { %v1334_v44 = vadd.f32 %v6950_v30, %v1333_v7  ;;  %v5237_v16 = vpop.f32.mrb[18].mxu1  ;;  %2391 = vmatprep.mubr.bf16.mxu1 %v2122_v17  ;;  %5262 = vmatprep.mubr.bf16.mxu0 %v2122_v17  ;;  %v1669_v38 = vand.u32 15, %v1453_v35  ;;  %v1904_v2 = vsel %vm1897_vm1, %v1889_v29, %v1890_v50  ;;  %v1903_v43 = vsel %vm1897_vm1, %v1890_v50, %v1891_v55 }
 0x392   : > { %v1366_v14 = vadd.f32 3.0, %v1342_v63  ;;  %v1345_v33 = vadd.f32 %v5237_v16, %v6950_v30  ;;  %v1336_v48 = vpop.f32.mrb[19].mxu1  ;;  %5263 = vmatmul.mubr.bf16.gmra.mrb[48].mxu0 %v7135_v3  ;;  %5042 = vmatprep.subr.bf16.mxu0 %v5747_v46  ;;  %v7167_v7 = vpack.c.bf16 %v1904_v2, %v1905_v52  ;;  %v7169_v35 = vpack.c.bf16 %v1902_v0, %v1903_v43 }
 0x393   : > { %v1364_v25 = vadd.f32 3.0, %v1334_v44  ;;  %v1337_v29 = vadd.f32 %v6950_v30, %v1336_v48  ;;  %2392 = vmatmul.mubr.bf16.gmra.mrb[40].mxu1 %v7080_v1  ;;  %v7174_v55 = vpack.c.bf16 %v2879_v60, %v7099_v13  ;;  %v2877_v50 = vsel %vm2871_vm2, %v2864_v21, %v2865_v15 }
 0x394   : > { %v1386_v16 = vmax.f32 %v1366_v14, 0.0  ;;  %v1367_v36 = vadd.f32 3.0, %v1345_v33  ;;  %2399 = vmatprep.mubr.bf16.mxu1 %v7135_v3  ;;  %v1455_v46 = vadd.s32 48, %v6957_v34  ;;  %v2878_v52 = vsel %vm2871_vm2, %v2863_v32, %v2864_v21 }
 0x395   : > { %v1384_v0 = vmax.f32 %v1364_v25, 0.0  ;;  %v1365_v2 = vadd.f32 3.0, %v1337_v29  ;;  %v7182_v30 = vpack.c.bf16 %v2877_v50, %v2878_v52  ;;  %v1535_v48 = vstv %s7163_s11  ;;  %s7764_s11 = scalar_lea.hbm %s8104_s4, %s4792_s29 }
 0x396   : > { %v1406_v1 = vmin.f32 %v1386_v16, 6.0  ;;  %v1387_v13 = vmax.f32 %v1367_v36, 0.0  ;;  %v1920_v60 = vadd.s32 4294967295, %v1655_v39  ;;  %v1922_v15 = vadd.s32 4294967295, %v1669_v38 }
 0x397   : > { %v1404_v43 = vmin.f32 %v1384_v0, 6.0  ;;  %v1385_v37 = vmax.f32 %v1365_v2, 0.0  ;;  %v1641_v14 = vand.u32 15, %v6957_v34  ;;  %v1683_v27 = vand.u32 15, %v1455_v46 }
 0x398   : > { %v1426_v45 = vmul.f32 %v1406_v1, %v1342_v63  ;;  %v1407_v40 = vmin.f32 %v1387_v13, 6.0  ;;  %vm7187_vm4 = vcmp.eq.s32.totalorder %v1535_v48, 1  ;;  %vm1940_vm5 = vcmp.ge.s32.totalorder %v1920_v60, 0 }
 0x399   : > { %v1424_v25 = vmul.f32 %v1404_v43, %v1334_v44  ;;  %v1405_v21 = vmin.f32 %v1385_v37, 6.0  ;;  %vm1942_vm6 = vcmp.ge.s32.totalorder %v1922_v15, 0  ;;  %v1918_v38 = vadd.s32 4294967295, %v1641_v14  ;;  %vm4551_vm7 = vmpackc.low %vm7187_vm4, %vm7187_vm4 }
 0x39a   : > { %v1446_v50 = vmul.f32 0.16666667, %v1426_v45  ;;  %v1427_v16 = vmul.f32 %v1407_v40, %v1345_v33  ;;  %v1924_v52 = vadd.s32 4294967295, %v1683_v27  ;;  %v1697_v0 = vand.u32 15, %v1457_v28  ;;  %vm7209_vm9 = vmpackc.low %vm6206_vm8, %vm1940_vm5 }
 0x39b   : > { %v1444_v36 = vmul.f32 0.16666667, %v1424_v25  ;;  %v1425_v39 = vmul.f32 %v1405_v21, %v1337_v29  ;;  %2400 = vmatmul.mubr.bf16.gmra.mrb[44].mxu1 %v2122_v17  ;;  %v1459_v44 = vadd.s32 80, %v6957_v34  ;;  %v8039_v27 = vrot.slane %v7127_v47, 7  ;;  %vm7222_vm10 = vmpackc.low %vm6206_vm8, %vm1942_vm6 }
 0x39c   : > { %v1635_v63 = vsel %vm7187_vm4, %v1446_v50, 0.0  ;;  %v1447_v46 = vmul.f32 0.16666667, %v1427_v16  ;;  %v8040_v13 = vrot.slane %v7127_v47, 1  ;;  %vm1938_vm11 = vcmp.ge.s32.totalorder %v1918_v38, 0  ;;  %v5748_v38 = vld [vmem:[#allocation11 + $0x180] sm:$0xff]  }
 0x39d   : > { %v1895_v2 = vrot.slane %v1635_v63, 7  ;;  %v1893_v1 = vrot.slane %v1444_v36, 7  ;;  %v2867_v48 = vrot.slane %v1444_v36, 1  ;;  %v2869_v37 = vrot.slane %v1635_v63, 1  ;;  %vm4581_vm13 = vmpackc.low %vm6206_vm8, %vm1938_vm11  ;;  %v5759_v63 = vld [vmem:[#allocation11 + $0x1f0] sm:$0xff]  }
 0x39e   : > { %v1636_v40 = vsel %vm7187_vm4, %v1447_v46, 0.0  ;;  %v4552_v45 = vpack.c.bf16 %v1447_v46, %v1446_v50  ;;  %v1445_v33 = vmul.f32 0.16666667, %v1425_v39  ;;  %v8043_v39 = vrot.slane %v6968_v42, 7  ;;  %v5755_v50 = vld [vmem:[#allocation11 + $0x1e0] sm:$0xff]  }
 0x39f   : > { %v1896_v17 = vrot.slane %v1636_v40, 7  ;;  %v2870_v29 = vrot.slane %v1636_v40, 1  ;;  %v1901_v28 = vsel %vm1897_vm1, %v8039_v27, %v1893_v1  ;;  %v2875_v43 = vsel %vm2871_vm2, %v8040_v13, %v2867_v48  ;;  %v5749_v27 = vld [vmem:[#allocation11 + $0x1c8] sm:$0xff]  }
 0x3a0   : > { %v1894_v14 = vrot.slane %v1445_v33, 7  ;;  %v2868_v25 = vrot.slane %v1445_v33, 1  ;;  %v2124_v21 = vpack.c.bf16 %v1445_v33, %v1444_v36  ;;  %v7214_v16 = vpack.c.bf16 %v2875_v43, %v7154_v12  ;;  %v5750_v43 = vld [vmem:[#allocation11 + $0x188] sm:$0xff]  }
 0x3a1   : > { %v1917_v47 = vsel %vm1897_vm1, %v1896_v17, %v8043_v39  ;;  %v7228_v60 = vsel %vm1897_vm1, %v1895_v2, %v1896_v17  ;;  %v7232_v36 = vsel %vm2871_vm2, %v2869_v37, %v2870_v29  ;;  %v8046_v12 = vrot.slane %v6968_v42, 1 }
 0x3a2   : > { %v4582_v15 = vpack.c.bf16 %v7000_v59, %v1917_v47  ;;  %2407 = vmatprep.mubr.bf16.mxu1 %v2124_v21  ;;  %5266 = vmatprep.mubr.bf16.mxu0 %v2124_v21  ;;  %v1926_v40 = vadd.s32 4294967295, %v1697_v0  ;;  %v1900_v33 = vsel %vm1897_vm1, %v1893_v1, %v1894_v14  ;;  %v7245_v17 = vsel %vm1897_vm1, %v1894_v14, %v1895_v2  ;;  %v5751_v14 = vld [vmem:[#allocation11 + $0x1d0] sm:$0xff]  }
 0x3a3   : > { %v7238_v46 = vsel %vm2871_vm2, %v2870_v29, %v8046_v12  ;;  %2408 = vmatmul.mubr.bf16.gmra.mrb[48].mxu1 %v7135_v3  ;;  %5267 = vmatmul.mubr.msk.bf16.gmra.mrb[52].mxu0 %vm4551_vm7, %v4552_v45  ;;  %v1461_v42 = vadd.s32 96, %v6957_v34  ;;  %v7254_v59 = vpack.c.bf16 %v1900_v33, %v1901_v28  ;;  %v4648_v0 = vpack.c.bf16 %v7228_v60, %v7245_v17  ;;  %v5752_v47 = vld [vmem:[#allocation11 + $0x190] sm:$0xff]   ;;  %v5753_v12 = vld [vmem:[#allocation11 + $0x1d8] sm:$0xff]  }
 0x3a4   : > { %v2873_v1 = vsel %vm2871_vm2, %v2868_v25, %v2869_v37  ;;  %4580 = vmatprep.mubr.msk.bf16.mxu1 %vm7209_vm9, %v7023_v4  ;;  %5286 = vmatprep.mubr.msk.bf16.mxu0 %vm7222_vm10, %v7049_v5  ;;  %v2874_v3 = vsel %vm2871_vm2, %v2867_v48, %v2868_v25  ;;  %v4744_v32 = vpack.c.bf16 %v7238_v46, %v7232_v36  ;;  %vm1944_vm12 = vcmp.ge.s32.totalorder %v1924_v52, 0  ;;  %v5773_v36 = vld [vmem:[#allocation13 + $0x10] sm:$0xff]  }
 0x3a5   : > { %v1711_v2 = vand.u32 15, %v1459_v44  ;;  %v7270_v45 = vpack.c.bf16 %v2873_v1, %v2874_v3  ;;  %vm1946_vm14 = vcmp.ge.s32.totalorder %v1926_v40, 0  ;;  %v1725_v37 = vand.u32 15, %v1461_v42  ;;  %vm7274_vm15 = vmpackc.low %vm6206_vm8, %vm1944_vm12  ;;  %v5754_v3 = vld [vmem:[#allocation11 + $0x198] sm:$0xff]  }
 0x3a6   : > { %v1463_v48 = vadd.s32 112, %v6957_v34  ;;  %vm7280_vm0 = vmpackc.low %vm6206_vm8, %vm1946_vm14  ;;  %v1465_v13 = vadd.s32 128, %v6957_v34  ;;  %v1467_v40 = vadd.s32 144, %v6957_v34  ;;  %v1452_v1 = vadd.s32 24, %v6957_v34 }
 0x3a7   : > { %v1928_v28 = vadd.s32 4294967295, %v1711_v2  ;;  %v1930_v44 = vadd.s32 4294967295, %v1725_v37  ;;  %v1460_v52 = vadd.s32 88, %v6957_v34  ;;  %v1462_v39 = vadd.s32 104, %v6957_v34 }
 0x3a8   : > { %v1739_v25 = vand.u32 15, %v1463_v48  ;;  %v1753_v21 = vand.u32 15, %v1465_v13  ;;  %v1662_v2 = vand.u32 15, %v1452_v1  ;;  %v1450_v48 = vadd.s32 8, %v6957_v34  ;;  %v5762_v1 = vld [vmem:[#allocation11 + $0x1b8] sm:$0xff]  }
 0x3a9   : > { %vm1948_vm1 = vcmp.ge.s32.totalorder %v1928_v28, 0  ;;  %vm1950_vm2 = vcmp.ge.s32.totalorder %v1930_v44, 0 }
 0x3aa   : > { %vm7295_vm3 = vmpackc.low %vm6206_vm8, %vm1948_vm1  ;;  %v1934_v42 = vadd.s32 4294967295, %v1753_v21  ;;  %v2895_v13 = vadd.s32 1, %v1662_v2  ;;  %v5760_v21 = vld [vmem:[#allocation11 + $0x1b0] sm:$0xff]  }
 0x3ab   : > { %4583 = vmatmul.mubr.msk.bf16.vlgmr.msra.gmra.mrb[52].mxu1 %vm4581_vm13, %v4582_v15  ;;  %5287 = vmatmul.mubr.msk.bf16.vlgmr.msra.gmra.mrb[40].mxu0 %vm7274_vm15, %v7046_v8  ;;  %v1932_v15 = vadd.s32 4294967295, %v1739_v25  ;;  %vm7301_vm4 = vmpackc.low %vm6206_vm8, %vm1950_vm2 }
 0x3ac   : > { %5043 = vmatpush3.bf16.msra.mxu0 %v5748_v38  ;;  %4586 = vmatprep.mubr.msk.bf16.mxu1 %vm7222_vm10, %v7049_v5  ;;  %vm1954_vm6 = vcmp.ge.s32.totalorder %v1934_v42, 0  ;;  %v5756_v38 = vld [vmem:[#allocation11 + $0x1a0] sm:$0xff]   ;;  %vm2935_vm11 = vcmp.lt.s32.totalorder %v2895_v13, 16  ;;  %v5769_v13 = vld [vmem:[#allocation11 + $0x230] sm:$0xff]  }
 0x3ad   : > { %5290 = vmatprep.mubr.msk.bf16.mxu0 %vm7280_vm0, %v7108_v31  ;;  %5044 = vmatprep.subr.bf16.mxu0 %v5749_v27  ;;  %vm1952_vm5 = vcmp.ge.s32.totalorder %v1932_v15, 0  ;;  %v5757_v27 = vld [vmem:[#allocation11 + $0x1e8] sm:$0xff]   ;;  %vm7344_vm13 = vmpackc.low %vm2935_vm11, %vm6206_vm8 }
 0x3ae   : > { %vm7319_vm7 = vmpackc.low %vm6206_vm8, %vm1952_vm5  ;;  %v5772_v15 = vld [vmem:[#allocation13 + $0x8] sm:$0xff]  }
 0x3b0   : > { %5045 = vmatpush3.bf16.msra.mxu0 %v5750_v43  ;;  %v1454_v43 = vadd.s32 40, %v6957_v34 }
 0x3b1   : > { %5046 = vmatprep.subr.bf16.mxu0 %v5751_v14  ;;  %v5758_v14 = vld [vmem:[#allocation11 + $0x1a8] sm:$0xff]  }
 0x3b2   : > { %v1676_v25 = vand.u32 15, %v1454_v43  ;;  %v1464_v43 = vadd.s32 120, %v6957_v34 }
 0x3b3   : > { %4589 = vmatmul.mubr.msk.bf16.gmra.mrb[56].mxu1 %vm7209_vm9, %v7023_v4  ;;  %5291 = vmatmul.mubr.msk.bf16.gmra.mrb[44].mxu0 %vm7295_vm3, %v7110_v62  ;;  %v1767_v4 = vand.u32 15, %v1467_v40  ;;  %vm7325_vm9 = vmpackc.low %vm6206_vm8, %vm1954_vm6  ;;  %v1456_v40 = vadd.s32 56, %v6957_v34 }
 0x3b4   : > { %5047 = vmatpush3.bf16.msra.mxu0 %v5752_v47  ;;  %4592 = vmatprep.mubr.msk.bf16.mxu1 %vm7274_vm15, %v7046_v8  ;;  %v5761_v47 = vld [vmem:[#allocation11 + $0x1f8] sm:$0xff]   ;;  %v2897_v42 = vadd.s32 1, %v1676_v25  ;;  %v1746_v44 = vand.u32 15, %v1464_v43 }
 0x3b5   : > { %5294 = vmatprep.mubr.msk.bf16.mxu0 %vm7301_vm4, %v7167_v7  ;;  %5048 = vmatprep.subr.bf16.mxu0 %v5753_v12  ;;  %v1936_v28 = vadd.s32 4294967295, %v1767_v4  ;;  %v1690_v29 = vand.u32 15, %v1456_v40  ;;  %v5765_v4 = vld [vmem:[#allocation11 + $0x210] sm:$0xff]  }
 0x3b6   : > { %v2907_v37 = vadd.s32 1, %v1746_v44 }
 0x3b7   : > { %v2899_v17 = vadd.s32 1, %v1690_v29 }
 0x3b8   : > { %5049 = vmatpush3.bf16.msra.mxu0 %v5754_v3  ;;  %v5763_v3 = vld [vmem:[#allocation11 + $0x200] sm:$0xff]  }
 0x3b9   : > { %5050 = vmatprep.subr.bf16.mxu0 %v5755_v50  ;;  %v8063_v50 = vpack.c.bf16 %v7004_v51, %v7010_v9  ;;  %vm2939_vm5 = vcmp.lt.s32.totalorder %v2899_v17, 16  ;;  %v5766_v9 = vld [vmem:[#allocation11 + $0x218] sm:$0xff]  }
 0x3bb   : > { %4595 = vmatmul.mubr.msk.bf16.gmra.mrb[60].mxu1 %vm7222_vm10, %v7049_v5  ;;  %5295 = vmatmul.mubr.msk.bf16.gmra.mrb[48].mxu0 %vm7319_vm7, %v7169_v35  ;;  %vm1956_vm10 = vcmp.ge.s32.totalorder %v1936_v28, 0  ;;  %v1648_v5 = vand.u32 15, %v1450_v48  ;;  %v5768_v28 = vld [vmem:[#allocation11 + $0x228] sm:$0xff]   ;;  %v1732_v48 = vand.u32 15, %v1462_v39 }
 0x3bc   : > { %5051 = vmatpush3.bf16.msra.mxu0 %v5756_v38  ;;  %4598 = vmatprep.mubr.msk.bf16.mxu1 %vm7280_vm0, %v7108_v31  ;;  %vm4647_vm12 = vmpackc.low %vm6206_vm8, %vm1956_vm10  ;;  %v1718_v38 = vand.u32 15, %v1460_v52 }
 0x3bd   : > { %5298 = vmatprep.mubr.msk.bf16.mxu0 %vm7325_vm9, %v7254_v59  ;;  %5052 = vmatprep.subr.bf16.mxu0 %v5757_v27  ;;  %v2893_v12 = vadd.s32 1, %v1648_v5  ;;  %v5767_v27 = vld [vmem:[#allocation11 + $0x220] sm:$0xff]   ;;  %v2905_v33 = vadd.s32 1, %v1732_v48 }
 0x3bf   : > { %vm2933_vm14 = vcmp.lt.s32.totalorder %v2893_v12, 16 }
 0x3c0   : > { %5053 = vmatpush3.bf16.msra.mxu0 %v5758_v14  ;;  %vm4677_vm1 = vmpackc.low %vm2933_vm14, %vm6206_vm8 }
 0x3c1   : > { %5054 = vmatprep.subr.bf16.mxu0 %v5759_v63 }
 0x3c3   : > { %4601 = vmatmul.mubr.msk.bf16.gmra.mrb[64].mxu1 %vm7274_vm15, %v7046_v8  ;;  %5299 = vmatmul.mubr.msk.bf16.gmra.mrb[52].mxu0 %vm4647_vm12, %v4648_v0  ;;  %vm2937_vm15 = vcmp.lt.s32.totalorder %v2897_v42, 16  ;;  %v5764_v8 = vld [vmem:[#allocation11 + $0x208] sm:$0xff]   ;;  %v1458_v0 = vadd.s32 72, %v6957_v34 }
 0x3c4   : > { %5055 = vmatpush3.bf16.msra.mxu0 %v5760_v21  ;;  %4604 = vmatprep.mubr.msk.bf16.mxu1 %vm7295_vm3, %v7110_v62  ;;  %vm7363_vm2 = vmpackc.low %vm2937_vm15, %vm6206_vm8  ;;  %v1468_v21 = vadd.s32 152, %v6957_v34 }
 0x3c5   : > { %4676 = vmatprep.mubr.msk.bf16.mxu0 %vm7344_vm13, %v7063_v6  ;;  %5056 = vmatprep.subr.bf16.mxu0 %v5761_v47  ;;  %v1704_v2 = vand.u32 15, %v1458_v0 }
 0x3c6   : > { %v1774_v47 = vand.u32 15, %v1468_v21 }
 0x3c7   : > { %v2901_v51 = vadd.s32 1, %v1704_v2 }
 0x3c8   : > { %5057 = vmatpush3.bf16.msra.mxu0 %v5762_v1  ;;  %v5774_v1 = vld [vmem:[#allocation13 + $0x18] sm:$0xff]  }
 0x3c9   : > { %5302 = vmatprep.subr.bf16.mxu0 %v5763_v3  ;;  %vm2941_vm6 = vcmp.lt.s32.totalorder %v2901_v51, 16 }
 0x3ca   : > { %vm7399_vm10 = vmpackc.low %vm2941_vm6, %vm6206_vm8 }
 0x3cb   : > { %4607 = vmatmul.mubr.msk.bf16.gmra.mrb[68].mxu1 %vm7280_vm0, %v7108_v31  ;;  %4679 = vmatmul.mubr.msk.bf16.vlgmr.msra.gmra.mrb[56].mxu0 %vm4677_vm1, %v8063_v50  ;;  %vm7381_vm0 = vmpackc.low %vm2939_vm5, %vm6206_vm8  ;;  %v5775_v50 = vld [vmem:[#allocation13 + $0x20] sm:$0xff]  }
 0x3cc   : > { %5303 = vmatpush3.bf16.msra.mxu0 %v5763_v3  ;;  %4610 = vmatprep.mubr.msk.bf16.mxu1 %vm7301_vm4, %v7167_v7 }
 0x3cd   : > { %4682 = vmatprep.mubr.msk.bf16.mxu0 %vm7363_vm2, %v7067_v57  ;;  %5304 = vmatprep.subr.bf16.mxu0 %v5764_v8 }
 0x3d0   : > { %5305 = vmatpush3.bf16.msra.mxu0 %v5764_v8 }
 0x3d1   : > { %5306 = vmatprep.subr.bf16.mxu0 %v5765_v4 }
 0x3d3   : > { %4613 = vmatmul.mubr.msk.bf16.gmra.mrb[72].mxu1 %vm7295_vm3, %v7110_v62  ;;  %4685 = vmatmul.mubr.msk.bf16.gmra.mrb[60].mxu0 %vm7344_vm13, %v7063_v6  ;;  %v2903_v6 = vadd.s32 1, %v1718_v38  ;;  %v5776_v38 = vld [vmem:[#allocation13 + $0x28] sm:$0xff]  }
 0x3d4   : > { %4616 = vmatprep.mubr.msk.bf16.mxu1 %vm7319_vm7, %v7169_v35  ;;  %4688 = vmatprep.mubr.msk.bf16.mxu0 %vm7381_vm0, %v7115_v20 }
 0x3d5   : > { %5307 = vmatpush3.bf16.msra.mxu0 %v5765_v4  ;;  %vm2943_vm3 = vcmp.lt.s32.totalorder %v2903_v6, 16 }
 0x3d6   : > { %5308 = vmatprep.subr.bf16.mxu0 %v5766_v9  ;;  %vm7417_vm11 = vmpackc.low %vm2943_vm3, %vm6206_vm8 }
 0x3d9   : > { %5309 = vmatpush3.bf16.msra.mxu0 %v5766_v9 }
 0x3da   : > { %5310 = vmatprep.subr.bf16.mxu0 %v5767_v27 }
 0x3db   : > { %4619 = vmatmul.mubr.msk.bf16.gmra.mrb[76].mxu1 %vm7301_vm4, %v7167_v7  ;;  %4691 = vmatmul.mubr.msk.bf16.gmra.mrb[64].mxu0 %vm7363_vm2, %v7067_v57  ;;  %vm2945_vm4 = vcmp.lt.s32.totalorder %v2905_v33, 16 }
 0x3dc   : > { %4622 = vmatprep.mubr.msk.bf16.mxu1 %vm7325_vm9, %v7254_v59  ;;  %4694 = vmatprep.mubr.msk.bf16.mxu0 %vm7399_vm10, %v7122_v41  ;;  %v5770_v59 = vld [vmem:[#allocation11 + $0x238] sm:$0xff]   ;;  %vm7432_vm9 = vmpackc.low %vm2945_vm4, %vm6206_vm8 }
 0x3dd   : > { %5311 = vmatpush3.bf16.msra.mxu0 %v5767_v27 }
 0x3de   : > { %5312 = vmatprep.subr.bf16.mxu0 %v5768_v28 }
 0x3e1   : > { %5313 = vmatpush3.bf16.msra.mxu0 %v5768_v28 }
 0x3e2   : > { %5314 = vmatprep.subr.bf16.mxu0 %v5769_v13 }
 0x3e3   : > { %4625 = vmatmul.mubr.msk.bf16.gmra.mrb[80].mxu1 %vm7319_vm7, %v7169_v35  ;;  %4697 = vmatmul.mubr.msk.bf16.gmra.mrb[68].mxu0 %vm7381_vm0, %v7115_v20  ;;  %v1466_v35 = vadd.s32 136, %v6957_v34  ;;  %vm2947_vm7 = vcmp.lt.s32.totalorder %v2907_v37, 16  ;;  %v8074_v34 = vpack.c.bf16 %v6820_v11, %v6818_v10 }
 0x3e4   : > { %4700 = vmatprep.mubr.msk.bf16.mxu0 %vm7417_vm11, %v7174_v55  ;;  %vm7444_vm12 = vmpackc.low %vm2947_vm7, %vm6206_vm8 }
 0x3e5   : > { %5315 = vmatpush3.bf16.msra.mxu0 %v5769_v13  ;;  %v1760_v63 = vand.u32 15, %v1466_v35  ;;  %v5777_v35 = vld [vmem:[#allocation13 + $0x30] sm:$0xff]  }
 0x3e6   : > { %5316 = vmatprep.subr.bf16.mxu0 %v5770_v59 }
 0x3e7   : > { %v2909_v25 = vadd.s32 1, %v1760_v63 }
 0x3e9   : > { %5317 = vmatpush3.bf16.msra.mxu0 %v5770_v59  ;;  %vm2949_vm13 = vcmp.lt.s32.totalorder %v2909_v25, 16 }
 0x3ea   : > { %vm4716_vm14 = vmpackc.low %vm2949_vm13, %vm6206_vm8 }
 0x3eb   : > { %4703 = vmatmul.mubr.msk.bf16.gmra.mrb[72].mxu0 %vm7399_vm10, %v7122_v41 }
 0x3ec   : > { %4706 = vmatprep.mubr.msk.bf16.mxu0 %vm7432_vm9, %v7182_v30 }
 0x3f3   : > { %4709 = vmatmul.mubr.msk.bf16.gmra.mrb[76].mxu0 %vm7417_vm11, %v7174_v55 }
 0x3f4   : > { %4712 = vmatprep.mubr.msk.bf16.mxu0 %vm7444_vm12, %v7214_v16 }
 0x3fb   : > { %4715 = vmatmul.mubr.msk.bf16.gmra.mrb[80].mxu0 %vm7432_vm9, %v7182_v30 }
 0x3fc   : > { %4718 = vmatprep.mubr.msk.bf16.mxu0 %vm4716_vm14, %v7270_v45 }
 0x403   : > { %4721 = vmatmul.mubr.msk.bf16.gmra.mrb[84].mxu0 %vm7444_vm12, %v7214_v16 }
 0x404   : > { %5318 = vmatprep.mubr.msk.bf16.mxu0 %vm7363_vm2, %v7067_v57  ;;  %v2911_v57 = vadd.s32 1, %v1774_v47  ;;  %v5778_v47 = vld [vmem:[#allocation13 + $0x38] sm:$0xff]  }
 0x406   : > { %vm2951_vm15 = vcmp.lt.s32.totalorder %v2911_v57, 16 }
 0x407   : > { %vm4743_vm1 = vmpackc.low %vm2951_vm15, %vm6206_vm8 }
 0x40b   : > { %5319 = vmatmul.mubr.msk.bf16.vlgmr.msra.gmra.mrb[40].mxu0 %vm7381_vm0, %v7115_v20  ;;  %v5771_v20 = vld [vmem:[#allocation13] sm:$0xff]  }
 0x40c   : > { %5322 = vmatprep.mubr.msk.bf16.mxu0 %vm7399_vm10, %v7122_v41  ;;  %5334 = vmatprep.subr.bf16.mxu1 %v5771_v20 }
 0x40d   : > { %5335 = vmatpush3.bf16.msra.mxu1 %v5771_v20 }
 0x40e   : > { %5336 = vmatprep.subr.bf16.mxu1 %v5772_v15 }
 0x411   : > { %5337 = vmatpush3.bf16.msra.mxu1 %v5772_v15 }
 0x412   : > { %5338 = vmatprep.subr.bf16.mxu1 %v5773_v36 }
 0x413   : > { %5323 = vmatmul.mubr.msk.bf16.gmra.mrb[44].mxu0 %vm7417_vm11, %v7174_v55 }
 0x414   : > { %5326 = vmatprep.mubr.msk.bf16.mxu0 %vm7432_vm9, %v7182_v30 }
 0x415   : > { %5339 = vmatpush3.bf16.msra.mxu1 %v5773_v36 }
 0x416   : > { %5340 = vmatprep.subr.bf16.mxu1 %v5774_v1 }
 0x419   : > { %5341 = vmatpush3.bf16.msra.mxu1 %v5774_v1 }
 0x41a   : > { %5342 = vmatprep.subr.bf16.mxu1 %v5775_v50 }
 0x41b   : > { %5327 = vmatmul.mubr.msk.bf16.gmra.mrb[48].mxu0 %vm7444_vm12, %v7214_v16 }
 0x41c   : > { %5330 = vmatprep.mubr.msk.bf16.mxu0 %vm4716_vm14, %v7270_v45 }
 0x41d   : > { %5343 = vmatpush3.bf16.msra.mxu1 %v5775_v50 }
 0x41e   : > { %5344 = vmatprep.subr.bf16.mxu1 %v5776_v38 }
 0x421   : > { %5345 = vmatpush3.bf16.msra.mxu1 %v5776_v38 }
 0x422   : > { %5346 = vmatprep.subr.bf16.mxu1 %v5777_v35 }
 0x423   : > { %5331 = vmatmul.mubr.msk.bf16.gmra.mrb[52].mxu0 %vm4743_vm1, %v4744_v32 }
 0x424   : > { %4019 = vmatprep.mubr.bf16.mxu0 %v8074_v34 }
 0x425   : > { %5347 = vmatpush3.bf16.msra.mxu1 %v5777_v35 }
 0x426   : > { %5348 = vmatprep.subr.bf16.mxu1 %v5778_v47 }
 0x429   : > { %5349 = vmatpush3.bf16.msra.mxu1 %v5778_v47  ;;  %v7552_v47 = vld [vmem:[#allocation14 + $0x58] sm:$0xff]  }
 0x435   : > { %v4898_v41 = vpop.f32.mrb[20].mxu1 }
 0x436   : > { %v4899_v55 = vpop.f32.mrb[21].mxu1 }
 0x437   : > { %v7489_v30 = vadd.f32 %v4899_v55, %v4898_v41  ;;  %v4901_v16 = vpop.f32.mrb[22].mxu1 }
 0x438   : > { %v4902_v45 = vpop.f32.mrb[23].mxu1 }
 0x439   : > { %v7491_v12 = vadd.f32 %v4902_v45, %v4901_v16 }
 0x446   : > { %v4904_v46 = vpop.f32.mrb[24].mxu1 }
 0x447   : > { %v4905_v10 = vpop.f32.mrb[25].mxu1 }
 0x448   : > { %v7493_v11 = vadd.f32 %v4905_v10, %v4904_v46  ;;  %v4907_v32 = vpop.f32.mrb[26].mxu1 }
 0x449   : > { %v4908_v40 = vpop.f32.mrb[27].mxu1 }
 0x44a   : > { %v7495_v42 = vadd.f32 %v4908_v40, %v4907_v32 }
 0x44e   : > { %v4910_v3 = vpop.f32.mrb[28].mxu1 }
 0x44f   : > { %v4911_v29 = vpop.f32.mrb[29].mxu1 }
 0x450   : > { %v7497_v8 = vadd.f32 %v4911_v29, %v4910_v3  ;;  %v4913_v60 = vpop.f32.mrb[30].mxu1 }
 0x451   : > { %v4914_v17 = vpop.f32.mrb[31].mxu1 }
 0x452   : > { %v7499_v0 = vadd.f32 %v4914_v17, %v4913_v60 }
 0x456   : > { %v4916_v4 = vpop.f32.mrb[32].mxu1 }
 0x457   : > { %v4917_v2 = vpop.f32.mrb[33].mxu1 }
 0x458   : > { %v7501_v31 = vadd.f32 %v4917_v2, %v4916_v4  ;;  %v4919_v51 = vpop.f32.mrb[34].mxu1 }
 0x459   : > { %v4920_v9 = vpop.f32.mrb[35].mxu1 }
 0x45a   : > { %v7503_v52 = vadd.f32 %v4920_v9, %v4919_v51 }
 0x45e   : > { %v4922_v27 = vpop.f32.mrb[36].mxu1 }
 0x45f   : > { %v4923_v62 = vpop.f32.mrb[37].mxu1 }
 0x460   : > { %v7505_v6 = vadd.f32 %v4923_v62, %v4922_v27  ;;  %v4925_v39 = vpop.f32.mrb[38].mxu1 }
 0x461   : > { %v4926_v28 = vpop.f32.mrb[39].mxu1 }
 0x462   : > { %v7507_v48 = vadd.f32 %v4926_v28, %v4925_v39  ;;  %v5779_v28 = vld [vmem:[#allocation14 + $0x40] sm:$0xff]  }
 0x463   : > { %5366 = vmatprep.subr.bf16.mxu1 %v5779_v28  ;;  %5138 = vmatprep.subr.bf16.mxu0 %v5779_v28 }
 0x466   : > { %v4928_v13 = vpop.f32.mrb[40].mxu1 }
 0x467   : > { %v4929_v7 = vpop.f32.mrb[41].mxu1 }
 0x468   : > { %v7509_v33 = vadd.f32 %v4929_v7, %v4928_v13  ;;  %v4931_v43 = vpop.f32.mrb[42].mxu1  ;;  %v7532_v13 = vld [vmem:[#allocation14] sm:$0xff]   ;;  %v7534_v7 = vld [vmem:[#allocation14 + $0x48] sm:$0xff]  }
 0x469   : > { %v4932_v59 = vpop.f32.mrb[43].mxu1  ;;  %5139 = vmatpush3.bf16.msra.mxu0 %v7532_v13 }
 0x46a   : > { %v7511_v44 = vadd.f32 %v4932_v59, %v4931_v43  ;;  %v7540_v43 = vld [vmem:[#allocation14 + $0x8] sm:$0xff]   ;;  %5140 = vmatprep.subr.bf16.mxu0 %v7534_v7 }
 0x46d   : > { %5141 = vmatpush3.bf16.msra.mxu0 %v7540_v43 }
 0x46e   : > { %v4934_v14 = vpop.f32.mrb[44].mxu1 }
 0x46f   : > { %v4935_v37 = vpop.f32.mrb[45].mxu1 }
 0x470   : > { %v7513_v63 = vadd.f32 %v4935_v37, %v4934_v14  ;;  %v4937_v5 = vpop.f32.mrb[46].mxu1 }
 0x471   : > { %v4938_v25 = vpop.f32.mrb[47].mxu1 }
 0x472   : > { %v7515_v21 = vadd.f32 %v4938_v25, %v4937_v5  ;;  %v7549_v25 = vld [vmem:[#allocation14 + $0x10] sm:$0xff]  }
 0x476   : > { %v4940_v57 = vpop.f32.mrb[48].mxu1 }
 0x477   : > { %v4941_v34 = vpop.f32.mrb[49].mxu1 }
 0x478   : > { %v7517_v20 = vadd.f32 %v4941_v34, %v4940_v57  ;;  %v4943_v41 = vpop.f32.mrb[50].mxu1 }
 0x479   : > { %v4944_v55 = vpop.f32.mrb[51].mxu1 }
 0x47a   : > { %v7519_v16 = vadd.f32 %v4944_v55, %v4943_v41  ;;  %v7558_v55 = vld [vmem:[#allocation14 + $0x18] sm:$0xff]  }
 0x47e   : > { %v4978_v45 = vpop.f32.mrb[52].mxu1 }
 0x47f   : > { %v4979_v15 = vpop.f32.mrb[53].mxu1 }
 0x480   : > { %v4980_v36 = vadd.f32 %v4979_v15, %v4978_v45  ;;  %v4981_v46 = vpop.f32.mrb[54].mxu1  ;;  %v7561_v15 = vld [vmem:[#allocation14 + $0x60] sm:$0xff]  }
 0x481   : > { %v4982_v10 = vpop.f32.mrb[55].mxu1 }
 0x482   : > { %v5385_v32 = vadd.f32 %v4980_v36, %v7489_v30  ;;  %v4983_v40 = vadd.f32 %v4982_v10, %v4981_v46 }
 0x484   : > { %v5391_v1 = vadd.f32 %v4983_v40, %v7491_v12 }
 0x486   : > { %v4984_v3 = vpop.f32.mrb[56].mxu1 }
 0x487   : > { %v4985_v29 = vpop.f32.mrb[57].mxu1 }
 0x488   : > { %v4986_v60 = vadd.f32 %v4985_v29, %v4984_v3  ;;  %v4987_v17 = vpop.f32.mrb[58].mxu1 }
 0x489   : > { %v4988_v50 = vpop.f32.mrb[59].mxu1 }
 0x48a   : > { %v7524_v4 = vadd.f32 %v4986_v60, %v7493_v11  ;;  %v4989_v2 = vadd.f32 %v4988_v50, %v4987_v17 }
 0x48c   : > { %v7527_v51 = vadd.f32 %v4989_v2, %v7495_v42  ;;  %v7569_v2 = vld [vmem:[#allocation14 + $0x20] sm:$0xff]  }
 0x48e   : > { %v4990_v9 = vpop.f32.mrb[60].mxu1 }
 0x48f   : > { %v4991_v38 = vpop.f32.mrb[61].mxu1 }
 0x490   : > { %v4992_v27 = vadd.f32 %v4991_v38, %v4990_v9  ;;  %v4993_v62 = vpop.f32.mrb[62].mxu1  ;;  %v7572_v9 = vld [vmem:[#allocation14 + $0x68] sm:$0xff]  }
 0x491   : > { %v4994_v30 = vpop.f32.mrb[63].mxu1 }
 0x492   : > { %v7530_v39 = vadd.f32 %v4992_v27, %v7497_v8  ;;  %v4995_v12 = vadd.f32 %v4994_v30, %v4993_v62  ;;  %v7543_v8 = vld [vmem:[#allocation14 + $0x50] sm:$0xff]  }
 0x493   : > { %5142 = vmatprep.subr.bf16.mxu0 %v7543_v8 }
 0x494   : > { %v7537_v11 = vadd.f32 %v4995_v12, %v7499_v0  ;;  %5143 = vmatpush3.bf16.msra.mxu0 %v7549_v25 }
 0x495   : > { %5144 = vmatprep.subr.bf16.mxu0 %v7552_v47 }
 0x496   : > { %v4996_v42 = vpop.f32.mrb[64].mxu1 }
 0x497   : > { %v4997_v59 = vpop.f32.mrb[65].mxu1 }
 0x498   : > { %v4998_v14 = vadd.f32 %v4997_v59, %v4996_v42  ;;  %v4999_v37 = vpop.f32.mrb[66].mxu1  ;;  %5145 = vmatpush3.bf16.msra.mxu0 %v7558_v55 }
 0x499   : > { %v5000_v35 = vpop.f32.mrb[67].mxu1  ;;  %5146 = vmatprep.subr.bf16.mxu0 %v7561_v15 }
 0x49a   : > { %v7546_v5 = vadd.f32 %v4998_v14, %v7501_v31  ;;  %v5001_v0 = vadd.f32 %v5000_v35, %v4999_v37 }
 0x49c   : > { %v7555_v57 = vadd.f32 %v5001_v0, %v7503_v52  ;;  %5147 = vmatpush3.bf16.msra.mxu0 %v7569_v2 }
 0x49d   : > { %5148 = vmatprep.subr.bf16.mxu0 %v7572_v9 }
 0x49e   : > { %v5002_v34 = vpop.f32.mrb[68].mxu1  ;;  %v5058_v41 = vpop.f32.mrb[56].mxu0 }
 0x49f   : > { %v5003_v31 = vpop.f32.mrb[69].mxu1  ;;  %v5059_v45 = vpop.f32.mrb[57].mxu0 }
 0x4a0   : > { %v5004_v36 = vadd.f32 %v5003_v31, %v5002_v34  ;;  %v5060_v46 = vadd.f32 %v5059_v45, %v5058_v41  ;;  %v5005_v10 = vpop.f32.mrb[70].mxu1  ;;  %v5061_v40 = vpop.f32.mrb[58].mxu0 }
 0x4a1   : > { %v5006_v3 = vpop.f32.mrb[71].mxu1  ;;  %v5062_v29 = vpop.f32.mrb[59].mxu0 }
 0x4a2   : > { %v7564_v52 = vadd.f32 %v5004_v36, %v7505_v6  ;;  %v5007_v60 = vadd.f32 %v5006_v3, %v5005_v10  ;;  %v5063_v17 = vadd.f32 %v5062_v29, %v5061_v40  ;;  %v7566_v50 = vadd.f32 %v5385_v32, %v5060_v46  ;;  %v7578_v6 = vld [vmem:[#allocation14 + $0x28] sm:$0xff]  }
 0x4a3   : > { %5149 = vmatpush3.bf16.msra.mxu0 %v7578_v6 }
 0x4a4   : > { %v5415_v38 = vadd.f32 %v5007_v60, %v7507_v48  ;;  %v7575_v27 = vadd.f32 %v5391_v1, %v5063_v17 }
 0x4a6   : > { %v5008_v62 = vpop.f32.mrb[72].mxu1  ;;  %v5064_v30 = vpop.f32.mrb[60].mxu0 }
 0x4a7   : > { %v5009_v32 = vpop.f32.mrb[73].mxu1  ;;  %v5065_v12 = vpop.f32.mrb[61].mxu0 }
 0x4a8   : > { %v5010_v28 = vadd.f32 %v5009_v32, %v5008_v62  ;;  %v5066_v42 = vadd.f32 %v5065_v12, %v5064_v30  ;;  %v5011_v59 = vpop.f32.mrb[74].mxu1  ;;  %v5067_v14 = vpop.f32.mrb[62].mxu0 }
 0x4a9   : > { %v5012_v37 = vpop.f32.mrb[75].mxu1  ;;  %v5068_v35 = vpop.f32.mrb[63].mxu0 }
 0x4aa   : > { %v5406_v48 = vadd.f32 %v5010_v28, %v7509_v33  ;;  %v5013_v1 = vadd.f32 %v5012_v37, %v5011_v59  ;;  %v5069_v0 = vadd.f32 %v5068_v35, %v5067_v14  ;;  %v7583_v34 = vadd.f32 %v7524_v4, %v5066_v42 }
 0x4ac   : > { %v5412_v41 = vadd.f32 %v5013_v1, %v7511_v44  ;;  %v7588_v31 = vadd.f32 %v7527_v51, %v5069_v0 }
 0x4ae   : > { %v5014_v45 = vpop.f32.mrb[76].mxu1  ;;  %v5070_v36 = vpop.f32.mrb[64].mxu0 }
 0x4af   : > { %v5015_v46 = vpop.f32.mrb[77].mxu1  ;;  %v5071_v10 = vpop.f32.mrb[65].mxu0 }
 0x4b0   : > { %v5016_v40 = vadd.f32 %v5015_v46, %v5014_v45  ;;  %v5072_v3 = vadd.f32 %v5071_v10, %v5070_v36  ;;  %v5017_v29 = vpop.f32.mrb[78].mxu1  ;;  %v5073_v33 = vpop.f32.mrb[66].mxu0 }
 0x4b1   : > { %v5018_v60 = vpop.f32.mrb[79].mxu1  ;;  %v5074_v17 = vpop.f32.mrb[67].mxu0 }
 0x4b2   : > { %v5421_v4 = vadd.f32 %v5016_v40, %v7513_v63  ;;  %v5019_v62 = vadd.f32 %v5018_v60, %v5017_v29  ;;  %v5075_v30 = vadd.f32 %v5074_v17, %v5073_v33  ;;  %v7592_v32 = vadd.f32 %v7530_v39, %v5072_v3 }
 0x4b4   : > { %v5427_v44 = vadd.f32 %v5019_v62, %v7515_v21  ;;  %v7596_v51 = vadd.f32 %v7537_v11, %v5075_v30 }
 0x4b6   : > { %v5020_v12 = vpop.f32.mrb[80].mxu1  ;;  %v5076_v28 = vpop.f32.mrb[68].mxu0 }
 0x4b7   : > { %v5021_v42 = vpop.f32.mrb[81].mxu1  ;;  %v5077_v59 = vpop.f32.mrb[69].mxu0 }
 0x4b8   : > { %v5022_v14 = vadd.f32 %v5021_v42, %v5020_v12  ;;  %v5078_v37 = vadd.f32 %v5077_v59, %v5076_v28  ;;  %v5023_v35 = vpop.f32.mrb[82].mxu1  ;;  %v5079_v1 = vpop.f32.mrb[70].mxu0 }
 0x4b9   : > { %v5024_v0 = vpop.f32.mrb[83].mxu1  ;;  %v5080_v63 = vpop.f32.mrb[71].mxu0 }
 0x4ba   : > { %v5418_v45 = vadd.f32 %v5022_v14, %v7517_v20  ;;  %v5025_v36 = vadd.f32 %v5024_v0, %v5023_v35  ;;  %v5081_v39 = vadd.f32 %v5080_v63, %v5079_v1  ;;  %v5395_v46 = vadd.f32 %v7546_v5, %v5078_v37 }
 0x4bc   : > { %v5424_v21 = vadd.f32 %v5025_v36, %v7519_v16  ;;  %v7602_v11 = vadd.f32 %v7555_v57, %v5081_v39 }
 0x4be   : > { %v5082_v10 = vpop.f32.mrb[72].mxu0 }
 0x4bf   : > { %v5083_v40 = vpop.f32.mrb[73].mxu0 }
 0x4c0   : > { %v5084_v3 = vadd.f32 %v5083_v40, %v5082_v10  ;;  %v5085_v29 = vpop.f32.mrb[74].mxu0 }
 0x4c1   : > { %v5086_v33 = vpop.f32.mrb[75].mxu0 }
 0x4c2   : > { %v5087_v60 = vadd.f32 %v5086_v33, %v5085_v29  ;;  %v7605_v17 = vadd.f32 %v7564_v52, %v5084_v3  ;;  %v7624_v33 = vld [vmem:[%s8075_s1] ss:$0 sm:$0xff]  ;;  %s6207_s1 = smov [#allocation16]  }
 0x4c3   : > { %s6029_s10 = sshll.u32 %s6207_s1, 4  ;;  %s6030_s10 = int_to_ptr.vmem [resolvable:$false] %s6029_s10 }
 0x4c4   : > { %v7607_v62 = vadd.f32 %v5415_v38, %v5087_v60  ;;  %s6031_s0 = scalar_lea.vmem %s6030_s10, 2048  ;;  %p6032_p5 = scmp.lt.s32.totalorder %s7766_s24, %s6030_s10 }
 0x4c5   : > { %p6033_p6 = scmp.lt.s32.totalorder %s6031_s0, %s6025_s25 }
 0x4c6   : > { %v5088_v20 = vpop.f32.mrb[76].mxu0 }
 0x4c7   : > { %v5089_v30 = vpop.f32.mrb[77].mxu0  ;;  %p6034_p11 = por %p6033_p6, %p6032_p5 }
 0x4c8   : > { %v5090_v12 = vadd.f32 %v5089_v30, %v5088_v20  ;;  %v5091_v5 = vpop.f32.mrb[78].mxu0 }
 0x4c9   : > { %v5092_v28 = vpop.f32.mrb[79].mxu0  ;;  %p6035_p10 = pnand %p6034_p11, %p6028_p8 }
 0x4ca   : > { %v5093_v16 = vadd.f32 %v5092_v28, %v5091_v5  ;;  %v7609_v42 = vadd.f32 %v5406_v48, %v5090_v12 }
 0x4cc   : > { %v7611_v57 = vadd.f32 %v5412_v41, %v5093_v16 }
 0x4ce   : > { %v5094_v59 = vpop.f32.mrb[80].mxu0 }
 0x4cf   : > { %v5095_v14 = vpop.f32.mrb[81].mxu0 }
 0x4d0   : > { %v5096_v37 = vadd.f32 %v5095_v14, %v5094_v59  ;;  %v5097_v35 = vpop.f32.mrb[82].mxu0 }
 0x4d1   : > { %v5098_v1 = vpop.f32.mrb[83].mxu0 }
 0x4d2   : > { %v5099_v0 = vadd.f32 %v5098_v1, %v5097_v35  ;;  %v7613_v52 = vadd.f32 %v5421_v4, %v5096_v37 }
 0x4d4   : > { %v7615_v38 = vadd.f32 %v5427_v44, %v5099_v0 }
 0x4d6   : > { %v5100_v63 = vpop.f32.mrb[84].mxu0 }
 0x4d7   : > { %v5101_v36 = vpop.f32.mrb[85].mxu0 }
 0x4d8   : > { %v5102_v39 = vadd.f32 %v5101_v36, %v5100_v63  ;;  %v5103_v10 = vpop.f32.mrb[86].mxu0 }
 0x4d9   : > { %v5104_v40 = vpop.f32.mrb[87].mxu0 }
 0x4da   : > { %v5105_v3 = vadd.f32 %v5104_v40, %v5103_v10  ;;  %v7617_v48 = vadd.f32 %v5418_v45, %v5102_v39 }
 0x4dc   : > { %v7619_v41 = vadd.f32 %v5424_v21, %v5105_v3 }
 0x4de   : > { %v5320_v29 = vpop.f32.mrb[40].mxu0 }
 0x4df   : > { %v5384_v4 = vadd.f32 %v7583_v34, %v5320_v29  ;;  %v3366_v44 = vpop.f32.mrb[41].mxu0 }
 0x4e0   : > { %v5387_v60 = vadd.f32 %v7566_v50, %v3366_v44  ;;  %v5321_v20 = vpop.f32.mrb[42].mxu0 }
 0x4e1   : > { %v3454_v30 = vadd.f32 %v5384_v4, %v7624_v33  ;;  %v5390_v12 = vadd.f32 %v7588_v31, %v5321_v20  ;;  %v3369_v45 = vpop.f32.mrb[43].mxu0 }
 0x4e2   : > { %v3452_v21 = vadd.f32 %v5387_v60, %v7624_v33  ;;  %v5393_v5 = vadd.f32 %v7575_v27, %v3369_v45 }
 0x4e3   : > { %v3470_v28 = vadd.f32 3.0, %v3454_v30  ;;  %v3455_v16 = vadd.f32 %v5390_v12, %v7624_v33 }
 0x4e4   : > { %v3468_v59 = vadd.f32 3.0, %v3452_v21  ;;  %v3453_v14 = vadd.f32 %v5393_v5, %v7624_v33 }
 0x4e5   : > { %v3486_v34 = vmax.f32 %v3470_v28, 0.0  ;;  %v3471_v37 = vadd.f32 3.0, %v3455_v16 }
 0x4e6   : > { %v3484_v35 = vmax.f32 %v3468_v59, 0.0  ;;  %v3469_v50 = vadd.f32 3.0, %v3453_v14  ;;  %v5324_v1 = vpop.f32.mrb[44].mxu0 }
 0x4e7   : > { %v3502_v0 = vmin.f32 %v3486_v34, 6.0  ;;  %v3487_v63 = vmax.f32 %v3471_v37, 0.0  ;;  %v5396_v36 = vadd.f32 %v5395_v46, %v5324_v1  ;;  %v3382_v31 = vpop.f32.mrb[45].mxu0 }
 0x4e8   : > { %v3500_v39 = vmin.f32 %v3484_v35, 6.0  ;;  %v3485_v10 = vmax.f32 %v3469_v50, 0.0  ;;  %v5399_v40 = vadd.f32 %v7592_v32, %v3382_v31  ;;  %v5325_v27 = vpop.f32.mrb[46].mxu0 }
 0x4e9   : > { %v3518_v3 = vmul.f32 %v3502_v0, %v3454_v30  ;;  %v3503_v29 = vmin.f32 %v3487_v63, 6.0  ;;  %v3458_v4 = vadd.f32 %v5396_v36, %v7624_v33  ;;  %v5402_v44 = vadd.f32 %v7602_v11, %v5325_v27  ;;  %v3385_v60 = vpop.f32.mrb[47].mxu0 }
 0x4ea   : > { %v3516_v20 = vmul.f32 %v3500_v39, %v3452_v21  ;;  %v3501_v12 = vmin.f32 %v3485_v10, 6.0  ;;  %v3456_v45 = vadd.f32 %v5399_v40, %v7624_v33  ;;  %v5405_v5 = vadd.f32 %v7596_v51, %v3385_v60 }
 0x4eb   : > { %v3534_v46 = vmul.f32 0.16666667, %v3518_v3  ;;  %v3519_v28 = vmul.f32 %v3503_v29, %v3455_v16  ;;  %v3474_v59 = vadd.f32 3.0, %v3458_v4  ;;  %v3459_v34 = vadd.f32 %v5402_v44, %v7624_v33 }
 0x4ec   : > { %v3532_v32 = vmul.f32 0.16666667, %v3516_v20  ;;  %v3517_v37 = vmul.f32 %v3501_v12, %v3453_v14  ;;  %v3472_v30 = vadd.f32 3.0, %v3456_v45  ;;  %v3457_v35 = vadd.f32 %v5405_v5, %v7624_v33 }
 0x4ed   : > { %v3550_v50 = vadd.f32 %v3534_v46, %v6843_v53  ;;  %v3535_v11 = vmul.f32 0.16666667, %v3519_v28  ;;  %v3490_v1 = vmax.f32 %v3474_v59, 0.0  ;;  %v3475_v21 = vadd.f32 3.0, %v3459_v34 }
 0x4ee   : > { %v3533_v0 = vmul.f32 0.16666667, %v3517_v37  ;;  %v3488_v63 = vmax.f32 %v3472_v30, 0.0  ;;  %v3473_v36 = vadd.f32 3.0, %v3457_v35  ;;  %v5328_v31 = vpop.f32.mrb[48].mxu0  ;;  %v3548_v51 = vadd.f32 %v3532_v32, %v6827_v23 }
 0x4ef   : > { %v3551_v16 = vadd.f32 %v3535_v11, %v6846_v56  ;;  %v3506_v39 = vmin.f32 %v3490_v1, 6.0  ;;  %v3491_v10 = vmax.f32 %v3475_v21, 0.0  ;;  %v5408_v14 = vadd.f32 %v7609_v42, %v5328_v31  ;;  %v3398_v40 = vpop.f32.mrb[49].mxu0 }
 0x4f0   : > { %v3504_v27 = vmin.f32 %v3488_v63, 6.0  ;;  %v3489_v3 = vmax.f32 %v3473_v36, 0.0  ;;  %v5411_v53 = vadd.f32 %v7605_v17, %v3398_v40  ;;  %v5329_v29 = vpop.f32.mrb[50].mxu0  ;;  %v3549_v44 = vadd.f32 %v3533_v0, %v6830_v26 }
 0x4f1   : > { %v3565_v60 = vpack.c.bf16 %v3551_v16, %v3550_v50  ;;  %v3522_v20 = vmul.f32 %v3506_v39, %v3458_v4  ;;  %v3507_v12 = vmin.f32 %v3491_v10, 6.0  ;;  %v3462_v5 = vadd.f32 %v5408_v14, %v7624_v33  ;;  %v3401_v23 = vpop.f32.mrb[51].mxu0 }
 0x4f2   : > { %v3520_v46 = vmul.f32 %v3504_v27, %v3456_v45  ;;  %v3505_v56 = vmin.f32 %v3489_v3, 6.0  ;;  %v3460_v28 = vadd.f32 %v5411_v53, %v7624_v33  ;;  %v5414_v42 = vadd.f32 %v7611_v57, %v5329_v29 }
 0x4f3   : > { %v3538_v59 = vmul.f32 0.16666667, %v3522_v20  ;;  %v3523_v32 = vmul.f32 %v3507_v12, %v3459_v34  ;;  %v3478_v37 = vadd.f32 3.0, %v3462_v5  ;;  %v5417_v17 = vadd.f32 %v7607_v62, %v3401_v23 }
 0x4f4   : > { %v3536_v30 = vmul.f32 0.16666667, %v3520_v46  ;;  %v3521_v11 = vmul.f32 %v3505_v56, %v3457_v35  ;;  %v3476_v26 = vadd.f32 3.0, %v3460_v28  ;;  %v3463_v4 = vadd.f32 %v5414_v42, %v7624_v33 }
 0x4f5   : > { %v3539_v50 = vmul.f32 0.16666667, %v3523_v32  ;;  %v3494_v1 = vmax.f32 %v3478_v37, 0.0  ;;  %v3461_v21 = vadd.f32 %v5417_v17, %v7624_v33  ;;  %v3564_v45 = vpack.c.bf16 %v3549_v44, %v3548_v51 }
 0x4f6   : > { %v3537_v0 = vmul.f32 0.16666667, %v3521_v11  ;;  %v3492_v63 = vmax.f32 %v3476_v26, 0.0  ;;  %v3479_v36 = vadd.f32 3.0, %v3463_v4  ;;  %v5332_v31 = vpop.f32.mrb[52].mxu0  ;;  %v3552_v57 = vadd.f32 %v3536_v30, %v6859_v19 }
 0x4f7   : > { %v3510_v34 = vmin.f32 %v3494_v1, 6.0  ;;  %v3477_v16 = vadd.f32 3.0, %v3461_v21  ;;  %5350 = vmatprep.mubr.bf16.mxu1 %v3564_v45  ;;  %v5420_v62 = vadd.f32 %v7617_v48, %v5332_v31  ;;  %v3414_v35 = vpop.f32.mrb[53].mxu0  ;;  %v3554_v39 = vadd.f32 %v3538_v59, %v6875_v49 }
 0x4f8   : > { %v3508_v10 = vmin.f32 %v3492_v63, 6.0  ;;  %v3495_v14 = vmax.f32 %v3479_v36, 0.0  ;;  %5351 = vmatmul.mubr.bf16.vlgmr.msra.gmra.mrb[84].mxu1 %v3565_v60  ;;  %v5423_v40 = vadd.f32 %v7613_v52, %v3414_v35  ;;  %v5333_v51 = vpop.f32.mrb[54].mxu0  ;;  %v3553_v27 = vadd.f32 %v3537_v0, %v6862_v22  ;;  %v8078_v35 = vld [vmem:[#allocation52_spill] sm:$0xff] }
 0x4f9   : > { %v3526_v3 = vmul.f32 %v3510_v34, %v3462_v5  ;;  %v3493_v53 = vmax.f32 %v3477_v16, 0.0  ;;  %v3466_v19 = vadd.f32 %v5420_v62, %v7624_v33  ;;  %v5426_v29 = vadd.f32 %v7619_v41, %v5333_v51  ;;  %v3417_v44 = vpop.f32.mrb[55].mxu0  ;;  %5374 = vmatpush3.bf16.msra.mxu1 %v7532_v13  ;;  %v8077_v16 = vld [vmem:[#allocation57_spill] sm:$0xff] }
 0x4fa   : > { %v3524_v48 = vmul.f32 %v3508_v10, %v3460_v28  ;;  %v3511_v20 = vmin.f32 %v3495_v14, 6.0  ;;  %v3464_v49 = vadd.f32 %v5423_v40, %v7624_v33  ;;  %v5429_v60 = vadd.f32 %v7615_v38, %v3417_v44  ;;  %5367 = vmatprep.subr.bf16.mxu1 %v7534_v7 }
 0x4fb   : > { %v3542_v52 = vmul.f32 0.16666667, %v3526_v3  ;;  %v3509_v12 = vmin.f32 %v3493_v53, 6.0  ;;  %v3482_v22 = vadd.f32 3.0, %v3466_v19  ;;  %v3467_v5 = vadd.f32 %v5426_v29, %v7624_v33  ;;  %v5792_v3 = vld [vmem:[#allocation14 + $0x30] sm:$0xff]   ;;  %v5793_v53 = vld [vmem:[#allocation14 + $0x78] sm:$0xff]  }
 0x4fc   : > { %v3540_v23 = vmul.f32 0.16666667, %v3524_v48  ;;  %v3527_v46 = vmul.f32 %v3511_v20, %v3463_v4  ;;  %v3480_v56 = vadd.f32 3.0, %v3464_v49  ;;  %v3465_v41 = vadd.f32 %v5429_v60, %v7624_v33 }
 0x4fd   : > { %v3525_v42 = vmul.f32 %v3509_v12, %v3461_v21  ;;  %v3498_v13 = vmax.f32 %v3482_v22, 0.0  ;;  %v3483_v28 = vadd.f32 3.0, %v3467_v5  ;;  %v3566_v59 = vpack.c.bf16 %v3553_v27, %v3552_v57  ;;  %5375 = vmatpush3.bf16.msra.mxu1 %v7540_v43  ;;  %v5791_v27 = vld [vmem:[#allocation14 + $0x70] sm:$0xff]  }
 0x4fe   : > { %v3543_v32 = vmul.f32 0.16666667, %v3527_v46  ;;  %v3496_v38 = vmax.f32 %v3480_v56, 0.0  ;;  %v3481_v37 = vadd.f32 3.0, %v3465_v41  ;;  %v3555_v7 = vadd.f32 %v3539_v50, %v6878_v54  ;;  %5368 = vmatprep.subr.bf16.mxu1 %v7543_v8  ;;  %5150 = vmatprep.subr.bf16.mxu0 %v5791_v27 }
 0x4ff   : > { %v3541_v17 = vmul.f32 0.16666667, %v3525_v42  ;;  %v3514_v30 = vmin.f32 %v3498_v13, 6.0  ;;  %v3499_v11 = vmax.f32 %v3483_v28, 0.0  ;;  %5354 = vmatprep.mubr.bf16.mxu1 %v3566_v59  ;;  %v3556_v26 = vadd.f32 %v3540_v23, %v6891_v18  ;;  %5151 = vmatpush3.bf16.msra.mxu0 %v5792_v3 }
 0x500   : > { %v3512_v33 = vmin.f32 %v3496_v38, 6.0  ;;  %v3497_v4 = vmax.f32 %v3481_v37, 0.0  ;;  %v3567_v1 = vpack.c.bf16 %v3555_v7, %v3554_v39  ;;  %v3558_v21 = vadd.f32 %v3542_v52, %v6907_v58  ;;  %5152 = vmatprep.subr.bf16.mxu0 %v5793_v53  ;;  %v8084_v38 = vld [vmem:[#allocation43_spill] sm:$0xff]  ;;  %v8085_v37 = vld [vmem:[#allocation42_spill] sm:$0xff] }
 0x501   : > { %v3530_v45 = vmul.f32 %v3514_v30, %v3466_v19  ;;  %v3515_v43 = vmin.f32 %v3499_v11, 6.0  ;;  %v3557_v0 = vadd.f32 %v3541_v17, %v6894_v24  ;;  %v3559_v63 = vadd.f32 %v3543_v32, %v6910_v61  ;;  %5376 = vmatpush3.bf16.msra.mxu1 %v7549_v25  ;;  %v8076_v61 = vld [vmem:[#allocation56_spill] sm:$0xff] }
 0x502   : > { %v3528_v54 = vmul.f32 %v3512_v33, %v3464_v49  ;;  %v3513_v8 = vmin.f32 %v3497_v4, 6.0  ;;  %5355 = vmatmul.mubr.bf16.gmra.mrb[88].mxu1 %v3567_v1  ;;  %5369 = vmatprep.subr.bf16.mxu1 %v7552_v47  ;;  %v8079_v47 = vld [vmem:[#allocation53_spill] sm:$0xff]  ;;  %v8086_v7 = vpack.c.bf16 %v8084_v38, %v8085_v37  ;;  %v8097_v38 = vld [vmem:[#allocation50_spill] sm:$0xff] }
 0x503   : > { %v3546_v50 = vmul.f32 0.16666667, %v3530_v45  ;;  %v3531_v18 = vmul.f32 %v3515_v43, %v3467_v5  ;;  %v3568_v36 = vpack.c.bf16 %v3557_v0, %v3556_v26  ;;  %v3569_v31 = vpack.c.bf16 %v3559_v63, %v3558_v21 }
 0x504   : > { %v3544_v57 = vmul.f32 0.16666667, %v3528_v54  ;;  %v3529_v34 = vmul.f32 %v3513_v8, %v3465_v41 }
 0x505   : > { %v3547_v58 = vmul.f32 0.16666667, %v3531_v18  ;;  %5358 = vmatprep.mubr.bf16.mxu1 %v3568_v36  ;;  %5377 = vmatpush3.bf16.msra.mxu1 %v7558_v55  ;;  %v3562_v25 = vadd.f32 %v3546_v50, %v8076_v61  ;;  %v8080_v55 = vld [vmem:[#allocation41_spill] sm:$0xff] }
 0x506   : > { %v3545_v24 = vmul.f32 0.16666667, %v3529_v34  ;;  %5370 = vmatprep.subr.bf16.mxu1 %v7561_v15  ;;  %v3560_v39 = vadd.f32 %v3544_v57, %v8078_v35  ;;  %v8081_v15 = vld [vmem:[#allocation40_spill] sm:$0xff] }
 0x507   : > { %v3563_v62 = vadd.f32 %v3547_v58, %v8077_v16  ;;  %v8082_v51 = vpack.c.bf16 %v8080_v55, %v8081_v15  ;;  %v8088_v35 = vld [vmem:[#allocation44_spill] sm:$0xff] }
 0x508   : > { %v3561_v10 = vadd.f32 %v3545_v24, %v8079_v47 }
 0x509   : > { %v3571_v14 = vpack.c.bf16 %v3563_v62, %v3562_v25  ;;  %5378 = vmatpush3.bf16.msra.mxu1 %v7569_v2  ;;  %v5794_v2 = vld [vmem:[#allocation14 + $0x38] sm:$0xff]   ;;  %v8087_v62 = vld [vmem:[#allocation45_spill] sm:$0xff] }
 0x50a   : > { %5359 = vmatmul.mubr.bf16.gmra.mrb[92].mxu1 %v3569_v31  ;;  %v3570_v40 = vpack.c.bf16 %v3561_v10, %v3560_v39  ;;  %5371 = vmatprep.subr.bf16.mxu1 %v7572_v9  ;;  %v7690_v9 = vld [vmem:[%s8083_s17] ss:$0 sm:$0xff]  ;;  %v8089_v39 = vpack.c.bf16 %v8087_v62, %v8088_v35 }
 0x50b   : > { %5153 = vmatpush3.bf16.msra.mxu0 %v5794_v2 }
 0x50c   : > { %5362 = vmatprep.mubr.bf16.mxu1 %v3570_v40 }
 0x50d   : > { %5379 = vmatpush3.bf16.msra.mxu1 %v7578_v6 }
 0x50e   : > { %5372 = vmatprep.subr.bf16.mxu1 %v5791_v27 }
 0x511   : > { %5380 = vmatpush3.bf16.msra.mxu1 %v5792_v3 }
 0x512   : > { %5363 = vmatmul.mubr.bf16.gmra.mrb[96].mxu1 %v3571_v14  ;;  %5373 = vmatprep.subr.bf16.mxu1 %v5793_v53 }
 0x513   : > { %4027 = vmatprep.mubr.bf16.mxu1 %v8082_v51 }
 0x515   : > { %5381 = vmatpush3.bf16.msra.mxu1 %v5794_v2 }
 0x5cb   : > { %v5352_v6 = vpop.f32.mrb[84].mxu1 }
 0x5cc   : > { %v3686_v19 = vadd.f32 %v5352_v6, %v7690_v9  ;;  %v3677_v29 = vpop.f32.mrb[85].mxu1 }
 0x5cd   : > { %v3678_v44 = vadd.f32 %v7690_v9, %v3677_v29  ;;  %v5353_v48 = vpop.f32.mrb[86].mxu1 }
 0x5ce   : > { %v3758_v20 = vmul.f32 0.1, %v3686_v19  ;;  %v3689_v49 = vadd.f32 %v5353_v48, %v7690_v9  ;;  %v3680_v60 = vpop.f32.mrb[87].mxu1  ;;  %vm3742_vm8 = vcmp.ge.f32.partialorder %v3686_v19, 0.0 }
 0x5cf   : > { %v3756_v52 = vmul.f32 0.1, %v3678_v44  ;;  %v3681_v12 = vadd.f32 %v7690_v9, %v3680_v60  ;;  %vm3740_vm2 = vcmp.ge.f32.partialorder %v3678_v44, 0.0  ;;  %v8090_v60 = vld [vmem:[#allocation47_spill] sm:$0xff] }
 0x5d0   : > { %vm3743_vm5 = vcmp.ge.f32.partialorder %v3689_v49, 0.0  ;;  %v3759_v22 = vmul.f32 0.1, %v3689_v49  ;;  %v3774_v23 = vsel %vm3742_vm8, %v3686_v19, %v3758_v20 }
 0x5d1   : > { %vm3741_vm0 = vcmp.ge.f32.partialorder %v3681_v12, 0.0  ;;  %v3757_v5 = vmul.f32 0.1, %v3681_v12  ;;  %v3772_v56 = vsel %vm3740_vm2, %v3678_v44, %v3756_v52  ;;  %v8091_v52 = vld [vmem:[#allocation46_spill] sm:$0xff] }
 0x5d2   : > { %v3775_v46 = vsel %vm3743_vm5, %v3689_v49, %v3759_v22 }
 0x5d3   : > { %v3838_v41 = vpack.c.bf16 %v3775_v46, %v3774_v23  ;;  %v3773_v42 = vsel %vm3741_vm0, %v3681_v12, %v3757_v5  ;;  %v8092_v12 = vpack.c.bf16 %v8090_v60, %v8091_v52 }
 0x5d4   : > { %v3836_v13 = vpack.c.bf16 %v3773_v42, %v3772_v56 }
 0x5d5   : > { %v5356_v28 = vpop.f32.mrb[88].mxu1  ;;  %4028 = vmatmul.mubr.bf16.vlgmr.msra.gmra.mrb[100].mxu1 %v3838_v41 }
 0x5d6   : > { %v3702_v59 = vadd.f32 %v5356_v28, %v7690_v9  ;;  %v3693_v32 = vpop.f32.mrb[89].mxu1  ;;  %4020 = vmatmul.mubr.bf16.vlgmr.msra.gmra.mrb[88].mxu0 %v3836_v13  ;;  %4035 = vmatprep.mubr.bf16.mxu1 %v8086_v7  ;;  %v8093_v28 = vld [vmem:[#allocation49_spill] sm:$0xff]  ;;  %v8099_v7 = vld [vmem:[#allocation55_spill] sm:$0xff] }
 0x5d7   : > { %v3694_v17 = vadd.f32 %v7690_v9, %v3693_v32  ;;  %v5357_v30 = vpop.f32.mrb[90].mxu1 }
 0x5d8   : > { %v3762_v11 = vmul.f32 0.1, %v3702_v59  ;;  %v3705_v26 = vadd.f32 %v5357_v30, %v7690_v9  ;;  %v3696_v33 = vpop.f32.mrb[91].mxu1  ;;  %vm3746_vm6 = vcmp.ge.f32.partialorder %v3702_v59, 0.0 }
 0x5d9   : > { %v3760_v4 = vmul.f32 0.1, %v3694_v17  ;;  %v3697_v1 = vadd.f32 %v7690_v9, %v3696_v33  ;;  %vm3744_vm10 = vcmp.ge.f32.partialorder %v3694_v17, 0.0  ;;  %v7729_v33 = vld [vmem:[%s8102_s2] ss:$0 sm:$0xff] }
 0x5da   : > { %vm3747_vm3 = vcmp.ge.f32.partialorder %v3705_v26, 0.0  ;;  %v3763_v21 = vmul.f32 0.1, %v3705_v26  ;;  %v3778_v43 = vsel %vm3746_vm6, %v3702_v59, %v3762_v11  ;;  %v8094_v59 = vld [vmem:[#allocation48_spill] sm:$0xff] }
 0x5db   : > { %vm3745_vm11 = vcmp.ge.f32.partialorder %v3697_v1, 0.0  ;;  %v3761_v45 = vmul.f32 0.1, %v3697_v1  ;;  %v3776_v54 = vsel %vm3744_vm10, %v3694_v17, %v3760_v4  ;;  %v8095_v32 = vpack.c.bf16 %v8093_v28, %v8094_v59  ;;  %v8100_v17 = vld [vmem:[#allocation54_spill] sm:$0xff] }
 0x5dc   : > { %v3779_v0 = vsel %vm3747_vm3, %v3705_v26, %v3763_v21  ;;  %v8101_v30 = vpack.c.bf16 %v8099_v7, %v8100_v17 }
 0x5dd   : > { %v5360_v63 = vpop.f32.mrb[92].mxu1  ;;  %v3777_v8 = vsel %vm3745_vm11, %v3697_v1, %v3761_v45  ;;  %v3842_v50 = vpack.c.bf16 %v3779_v0, %v3778_v43 }
 0x5de   : > { %v3718_v18 = vadd.f32 %v5360_v63, %v7690_v9  ;;  %v3709_v36 = vpop.f32.mrb[93].mxu1  ;;  %v3840_v31 = vpack.c.bf16 %v3777_v8, %v3776_v54 }
 0x5df   : > { %v3710_v57 = vadd.f32 %v7690_v9, %v3709_v36  ;;  %v5361_v34 = vpop.f32.mrb[94].mxu1 }
 0x5e0   : > { %v3766_v58 = vmul.f32 0.1, %v3718_v18  ;;  %v3721_v24 = vadd.f32 %v5361_v34, %v7690_v9  ;;  %v3712_v61 = vpop.f32.mrb[95].mxu1  ;;  %4036 = vmatmul.mubr.bf16.gmra.mrb[104].mxu1 %v3840_v31  ;;  %vm3750_vm4 = vcmp.ge.f32.partialorder %v3718_v18, 0.0 }
 0x5e1   : > { %v3764_v25 = vmul.f32 0.1, %v3710_v57  ;;  %v3713_v16 = vadd.f32 %v7690_v9, %v3712_v61  ;;  %4043 = vmatprep.mubr.bf16.mxu1 %v8089_v39  ;;  %vm3748_vm9 = vcmp.ge.f32.partialorder %v3710_v57, 0.0 }
 0x5e2   : > { %vm3751_vm7 = vcmp.ge.f32.partialorder %v3721_v24, 0.0  ;;  %v3767_v47 = vmul.f32 0.1, %v3721_v24  ;;  %v3782_v14 = vsel %vm3750_vm4, %v3718_v18, %v3766_v58 }
 0x5e3   : > { %vm3749_vm12 = vcmp.ge.f32.partialorder %v3713_v16, 0.0  ;;  %v3765_v10 = vmul.f32 0.1, %v3713_v16  ;;  %v3780_v15 = vsel %vm3748_vm9, %v3710_v57, %v3764_v25 }
 0x5e4   : > { %v3783_v40 = vsel %vm3751_vm7, %v3721_v24, %v3767_v47 }
 0x5e5   : > { %v5364_v55 = vpop.f32.mrb[96].mxu1  ;;  %v3781_v51 = vsel %vm3749_vm12, %v3713_v16, %v3765_v10  ;;  %v3846_v27 = vpack.c.bf16 %v3783_v40, %v3782_v14 }
 0x5e6   : > { %v3734_v3 = vadd.f32 %v5364_v55, %v7690_v9  ;;  %v3725_v53 = vpop.f32.mrb[97].mxu1  ;;  %v3844_v2 = vpack.c.bf16 %v3781_v51, %v3780_v15 }
 0x5e7   : > { %v3726_v6 = vadd.f32 %v7690_v9, %v3725_v53  ;;  %v5365_v19 = vpop.f32.mrb[98].mxu1 }
 0x5e8   : > { %v3770_v29 = vmul.f32 0.1, %v3734_v3  ;;  %v3737_v44 = vadd.f32 %v5365_v19, %v7690_v9  ;;  %v3728_v48 = vpop.f32.mrb[99].mxu1  ;;  %4044 = vmatmul.mubr.bf16.gmra.mrb[108].mxu1 %v3842_v50  ;;  %vm3754_vm13 = vcmp.ge.f32.partialorder %v3734_v3, 0.0 }
 0x5e9   : > { %v3768_v20 = vmul.f32 0.1, %v3726_v6  ;;  %v3729_v49 = vadd.f32 %v7690_v9, %v3728_v48  ;;  %4051 = vmatprep.mubr.bf16.mxu1 %v8092_v12  ;;  %vm3752_vm14 = vcmp.ge.f32.partialorder %v3726_v6, 0.0  ;;  %v8096_v9 = vld [vmem:[#allocation51_spill] sm:$0xff] }
 0x5ea   : > { %vm3755_vm15 = vcmp.ge.f32.partialorder %v3737_v44, 0.0  ;;  %v3771_v22 = vmul.f32 0.1, %v3737_v44  ;;  %v3786_v23 = vsel %vm3754_vm13, %v3734_v3, %v3770_v29  ;;  %v8098_v37 = vpack.c.bf16 %v8096_v9, %v8097_v38 }
 0x5eb   : > { %vm3753_vm1 = vcmp.ge.f32.partialorder %v3729_v49, 0.0  ;;  %v3769_v5 = vmul.f32 0.1, %v3729_v49  ;;  %v3784_v56 = vsel %vm3752_vm14, %v3726_v6, %v3768_v20 }
 0x5ec   : > { %v3787_v46 = vsel %vm3755_vm15, %v3737_v44, %v3771_v22 }
 0x5ed   : > { %v3785_v41 = vsel %vm3753_vm1, %v3729_v49, %v3769_v5  ;;  %v3850_v42 = vpack.c.bf16 %v3787_v46, %v3786_v23 }
 0x5ee   : > { %v3848_v13 = vpack.c.bf16 %v3785_v41, %v3784_v56 }
 0x5f0   : > { %4052 = vmatmul.mubr.bf16.gmra.mrb[112].mxu1 %v3844_v2 }
 0x5f1   : > { %4059 = vmatprep.mubr.bf16.mxu1 %v8095_v32 }
 0x5f8   : > { %4060 = vmatmul.mubr.bf16.gmra.mrb[116].mxu1 %v3846_v27 }
 0x5f9   : > { %4067 = vmatprep.mubr.bf16.mxu1 %v8098_v37 }
 0x600   : > { %4068 = vmatmul.mubr.bf16.gmra.mrb[120].mxu1 %v3848_v13 }
 0x601   : > { %4075 = vmatprep.mubr.bf16.mxu1 %v8101_v30 }
 0x608   : > { %4076 = vmatmul.mubr.bf16.gmra.mrb[124].mxu1 %v3850_v42 }
 0x6a8   : > { %v5160_v11 = vpop.f32.mrb[100].mxu1 }
 0x6a9   : > { %v5154_v26 = vpop.f32.mrb[88].mxu0  ;;  %v5161_v4 = vpop.f32.mrb[101].mxu1 }
 0x6aa   : > { %v5162_v1 = vadd.f32 %v5161_v4, %v5160_v11  ;;  %v5155_v21 = vpop.f32.mrb[89].mxu0  ;;  %v5163_v45 = vpop.f32.mrb[102].mxu1 }
 0x6ab   : > { %v5156_v43 = vadd.f32 %v5155_v21, %v5154_v26  ;;  %v5157_v0 = vpop.f32.mrb[90].mxu0  ;;  %v5164_v63 = vpop.f32.mrb[103].mxu1 }
 0x6ac   : > { %v4030_v54 = vadd.f32 %v5162_v1, %v7729_v33  ;;  %v5165_v8 = vadd.f32 %v5164_v63, %v5163_v45  ;;  %v5158_v50 = vpop.f32.mrb[91].mxu0 }
 0x6ad   : > { %v4022_v18 = vadd.f32 %v5156_v43, %v7729_v33  ;;  %v5159_v36 = vadd.f32 %v5158_v50, %v5157_v0 }
 0x6ae   : > { %v4086_v31 = vadd.f32 3.0, %v4030_v54  ;;  %v4033_v57 = vadd.f32 %v5165_v8, %v7729_v33 }
 0x6af   : > { %v4084_v34 = vadd.f32 3.0, %v4022_v18  ;;  %v4025_v58 = vadd.f32 %v5159_v36, %v7729_v33 }
 0x6b0   : > { %v4102_v24 = vmax.f32 %v4086_v31, 0.0  ;;  %v4087_v61 = vadd.f32 3.0, %v4033_v57 }
 0x6b1   : > { %v4100_v25 = vmax.f32 %v4084_v34, 0.0  ;;  %v4085_v16 = vadd.f32 3.0, %v4025_v58 }
 0x6b2   : > { %v4118_v62 = vmin.f32 %v4102_v24, 6.0  ;;  %v4103_v35 = vmax.f32 %v4087_v61, 0.0 }
 0x6b3   : > { %v4116_v39 = vmin.f32 %v4100_v25, 6.0  ;;  %v4101_v47 = vmax.f32 %v4085_v16, 0.0  ;;  %v5166_v10 = vpop.f32.mrb[104].mxu1 }
 0x6b4   : > { %v4134_v14 = vmul.f32 %v4118_v62, %v4030_v54  ;;  %v4119_v40 = vmin.f32 %v4103_v35, 6.0  ;;  %v5167_v55 = vpop.f32.mrb[105].mxu1 }
 0x6b5   : > { %v4132_v15 = vmul.f32 %v4116_v39, %v4022_v18  ;;  %v4117_v51 = vmin.f32 %v4101_v47, 6.0  ;;  %v5168_v27 = vadd.f32 %v5167_v55, %v5166_v10  ;;  %v5169_v3 = vpop.f32.mrb[106].mxu1 }
 0x6b6   : > { %v4135_v53 = vmul.f32 %v4119_v40, %v4033_v57  ;;  %v5170_v2 = vpop.f32.mrb[107].mxu1  ;;  %v4150_v44 = vmul.f32 0.16666667, %v4134_v14 }
 0x6b7   : > { %v4133_v6 = vmul.f32 %v4117_v51, %v4025_v58  ;;  %v4038_v19 = vadd.f32 %v5168_v27, %v7729_v33  ;;  %v5171_v29 = vadd.f32 %v5170_v2, %v5169_v3  ;;  %v4148_v20 = vmul.f32 0.16666667, %v4132_v15 }
 0x6b8   : > { %v4151_v48 = vmul.f32 0.16666667, %v4135_v53 }
 0x6b9   : > { %v4149_v49 = vmul.f32 0.16666667, %v4133_v6  ;;  %v4088_v60 = vadd.f32 3.0, %v4038_v19  ;;  %v4041_v52 = vadd.f32 %v5171_v29, %v7729_v33 }
 0x6ba   : > { %v4825_v12 = vpack.c.bf16 %v4151_v48, %v4150_v44 }
 0x6bb   : > { %v4820_v22 = vpack.c.bf16 %v4149_v49, %v4148_v20  ;;  %v4104_v5 = vmax.f32 %v4088_v60, 0.0  ;;  %v4089_v23 = vadd.f32 3.0, %v4041_v52  ;;  %v5172_v46 = vpop.f32.mrb[108].mxu1 }
 0x6bc   : > { %4857 = vst [vmem:[%s7739_s6 + $0x8] sm:$0xff] %v4825_v12   ;;  %v5173_v56 = vpop.f32.mrb[109].mxu1 }
 0x6bd   : > { %4821 = vst [vmem:[%s7739_s6] sm:$0xff] %v4820_v22   ;;  %v4120_v41 = vmin.f32 %v4104_v5, 6.0  ;;  %v4105_v42 = vmax.f32 %v4089_v23, 0.0  ;;  %v5174_v13 = vadd.f32 %v5173_v56, %v5172_v46  ;;  %v5175_v28 = vpop.f32.mrb[110].mxu1 }
 0x6be   : > { %v5176_v59 = vpop.f32.mrb[111].mxu1 }
 0x6bf   : > { %v4136_v32 = vmul.f32 %v4120_v41, %v4038_v19  ;;  %v4121_v9 = vmin.f32 %v4105_v42, 6.0  ;;  %v4046_v38 = vadd.f32 %v5174_v13, %v7729_v33  ;;  %v5177_v37 = vadd.f32 %v5176_v59, %v5175_v28 }
 0x6c1   : > { %v4137_v7 = vmul.f32 %v4121_v9, %v4041_v52  ;;  %v4090_v17 = vadd.f32 3.0, %v4046_v38  ;;  %v4049_v30 = vadd.f32 %v5177_v37, %v7729_v33  ;;  %v4152_v11 = vmul.f32 0.16666667, %v4136_v32 }
 0x6c3   : > { %v4153_v26 = vmul.f32 0.16666667, %v4137_v7  ;;  %v4106_v4 = vmax.f32 %v4090_v17, 0.0  ;;  %v4091_v1 = vadd.f32 3.0, %v4049_v30  ;;  %v5178_v21 = vpop.f32.mrb[112].mxu1 }
 0x6c4   : > { %v5179_v45 = vpop.f32.mrb[113].mxu1 }
 0x6c5   : > { %v4830_v43 = vpack.c.bf16 %v4153_v26, %v4152_v11  ;;  %v4122_v0 = vmin.f32 %v4106_v4, 6.0  ;;  %v4107_v63 = vmax.f32 %v4091_v1, 0.0  ;;  %v5180_v54 = vadd.f32 %v5179_v45, %v5178_v21  ;;  %v5181_v8 = vpop.f32.mrb[114].mxu1 }
 0x6c6   : > { %v5182_v50 = vpop.f32.mrb[115].mxu1 }
 0x6c7   : > { %4858 = vst [vmem:[%s7739_s6 + $0x10] sm:$0xff] %v4830_v43   ;;  %v4138_v18 = vmul.f32 %v4122_v0, %v4046_v38  ;;  %v4123_v36 = vmin.f32 %v4107_v63, 6.0  ;;  %v4054_v31 = vadd.f32 %v5180_v54, %v7729_v33  ;;  %v5183_v57 = vadd.f32 %v5182_v50, %v5181_v8 }
 0x6c9   : > { %v4139_v34 = vmul.f32 %v4123_v36, %v4049_v30  ;;  %v4092_v58 = vadd.f32 3.0, %v4054_v31  ;;  %v4057_v24 = vadd.f32 %v5183_v57, %v7729_v33  ;;  %v4154_v61 = vmul.f32 0.16666667, %v4138_v18 }
 0x6cb   : > { %v4155_v25 = vmul.f32 0.16666667, %v4139_v34  ;;  %v4108_v16 = vmax.f32 %v4092_v58, 0.0  ;;  %v4093_v62 = vadd.f32 3.0, %v4057_v24  ;;  %v5184_v35 = vpop.f32.mrb[116].mxu1 }
 0x6cc   : > { %v5185_v39 = vpop.f32.mrb[117].mxu1 }
 0x6cd   : > { %v4835_v47 = vpack.c.bf16 %v4155_v25, %v4154_v61  ;;  %v4124_v10 = vmin.f32 %v4108_v16, 6.0  ;;  %v4109_v14 = vmax.f32 %v4093_v62, 0.0  ;;  %v5186_v40 = vadd.f32 %v5185_v39, %v5184_v35  ;;  %v5187_v55 = vpop.f32.mrb[118].mxu1 }
 0x6ce   : > { %v5188_v15 = vpop.f32.mrb[119].mxu1 }
 0x6cf   : > { %4859 = vst [vmem:[%s7739_s6 + $0x18] sm:$0xff] %v4835_v47   ;;  %v4140_v51 = vmul.f32 %v4124_v10, %v4054_v31  ;;  %v4125_v27 = vmin.f32 %v4109_v14, 6.0  ;;  %v4062_v3 = vadd.f32 %v5186_v40, %v7729_v33  ;;  %v5189_v53 = vadd.f32 %v5188_v15, %v5187_v55 }
 0x6d1   : > { %v4141_v2 = vmul.f32 %v4125_v27, %v4057_v24  ;;  %v4094_v6 = vadd.f32 3.0, %v4062_v3  ;;  %v4065_v19 = vadd.f32 %v5189_v53, %v7729_v33  ;;  %v4156_v29 = vmul.f32 0.16666667, %v4140_v51 }
 0x6d3   : > { %v4157_v44 = vmul.f32 0.16666667, %v4141_v2  ;;  %v4110_v48 = vmax.f32 %v4094_v6, 0.0  ;;  %v4095_v20 = vadd.f32 3.0, %v4065_v19  ;;  %v5190_v49 = vpop.f32.mrb[120].mxu1 }
 0x6d4   : > { %v5191_v60 = vpop.f32.mrb[121].mxu1 }
 0x6d5   : > { %v4840_v52 = vpack.c.bf16 %v4157_v44, %v4156_v29  ;;  %v4126_v12 = vmin.f32 %v4110_v48, 6.0  ;;  %v4111_v22 = vmax.f32 %v4095_v20, 0.0  ;;  %v5192_v5 = vadd.f32 %v5191_v60, %v5190_v49  ;;  %v5193_v23 = vpop.f32.mrb[122].mxu1 }
 0x6d6   : > { %v5194_v46 = vpop.f32.mrb[123].mxu1 }
 0x6d7   : > { %4860 = vst [vmem:[%s7739_s6 + $0x20] sm:$0xff] %v4840_v52   ;;  %v4142_v56 = vmul.f32 %v4126_v12, %v4062_v3  ;;  %v4127_v41 = vmin.f32 %v4111_v22, 6.0  ;;  %v4070_v42 = vadd.f32 %v5192_v5, %v7729_v33  ;;  %v5195_v13 = vadd.f32 %v5194_v46, %v5193_v23 }
 0x6d9   : > { %v4143_v28 = vmul.f32 %v4127_v41, %v4065_v19  ;;  %v4096_v59 = vadd.f32 3.0, %v4070_v42  ;;  %v4073_v32 = vadd.f32 %v5195_v13, %v7729_v33  ;;  %v4158_v9 = vmul.f32 0.16666667, %v4142_v56 }
 0x6db   : > { %v4159_v38 = vmul.f32 0.16666667, %v4143_v28  ;;  %v4112_v37 = vmax.f32 %v4096_v59, 0.0  ;;  %v4097_v7 = vadd.f32 3.0, %v4073_v32  ;;  %v5196_v17 = vpop.f32.mrb[124].mxu1 }
 0x6dc   : > { %v5197_v30 = vpop.f32.mrb[125].mxu1 }
 0x6dd   : > { %v4845_v11 = vpack.c.bf16 %v4159_v38, %v4158_v9  ;;  %v4128_v26 = vmin.f32 %v4112_v37, 6.0  ;;  %v4113_v4 = vmax.f32 %v4097_v7, 0.0  ;;  %v5198_v1 = vadd.f32 %v5197_v30, %v5196_v17  ;;  %v5199_v21 = vpop.f32.mrb[126].mxu1 }
 0x6de   : > { %v5200_v45 = vpop.f32.mrb[127].mxu1 }
 0x6df   : > { %4861 = vst [vmem:[%s7739_s6 + $0x28] sm:$0xff] %v4845_v11   ;;  %v4144_v43 = vmul.f32 %v4128_v26, %v4070_v42  ;;  %v4129_v0 = vmin.f32 %v4113_v4, 6.0  ;;  %v4078_v63 = vadd.f32 %v5198_v1, %v7729_v33  ;;  %v5201_v54 = vadd.f32 %v5200_v45, %v5199_v21 }
 0x6e1   : > { %v4145_v8 = vmul.f32 %v4129_v0, %v4073_v32  ;;  %v4098_v50 = vadd.f32 3.0, %v4078_v63  ;;  %v4081_v18 = vadd.f32 %v5201_v54, %v7729_v33  ;;  %v4160_v36 = vmul.f32 0.16666667, %v4144_v43 }
 0x6e3   : > { %v4161_v31 = vmul.f32 0.16666667, %v4145_v8  ;;  %v4114_v57 = vmax.f32 %v4098_v50, 0.0  ;;  %v4099_v34 = vadd.f32 3.0, %v4081_v18 }
 0x6e5   : > { %v4850_v58 = vpack.c.bf16 %v4161_v31, %v4160_v36  ;;  %v4130_v24 = vmin.f32 %v4114_v57, 6.0  ;;  %v4115_v61 = vmax.f32 %v4099_v34, 0.0 }
 0x6e7   : > { %4862 = vst [vmem:[%s7739_s6 + $0x30] sm:$0xff] %v4850_v58   ;;  %v4146_v25 = vmul.f32 %v4130_v24, %v4078_v63  ;;  %v4131_v16 = vmin.f32 %v4115_v61, 6.0 }
 0x6e9   : > { %v4147_v62 = vmul.f32 %v4131_v16, %v4081_v18  ;;  %v4162_v33 = vmul.f32 0.16666667, %v4146_v25 }
 0x6eb   : > { %v4163_v35 = vmul.f32 0.16666667, %v4147_v62 }
 0x6ed   : > { %v4855_v39 = vpack.c.bf16 %v4163_v35, %v4162_v33 }
 0x6ef   : > { %4863 = vst [vmem:[%s7739_s6 + $0x38] sm:$0xff] %v4855_v39  }
 0x6f0   : > { %6038 = shalt.err (!%p6035_p10)
}
 0x6f1   : > { %s6039_s17 = scalar_lea.hbm %s7764_s11, 1024  ;;  %s6043_s2 = scalar_lea.hbm %s8104_s4, 4096 }
 0x6f2   : > { %p6040_p13 = scmp.ne.s32.totalorder %s7764_s11, %s6039_s17  ;;  %p6044_p3 = scmp.lt.u32.totalorder %s7764_s11, %s8104_s4 }
 0x6f3   : > { %p6045_p4 = scmp.lt.u32.totalorder %s6043_s2, %s6039_s17  ;;  %p6047_p7 = scmp.lt.u32.totalorder %s6039_s17, %s7764_s11 }
 0x6f4   : > { %p6041_p2 = pnand %p6040_p13, %p8105_p1 }
 0x6f5   : > { %p6046_p0 = por %p6045_p4, %p6044_p3 }
 0x6f6   : > { %p6042_p12 = pneg %p6041_p2 }
 0x6f7   : > { %p6048_p9 = por %p6047_p7, %p6046_p0 }
 0x6f9   : > { %p6049_p8 = pnand %p6048_p9, %p6042_p12 }
 0x6fb   : > { %6052 = shalt.err (!%p6049_p8)
}
 0x6fc   : > { %s6208_s9 = smov 64   ;;  %s6209_s14 = smov 4  }
 0x6fd   : > { %5488 = dma.vmem_to_hbm [thread:$0]  (%p8105_p1), %s7766_s24, 1024, %s7764_s11, %s4245_s7, %s6208_s9, %s6208_s9, %s6209_s14  }
 0x6fe PF: > { %p5531_p5 = scmp.ge.s32.totalorder %s6191_s26, 2  ;;  %s4275_s22 = sand.u32 1, %s6163_s19  }
 0x6ff   : > { %p8106_p6 = scmp.ne.s32.totalorder %s7975_s23, 0  ;;  %s4276_s29 = scalar_lea.sflag [#allocation4], %s4275_s22 }
 0x701   : > { %p5517_p11 = pnand %p5531_p5, %p8106_p6 }
 0x703   : > { %6134 = dma.done.wait (!%p5517_p11), %s4276_s29, 1024  }
 0x704   : > { %6136 = vsyncadd (!%p5517_p11), %s4276_s29, 4294966272  ;;  %s36_s26 = sadd.s32 1, %s6191_s26   ;;  %s8108_s29 = sld [smem:[#allocation25_spill]] }
 0x705   : > { %p7798_p10 = scmp.ge.s32.totalorder %s36_s26, 6   ;;  %s8109_s30 = sld [smem:[#allocation26_spill]] }
 0x706   : > { %s8110_s8 = sld [smem:[#allocation27_spill]]  ;;  %s8111_s24 = smov %s6464_s16 }
 0x707   : > { %s8112_s11 = sld [smem:[#allocation38_spill]]  ;;  %s8113_s22 = sld [smem:[#allocation30_spill]] }
 0x708   : > { %s8114_s23 = sld [smem:[#allocation31_spill]]  ;;  %s8115_s7 = sld [smem:[#allocation33_spill]] }
 0x709   : > { %s8116_s25 = sld [smem:[#allocation34_spill]]  ;;  %s8117_s15 = smov %s8140_s3 }
 0x70a   : > { %s8119_s17 = smov %s6159_s18  ;;  %s8120_s18 = smov %s8111_s24 }
 0x70b   : > { %s8121_s19 = smov %s6167_s20  ;;  %s8122_s20 = smov %s6171_s21 }
 0x70c   : > { %s8118_s16 = smov %s8110_s8  ;;  %35 = sbr.rel (!%p7798_p10) target bundleno = 31 (0x1f), region = 167 }
 0x70d   : > { %s8123_s21 = smov %s8112_s11 }
 0x70e   : > { %s8124_s24 = smov %s8115_s7 }
 0x713   :  { %4281 = vsyncpa [#allocation3], 1 }
 0x714   :  { %4283 = vsyncpa [#allocation3 + $0x1], 1 }
 0x715   :  { %4284 = vsyncpa [#allocation6], 1 }
 0x716   :  { %4286 = vsyncpa [#allocation6 + $0x1], 1 }
 0x717   :  { %4287 = vsyncpa [#allocation9], 1 }
 0x718   :  { %4288 = vsyncpa [#allocation12], 1 }
 0x719   :  { %4289 = vsyncpa [#allocation15], 1 }
 0x71a   :  { %4290 = vsyncpa [#allocation4], 1 }
 0x71b   :  { %4292 = vsyncpa [#allocation4 + $0x1], 1 }

</bundles_post_ra>
